<compile_context>
chip_gen: v7x
topology: tpu7x:2x2x1
jax: 0.10.0
libtpu: 0.0.40
codegen_flags: <defaults>
</compile_context>

<pallas_src>
import numpy as np
import jax
import jax.numpy as jnp
from jax.experimental import pallas as pl
from jax.experimental.pallas import tpu as pltpu

PIANO_SAMPLES = 2048                    # global `piano_samples` of the source module
N = 512                                 # FFT / frame size
HOP = 256                               # overlap-add hop
F_BINS = 257                            # rfft bins for N = 512
NUM_BLOCKS = PIANO_SAMPLES // HOP       # loop trip count (while i*256 < piano_samples)
N_FRAMES = PIANO_SAMPLES // 256 + 2     # parameter frame count from __init__


# ----------------------------------------------------------------------------
# Host-side (float64) DFT matrices and filter composition.
# torch.fft.rfft/irfft (ortho) semantics: c2r ignores the imaginary parts of the
# DC and Nyquist bins — baked into the c/d vectors of Vr/Vi, hence preserved by
# the composition.
# ----------------------------------------------------------------------------
def _build_dft_matrices():
    n = np.arange(N)[:, None]
    k = np.arange(F_BINS)[None, :]
    ang = 2.0 * np.pi * ((n * k) % N) / N
    wr = np.cos(ang) / np.sqrt(N)            # (N, F)  Re(rfft)
    wi = -np.sin(ang) / np.sqrt(N)           # (N, F)  Im(rfft)

    kk = np.arange(F_BINS)[:, None]
    nn = np.arange(N)[None, :]
    ang2 = 2.0 * np.pi * ((kk * nn) % N) / N
    c = np.full((F_BINS, 1), 2.0); c[0] = 1.0; c[-1] = 1.0
    d = np.full((F_BINS, 1), 2.0); d[0] = 0.0; d[-1] = 0.0   # drop Im @ DC/Nyquist
    vr = c * np.cos(ang2) / np.sqrt(N)       # (F, N)
    vi = -d * np.sin(ang2) / np.sqrt(N)      # (F, N)
    return wr, wi, vr, vi                    # float64


def compose_transfer_matrix(tr, ti, wr, wi, vr, vi):
    """Dense (512,512) M with  x @ M == irfft(rfft(x, ortho) * (tr + i*ti), ortho)."""
    a = wr * tr[None, :] - wi * ti[None, :]
    b = wr * ti[None, :] + wi * tr[None, :]
    return a @ vr + b @ vi


# ----------------------------------------------------------------------------
# Pallas kernel: one invocation runs the whole waveguide.
#   impulses = (noise * exc) @ M_exc                (batched, all 8 sublanes)
#   state_i  = impulse_i + new_block_{i-1}
#   out[i]   = state_i[:HOP] + state_{i-1}[HOP:]    (50% overlap-add, row i)
#   new_block_i = state_i @ M_fb_i                  (hamming folded into M_fb;
#                                                    skipped for the last block)
# ----------------------------------------------------------------------------
def karplus_kernel(noise_ref, exc_ref, m_exc_ref, m_fb_ref, out_ref, imp_ref):
    mxu_dtype = m_exc_ref.dtype   # bf16 in the perf config, f32 in the check config

    # Batched excitation prologue: all NUM_BLOCKS impulses in one MXU matmul.
    e = noise_ref[...] * exc_ref[...]                               # (B, N) f32
    impulses = jnp.dot(e.astype(mxu_dtype), m_exc_ref[...],
                       preferred_element_type=jnp.float32)          # (B, N) f32
    # Park in VMEM scratch so the serial loop reads rows instead of
    # sublane-extracting from a live vreg block (keeps XLU off the crit path).
    imp_ref[...] = impulses

    # Sequential recurrence, fully unrolled (static trip count, static slices).
    prev_nb = jnp.zeros((1, N), jnp.float32)                        # new_block_{i-1}
    prev_tail = jnp.zeros((1, HOP), jnp.float32)                    # state_{i-1}[HOP:]
    for i in range(NUM_BLOCKS):
        state = imp_ref[i:i + 1, :] + prev_nb                       # (1, N) f32
        out_ref[i:i + 1, :] = state[:, :HOP] + prev_tail            # OLA segment i
        if i + 1 < NUM_BLOCKS:                                      # last new_block is
            prev_nb = jnp.dot(state.astype(mxu_dtype), m_fb_ref[i],  # truncated away
                              preferred_element_type=jnp.float32)   # window pre-folded
        prev_tail = state[:, HOP:]


def karplus_strong_pallas(noise, exc_blocks, m_exc, m_fb):
    # Whole-array VMEM specs, no grid: single-buffered constants, no pipeline.
    vmem_spec = pl.BlockSpec(memory_space=pltpu.MemorySpace.VMEM)
    out = pl.pallas_call(
        karplus_kernel,
        out_shape=jax.ShapeDtypeStruct((NUM_BLOCKS, HOP), jnp.float32),
        in_specs=[
            vmem_spec,   # noise             (B, N)       f32
            vmem_spec,   # excitation blocks (B, N)       f32
            vmem_spec,   # M_exc             (N, N)       bf16/f32
            vmem_spec,   # M_fb              (B-1, N, N)  bf16/f32 (window folded)
        ],
        out_specs=vmem_spec,
        scratch_shapes=[pltpu.VMEM((NUM_BLOCKS, N), jnp.float32)],  # impulses
        compiler_params=pltpu.CompilerParams(
            vmem_limit_bytes=32 * 1024 * 1024),
    )(noise, exc_blocks, m_exc, m_fb)
    return out.reshape(-1)                                   # (piano_samples,)


# ----------------------------------------------------------------------------
# Glue (plain JAX / numpy): parameters, F.upsample(linear), block slicing.
# ----------------------------------------------------------------------------
def upsample_linear_torch(x, scale):
    """F.interpolate(mode='linear', align_corners=False) on a 1-D signal."""
    L = x.shape[0]
    out_len = L * scale
    j = jnp.arange(out_len, dtype=jnp.float32)
    src = (j + 0.5) / scale - 0.5
    src = jnp.maximum(src, 0.0)
    i0 = jnp.minimum(jnp.floor(src).astype(jnp.int32), L - 1)
    i1 = jnp.minimum(i0 + 1, L - 1)
    w = src - i0.astype(jnp.float32)
    return x[i0] * (1.0 - w) + x[i1] * w


def numpy_reference(noise, exc_blocks, tf_c, etf_c, window):
    """Pure-numpy float64 re-implementation of the PyTorch forward."""
    B = NUM_BLOCKS
    frames = []
    for i in range(B):
        e = noise[i].astype(np.float64) * exc_blocks[i].astype(np.float64)
        spec = np.fft.rfft(e, norm="ortho") * etf_c
        imp = np.fft.irfft(spec, norm="ortho")
        if not frames:
            frames.append(imp)
        else:
            frames[-1] = frames[-1] + imp
        spec = np.fft.rfft(frames[-1], norm="ortho") * tf_c[i]
        nb = np.fft.irfft(spec, norm="ortho") * window.astype(np.float64)
        frames.append(nb)
    frames = np.stack(frames)                    # (B+1, 512)
    out = np.zeros((B + 2) * HOP, np.float64)
    for j in range(frames.shape[0]):             # 50%-overlap-add, hop = 256
        out[j * HOP:j * HOP + N] += frames[j]
    return out[:PIANO_SAMPLES]


if __name__ == "__main__":
    key = jax.random.PRNGKey(0)
    k_env, k_imp, k_noise = jax.random.split(key, 3)

    # Parameters (deterministic, shapes per __init__).
    excitation_env = jax.random.uniform(k_env, (N_FRAMES * 32,),
                                        minval=0.0, maxval=0.01, dtype=jnp.float32)
    _impulse_param = jax.random.uniform(k_imp, (512,), minval=-1.0, maxval=1.0,
                                        dtype=jnp.float32)  # unused (learned_impulse=False)
    tf_re = np.full((N_FRAMES, F_BINS), 0.2, np.float64)
    tf_im = np.full((N_FRAMES, F_BINS), 0.2, np.float64)
    etf_re = np.full((F_BINS,), 0.2, np.float64)
    etf_im = np.full((F_BINS,), 0.2, np.float64)

    # Per-forward random noise (torch.zeros(512).uniform_(-1,1) per block), made
    # deterministic with jax.random outside the kernel.
    noise = jax.random.uniform(k_noise, (NUM_BLOCKS, N), minval=-1.0, maxval=1.0,
                               dtype=jnp.float32)

    # excitation = (env**2) upsampled x8 (linear), sliced into 512-sample windows, hop 256.
    excitation = np.asarray(upsample_linear_torch(excitation_env ** 2, 256 // 32))
    idx = np.arange(NUM_BLOCKS)[:, None] * HOP + np.arange(N)[None, :]
    exc_blocks = excitation[idx].astype(np.float32)                  # (B, 512)

    # hamming_window(512), periodic=True (torch default).
    nwin = np.arange(N)
    window = 0.54 - 0.46 * np.cos(2.0 * np.pi * nwin / N)            # float64

    # Precompose the spectral chains into dense matrices (float64 on host).
    # Only NUM_BLOCKS-1 feedback matrices are needed: the last new_block is
    # truncated away by out[:piano_samples], so don't build/ship it.
    wr, wi, vr, vi = _build_dft_matrices()
    m_exc = compose_transfer_matrix(etf_re, etf_im, wr, wi, vr, vi)  # (512, 512)
    m_fb = np.stack([compose_transfer_matrix(tf_re[i], tf_im[i], wr, wi, vr, vi)
                     * window[None, :]
                     for i in range(NUM_BLOCKS - 1)])                # (B-1, 512, 512)

    noise_j = jnp.asarray(noise)
    exc_j = jnp.asarray(exc_blocks)

    # Float64 reference of the torch loop.
    # TODO(synk): `overlap_add` is undefined in the source; assumed standard
    # 50%-overlap-add (hop = frame//2) without an additional synthesis window.
    ref = numpy_reference(np.asarray(noise), exc_blocks,
                          tf_re[:NUM_BLOCKS] + 1j * tf_im[:NUM_BLOCKS],
                          etf_re + 1j * etf_im, window)

    # Perf config: bf16 MXU operands, f32 accumulation / recurrence state.
    out_bf16 = jax.block_until_ready(
        karplus_strong_pallas(noise_j, exc_j,
                              jnp.asarray(m_exc, jnp.bfloat16),
                              jnp.asarray(m_fb, jnp.bfloat16)))
    assert out_bf16.shape == (PIANO_SAMPLES,) and out_bf16.dtype == jnp.float32
    # Whole-signal relative-L2 check (bf16 operand rounding vs float64 reference).
    rel_l2 = float(np.linalg.norm(np.asarray(out_bf16, np.float64) - ref)
                   / np.linalg.norm(ref))
    assert rel_l2 < 5e-2, f"bf16 relative L2 error too large: {rel_l2}"

    # Tight correctness check with f32 matrices (same kernel, same structure).
    out_f32 = jax.block_until_ready(
        karplus_strong_pallas(noise_j, exc_j,
                              jnp.asarray(m_exc, jnp.float32),
                              jnp.asarray(m_fb, jnp.float32)))
    np.testing.assert_allclose(np.asarray(out_f32), ref, rtol=5e-2, atol=1e-9)

    print("KERNEL_OK")
</pallas_src>

<mosaic_0001>
module attributes {stable_mosaic.version = 11 : i64} {
  func.func @karplus_kernel(%arg0: memref<8x512xf32, #tpu.memory_space<vmem>>, %arg1: memref<8x512xf32, #tpu.memory_space<vmem>>, %arg2: memref<512x512xbf16, #tpu.memory_space<vmem>>, %arg3: memref<7x512x512xbf16, #tpu.memory_space<vmem>>, %arg4: memref<8x256xf32, #tpu.memory_space<vmem>>, %arg5: memref<8x512xf32, #tpu.memory_space<vmem>>) attributes {dimension_semantics = [], scalar_prefetch = 0 : i64, scratch_operands = 1 : i64, tpu.core_type = #tpu.core_type<tc>} {
    %c0 = arith.constant 0 : index
    %c0_0 = arith.constant 0 : index
    %0 = vector.load %arg0[%c0, %c0_0] : memref<8x512xf32, #tpu.memory_space<vmem>>, vector<8x512xf32>
    %c0_1 = arith.constant 0 : index
    %c0_2 = arith.constant 0 : index
    %1 = vector.load %arg1[%c0_1, %c0_2] : memref<8x512xf32, #tpu.memory_space<vmem>>, vector<8x512xf32>
    %2 = arith.mulf %0, %1 : vector<8x512xf32>
    %3 = arith.truncf %2 : vector<8x512xf32> to vector<8x512xbf16>
    %c0_3 = arith.constant 0 : index
    %c0_4 = arith.constant 0 : index
    %4 = vector.load %arg2[%c0_3, %c0_4] : memref<512x512xbf16, #tpu.memory_space<vmem>>, vector<512x512xbf16>
    %cst = arith.constant dense<0.000000e+00> : vector<8x512xf32>
    %5 = tpu.matmul %3, %4, %cst {dimension_numbers = #tpu.dot_dimension_numbers<[1], [0], [0], [1], [0, 0, 1, 1], [], []>} : vector<8x512xbf16>, vector<512x512xbf16>, vector<8x512xf32> -> vector<8x512xf32>
    %c0_5 = arith.constant 0 : index
    %c0_6 = arith.constant 0 : index
    %6 = vector.load %arg5[%c0_5, %c0_6] : memref<8x512xf32, #tpu.memory_space<vmem>>, vector<8x512xf32>
    tpu.vector_store %arg5[%c0_5, %c0_6], %5 {strides = array<i32>} : memref<8x512xf32, #tpu.memory_space<vmem>>, vector<8x512xf32>,
    %cst_7 = arith.constant 0.000000e+00 : f32
    %7 = vector.broadcast %cst_7 : f32 to vector<1x512xf32>
    %cst_8 = arith.constant 0.000000e+00 : f32
    %8 = vector.broadcast %cst_8 : f32 to vector<1x256xf32>
    %c0_9 = arith.constant 0 : index
    %c0_10 = arith.constant 0 : index
    %9 = vector.load %arg5[%c0_9, %c0_10] : memref<8x512xf32, #tpu.memory_space<vmem>>, vector<1x512xf32>
    %10 = arith.addf %9, %7 : vector<1x512xf32>
    %11 = vector.extract_strided_slice %10 {offsets = [0, 0], sizes = [1, 256], strides = [1, 1]} : vector<1x512xf32> to vector<1x256xf32>
    %12 = arith.addf %11, %8 : vector<1x256xf32>
    %c0_11 = arith.constant 0 : index
    %c0_12 = arith.constant 0 : index
    %13 = vector.load %arg4[%c0_11, %c0_12] : memref<8x256xf32, #tpu.memory_space<vmem>>, vector<1x256xf32>
    tpu.vector_store %arg4[%c0_11, %c0_12], %12 {strides = array<i32>} : memref<8x256xf32, #tpu.memory_space<vmem>>, vector<1x256xf32>,
    %14 = arith.truncf %10 : vector<1x512xf32> to vector<1x512xbf16>
    %c0_13 = arith.constant 0 : index
    %c0_14 = arith.constant 0 : index
    %c0_15 = arith.constant 0 : index
    %15 = vector.load %arg3[%c0_13, %c0_14, %c0_15] : memref<7x512x512xbf16, #tpu.memory_space<vmem>>, vector<1x512x512xbf16>
    %16 = vector.shape_cast %15 : vector<1x512x512xbf16> to vector<512x512xbf16>
    %cst_16 = arith.constant dense<0.000000e+00> : vector<1x512xf32>
    %17 = tpu.matmul %14, %16, %cst_16 {dimension_numbers = #tpu.dot_dimension_numbers<[1], [0], [0], [1], [0, 0, 1, 1], [], []>} : vector<1x512xbf16>, vector<512x512xbf16>, vector<1x512xf32> -> vector<1x512xf32>
    %18 = vector.extract_strided_slice %10 {offsets = [0, 256], sizes = [1, 256], strides = [1, 1]} : vector<1x512xf32> to vector<1x256xf32>
    %c1 = arith.constant 1 : index
    %c0_17 = arith.constant 0 : index
    %19 = vector.load %arg5[%c1, %c0_17] : memref<8x512xf32, #tpu.memory_space<vmem>>, vector<1x512xf32>
    %20 = arith.addf %19, %17 : vector<1x512xf32>
    %21 = vector.extract_strided_slice %20 {offsets = [0, 0], sizes = [1, 256], strides = [1, 1]} : vector<1x512xf32> to vector<1x256xf32>
    %22 = arith.addf %21, %18 : vector<1x256xf32>
    %c1_18 = arith.constant 1 : index
    %c0_19 = arith.constant 0 : index
    %23 = vector.load %arg4[%c1_18, %c0_19] : memref<8x256xf32, #tpu.memory_space<vmem>>, vector<1x256xf32>
    tpu.vector_store %arg4[%c1_18, %c0_19], %22 {strides = array<i32>} : memref<8x256xf32, #tpu.memory_space<vmem>>, vector<1x256xf32>,
    %24 = arith.truncf %20 : vector<1x512xf32> to vector<1x512xbf16>
    %c1_20 = arith.constant 1 : index
    %c0_21 = arith.constant 0 : index
    %c0_22 = arith.constant 0 : index
    %25 = vector.load %arg3[%c1_20, %c0_21, %c0_22] : memref<7x512x512xbf16, #tpu.memory_space<vmem>>, vector<1x512x512xbf16>
    %26 = vector.shape_cast %25 : vector<1x512x512xbf16> to vector<512x512xbf16>
    %cst_23 = arith.constant dense<0.000000e+00> : vector<1x512xf32>
    %27 = tpu.matmul %24, %26, %cst_23 {dimension_numbers = #tpu.dot_dimension_numbers<[1], [0], [0], [1], [0, 0, 1, 1], [], []>} : vector<1x512xbf16>, vector<512x512xbf16>, vector<1x512xf32> -> vector<1x512xf32>
    %28 = vector.extract_strided_slice %20 {offsets = [0, 256], sizes = [1, 256], strides = [1, 1]} : vector<1x512xf32> to vector<1x256xf32>
    %c2 = arith.constant 2 : index
    %c0_24 = arith.constant 0 : index
    %29 = vector.load %arg5[%c2, %c0_24] : memref<8x512xf32, #tpu.memory_space<vmem>>, vector<1x512xf32>
    %30 = arith.addf %29, %27 : vector<1x512xf32>
    %31 = vector.extract_strided_slice %30 {offsets = [0, 0], sizes = [1, 256], strides = [1, 1]} : vector<1x512xf32> to vector<1x256xf32>
    %32 = arith.addf %31, %28 : vector<1x256xf32>
    %c2_25 = arith.constant 2 : index
    %c0_26 = arith.constant 0 : index
    %33 = vector.load %arg4[%c2_25, %c0_26] : memref<8x256xf32, #tpu.memory_space<vmem>>, vector<1x256xf32>
    tpu.vector_store %arg4[%c2_25, %c0_26], %32 {strides = array<i32>} : memref<8x256xf32, #tpu.memory_space<vmem>>, vector<1x256xf32>,
    %34 = arith.truncf %30 : vector<1x512xf32> to vector<1x512xbf16>
    %c2_27 = arith.constant 2 : index
    %c0_28 = arith.constant 0 : index
    %c0_29 = arith.constant 0 : index
    %35 = vector.load %arg3[%c2_27, %c0_28, %c0_29] : memref<7x512x512xbf16, #tpu.memory_space<vmem>>, vector<1x512x512xbf16>
    %36 = vector.shape_cast %35 : vector<1x512x512xbf16> to vector<512x512xbf16>
    %cst_30 = arith.constant dense<0.000000e+00> : vector<1x512xf32>
    %37 = tpu.matmul %34, %36, %cst_30 {dimension_numbers = #tpu.dot_dimension_numbers<[1], [0], [0], [1], [0, 0, 1, 1], [], []>} : vector<1x512xbf16>, vector<512x512xbf16>, vector<1x512xf32> -> vector<1x512xf32>
    %38 = vector.extract_strided_slice %30 {offsets = [0, 256], sizes = [1, 256], strides = [1, 1]} : vector<1x512xf32> to vector<1x256xf32>
    %c3 = arith.constant 3 : index
    %c0_31 = arith.constant 0 : index
    %39 = vector.load %arg5[%c3, %c0_31] : memref<8x512xf32, #tpu.memory_space<vmem>>, vector<1x512xf32>
    %40 = arith.addf %39, %37 : vector<1x512xf32>
    %41 = vector.extract_strided_slice %40 {offsets = [0, 0], sizes = [1, 256], strides = [1, 1]} : vector<1x512xf32> to vector<1x256xf32>
    %42 = arith.addf %41, %38 : vector<1x256xf32>
    %c3_32 = arith.constant 3 : index
    %c0_33 = arith.constant 0 : index
    %43 = vector.load %arg4[%c3_32, %c0_33] : memref<8x256xf32, #tpu.memory_space<vmem>>, vector<1x256xf32>
    tpu.vector_store %arg4[%c3_32, %c0_33], %42 {strides = array<i32>} : memref<8x256xf32, #tpu.memory_space<vmem>>, vector<1x256xf32>,
    %44 = arith.truncf %40 : vector<1x512xf32> to vector<1x512xbf16>
    %c3_34 = arith.constant 3 : index
    %c0_35 = arith.constant 0 : index
    %c0_36 = arith.constant 0 : index
    %45 = vector.load %arg3[%c3_34, %c0_35, %c0_36] : memref<7x512x512xbf16, #tpu.memory_space<vmem>>, vector<1x512x512xbf16>
    %46 = vector.shape_cast %45 : vector<1x512x512xbf16> to vector<512x512xbf16>
    %cst_37 = arith.constant dense<0.000000e+00> : vector<1x512xf32>
    %47 = tpu.matmul %44, %46, %cst_37 {dimension_numbers = #tpu.dot_dimension_numbers<[1], [0], [0], [1], [0, 0, 1, 1], [], []>} : vector<1x512xbf16>, vector<512x512xbf16>, vector<1x512xf32> -> vector<1x512xf32>
    %48 = vector.extract_strided_slice %40 {offsets = [0, 256], sizes = [1, 256], strides = [1, 1]} : vector<1x512xf32> to vector<1x256xf32>
    %c4 = arith.constant 4 : index
    %c0_38 = arith.constant 0 : index
    %49 = vector.load %arg5[%c4, %c0_38] : memref<8x512xf32, #tpu.memory_space<vmem>>, vector<1x512xf32>
    %50 = arith.addf %49, %47 : vector<1x512xf32>
    %51 = vector.extract_strided_slice %50 {offsets = [0, 0], sizes = [1, 256], strides = [1, 1]} : vector<1x512xf32> to vector<1x256xf32>
    %52 = arith.addf %51, %48 : vector<1x256xf32>
    %c4_39 = arith.constant 4 : index
    %c0_40 = arith.constant 0 : index
    %53 = vector.load %arg4[%c4_39, %c0_40] : memref<8x256xf32, #tpu.memory_space<vmem>>, vector<1x256xf32>
    tpu.vector_store %arg4[%c4_39, %c0_40], %52 {strides = array<i32>} : memref<8x256xf32, #tpu.memory_space<vmem>>, vector<1x256xf32>,
    %54 = arith.truncf %50 : vector<1x512xf32> to vector<1x512xbf16>
    %c4_41 = arith.constant 4 : index
    %c0_42 = arith.constant 0 : index
    %c0_43 = arith.constant 0 : index
    %55 = vector.load %arg3[%c4_41, %c0_42, %c0_43] : memref<7x512x512xbf16, #tpu.memory_space<vmem>>, vector<1x512x512xbf16>
    %56 = vector.shape_cast %55 : vector<1x512x512xbf16> to vector<512x512xbf16>
    %cst_44 = arith.constant dense<0.000000e+00> : vector<1x512xf32>
    %57 = tpu.matmul %54, %56, %cst_44 {dimension_numbers = #tpu.dot_dimension_numbers<[1], [0], [0], [1], [0, 0, 1, 1], [], []>} : vector<1x512xbf16>, vector<512x512xbf16>, vector<1x512xf32> -> vector<1x512xf32>
    %58 = vector.extract_strided_slice %50 {offsets = [0, 256], sizes = [1, 256], strides = [1, 1]} : vector<1x512xf32> to vector<1x256xf32>
    %c5 = arith.constant 5 : index
    %c0_45 = arith.constant 0 : index
    %59 = vector.load %arg5[%c5, %c0_45] : memref<8x512xf32, #tpu.memory_space<vmem>>, vector<1x512xf32>
    %60 = arith.addf %59, %57 : vector<1x512xf32>
    %61 = vector.extract_strided_slice %60 {offsets = [0, 0], sizes = [1, 256], strides = [1, 1]} : vector<1x512xf32> to vector<1x256xf32>
    %62 = arith.addf %61, %58 : vector<1x256xf32>
    %c5_46 = arith.constant 5 : index
    %c0_47 = arith.constant 0 : index
    %63 = vector.load %arg4[%c5_46, %c0_47] : memref<8x256xf32, #tpu.memory_space<vmem>>, vector<1x256xf32>
    tpu.vector_store %arg4[%c5_46, %c0_47], %62 {strides = array<i32>} : memref<8x256xf32, #tpu.memory_space<vmem>>, vector<1x256xf32>,
    %64 = arith.truncf %60 : vector<1x512xf32> to vector<1x512xbf16>
    %c5_48 = arith.constant 5 : index
    %c0_49 = arith.constant 0 : index
    %c0_50 = arith.constant 0 : index
    %65 = vector.load %arg3[%c5_48, %c0_49, %c0_50] : memref<7x512x512xbf16, #tpu.memory_space<vmem>>, vector<1x512x512xbf16>
    %66 = vector.shape_cast %65 : vector<1x512x512xbf16> to vector<512x512xbf16>
    %cst_51 = arith.constant dense<0.000000e+00> : vector<1x512xf32>
    %67 = tpu.matmul %64, %66, %cst_51 {dimension_numbers = #tpu.dot_dimension_numbers<[1], [0], [0], [1], [0, 0, 1, 1], [], []>} : vector<1x512xbf16>, vector<512x512xbf16>, vector<1x512xf32> -> vector<1x512xf32>
    %68 = vector.extract_strided_slice %60 {offsets = [0, 256], sizes = [1, 256], strides = [1, 1]} : vector<1x512xf32> to vector<1x256xf32>
    %c6 = arith.constant 6 : index
    %c0_52 = arith.constant 0 : index
    %69 = vector.load %arg5[%c6, %c0_52] : memref<8x512xf32, #tpu.memory_space<vmem>>, vector<1x512xf32>
    %70 = arith.addf %69, %67 : vector<1x512xf32>
    %71 = vector.extract_strided_slice %70 {offsets = [0, 0], sizes = [1, 256], strides = [1, 1]} : vector<1x512xf32> to vector<1x256xf32>
    %72 = arith.addf %71, %68 : vector<1x256xf32>
    %c6_53 = arith.constant 6 : index
    %c0_54 = arith.constant 0 : index
    %73 = vector.load %arg4[%c6_53, %c0_54] : memref<8x256xf32, #tpu.memory_space<vmem>>, vector<1x256xf32>
    tpu.vector_store %arg4[%c6_53, %c0_54], %72 {strides = array<i32>} : memref<8x256xf32, #tpu.memory_space<vmem>>, vector<1x256xf32>,
    %74 = arith.truncf %70 : vector<1x512xf32> to vector<1x512xbf16>
    %c6_55 = arith.constant 6 : index
    %c0_56 = arith.constant 0 : index
    %c0_57 = arith.constant 0 : index
    %75 = vector.load %arg3[%c6_55, %c0_56, %c0_57] : memref<7x512x512xbf16, #tpu.memory_space<vmem>>, vector<1x512x512xbf16>
    %76 = vector.shape_cast %75 : vector<1x512x512xbf16> to vector<512x512xbf16>
    %cst_58 = arith.constant dense<0.000000e+00> : vector<1x512xf32>
    %77 = tpu.matmul %74, %76, %cst_58 {dimension_numbers = #tpu.dot_dimension_numbers<[1], [0], [0], [1], [0, 0, 1, 1], [], []>} : vector<1x512xbf16>, vector<512x512xbf16>, vector<1x512xf32> -> vector<1x512xf32>
    %78 = vector.extract_strided_slice %70 {offsets = [0, 256], sizes = [1, 256], strides = [1, 1]} : vector<1x512xf32> to vector<1x256xf32>
    %c7 = arith.constant 7 : index
    %c0_59 = arith.constant 0 : index
    %79 = vector.load %arg5[%c7, %c0_59] : memref<8x512xf32, #tpu.memory_space<vmem>>, vector<1x512xf32>
    %80 = arith.addf %79, %77 : vector<1x512xf32>
    %81 = vector.extract_strided_slice %80 {offsets = [0, 0], sizes = [1, 256], strides = [1, 1]} : vector<1x512xf32> to vector<1x256xf32>
    %82 = arith.addf %81, %78 : vector<1x256xf32>
    %c7_60 = arith.constant 7 : index
    %c0_61 = arith.constant 0 : index
    %83 = vector.load %arg4[%c7_60, %c0_61] : memref<8x256xf32, #tpu.memory_space<vmem>>, vector<1x256xf32>
    tpu.vector_store %arg4[%c7_60, %c0_61], %82 {strides = array<i32>} : memref<8x256xf32, #tpu.memory_space<vmem>>, vector<1x256xf32>,
    return
  }
}

</mosaic_0001>

<bundles_post_ra>
// kernel: tpu_custom_call.1
= control target key start
LH: loop header
LB: loop body
LE: loop exit
PB: predicated region body
PF: predicated region fallthrough
CT: control target
= control target key end

     0   :  { %9 = vsyncpa [#allocation4], 0  ;;  %s11003_s0 = inlined_call_operand.hbm [shape: f32[8,512], index: 0, kind: input, shape index: {}]   ;;  %s11004_s1 = inlined_call_operand.hbm [shape: f32[8,512], index: 1, kind: input, shape index: {}]   ;;  %s11005_s2 = inlined_call_operand.hbm [shape: bf16[512,512], index: 2, kind: input, shape index: {}]   ;;  %s11006_s3 = inlined_call_operand.hbm [shape: bf16[7,512,512], index: 3, kind: input, shape index: {}]   ;;  %s11007_s4 = inlined_call_operand.hbm [shape: f32[8,256], index: 4, kind: output, shape index: {}]  }
   0x1   :  { %10 = vsyncpa [#allocation7], 0 }
   0x2   :  { %11 = vsyncpa [#allocation10], 0 }
   0x3   :  { %12 = vsyncpa [#allocation5], 0  ;;  %s10768_s15 = smov [#allocation6]   ;;  %s10769_s17 = smov [#allocation3]  }
   0x4   :  { %s29_s16 = sshll.u32 %s10768_s15, 4  ;;  %s19_s18 = sshll.u32 %s10769_s17, 4  ;;  %s30_s16 = int_to_ptr.vmem [resolvable:$true] %s29_s16  ;;  %s20_s18 = int_to_ptr.vmem [resolvable:$true] %s19_s18 }
   0x5   :  { %s10650_s21 = scalar_lea.hbm %s11004_s1, 512 }
   0x6   :  { %p10651_p0 = scmp.ne.s32.totalorder %s11004_s1, %s10650_s21  ;;  %p10654_p1 = scmp.lt.u32.totalorder %s10650_s21, %s11004_s1 }
   0x8   :  { %p10656_p2 = pnand %p10654_p1, %p10651_p0 }
   0xa   :  { %10659 = shalt.err (!%p10656_p2)
}
   0xb   :  { %s10660_s26 = scalar_lea.vmem %s30_s16, 512  ;;  %p10665_p4 = scmp.lt.s32.totalorder %s30_s16, %s30_s16 }
   0xc   :  { %p10661_p3 = scmp.ne.s32.totalorder %s30_s16, %s10660_s26  ;;  %p10666_p5 = scmp.lt.s32.totalorder %s10660_s26, %s10660_s26 }
   0xe   :  { %p10667_p6 = por %p10666_p5, %p10665_p4 }
  0x10   :  { %p10668_p7 = pnand %p10667_p6, %p10661_p3 }
  0x12   :  { %10671 = shalt.err (!%p10668_p7)
}
  0x13   :  { %32 = dma.hbm_to_vmem [thread:$0]  %s11004_s1, 512, %s30_s16, [#allocation7]  }
  0x14   :  { %s10672_s5 = scalar_lea.hbm %s11003_s0, 512 }
  0x15   :  { %p10673_p8 = scmp.ne.s32.totalorder %s11003_s0, %s10672_s5  ;;  %p10676_p9 = scmp.lt.u32.totalorder %s10672_s5, %s11003_s0 }
  0x17   :  { %p10678_p10 = pnand %p10676_p9, %p10673_p8 }
  0x19   :  { %10681 = shalt.err (!%p10678_p10)
}
  0x1a   :  { %s10682_s10 = scalar_lea.vmem %s20_s18, 512  ;;  %p10687_p12 = scmp.lt.s32.totalorder %s20_s18, %s20_s18 }
  0x1b   :  { %p10683_p11 = scmp.ne.s32.totalorder %s20_s18, %s10682_s10  ;;  %p10688_p13 = scmp.lt.s32.totalorder %s10682_s10, %s10682_s10 }
  0x1d   :  { %p10689_p0 = por %p10688_p13, %p10687_p12 }
  0x1f   :  { %p10690_p1 = pnand %p10689_p0, %p10683_p11 }
  0x21   :  { %10693 = shalt.err (!%p10690_p1)
}
  0x22   :  { %22 = dma.hbm_to_vmem [thread:$0]  %s11003_s0, 512, %s20_s18, [#allocation4]  }
  0x23   :  { %s10770_s12 = smov [#allocation8]   ;;  %s10694_s16 = scalar_lea.hbm %s11005_s2, 16384 }
  0x24   :  { %s38_s13 = sshll.u32 %s10770_s12, 4  ;;  %p10695_p2 = scmp.ne.s32.totalorder %s11005_s2, %s10694_s16  ;;  %s39_s13 = int_to_ptr.vmem [resolvable:$true] %s38_s13 }
  0x25   :  { %p10698_p3 = scmp.lt.u32.totalorder %s10694_s16, %s11005_s2 }
  0x27   :  { %p10700_p4 = pnand %p10698_p3, %p10695_p2 }
  0x29   :  { %10703 = shalt.err (!%p10700_p4)
}
  0x2a   :  { %s10704_s22 = scalar_lea.vmem %s39_s13, 16384  ;;  %p10709_p6 = scmp.lt.s32.totalorder %s39_s13, %s39_s13 }
  0x2b   :  { %p10705_p5 = scmp.ne.s32.totalorder %s39_s13, %s10704_s22  ;;  %p10710_p7 = scmp.lt.s32.totalorder %s10704_s22, %s10704_s22 }
  0x2d   :  { %p10711_p8 = por %p10710_p7, %p10709_p6 }
  0x2f   :  { %p10712_p9 = pnand %p10711_p8, %p10705_p5 }
  0x31   :  { %10715 = shalt.err (!%p10712_p9)
}
  0x32   :  { %s10771_s0 = smov 256   ;;  %s10772_s18 = smov 16  }
  0x33   :  { %44 = dma.hbm_to_vmem [thread:$0]  %s11005_s2, 16384, %s39_s13, [#allocation7], %s10771_s0, %s10771_s0, %s10772_s18  }
  0x34   :  { %s10773_s25 = smov [#allocation9]   ;;  %s10716_s29 = scalar_lea.hbm %s11006_s3, 114688 }
  0x35   :  { %s50_s26 = sshll.u32 %s10773_s25, 4  ;;  %p10717_p10 = scmp.ne.s32.totalorder %s11006_s3, %s10716_s29  ;;  %s51_s26 = int_to_ptr.vmem [resolvable:$true] %s50_s26 }
  0x36   :  { %p10720_p11 = scmp.lt.u32.totalorder %s10716_s29, %s11006_s3 }
  0x38   :  { %p10722_p12 = pnand %p10720_p11, %p10717_p10 }
  0x3a   :  { %10725 = shalt.err (!%p10722_p12)
}
  0x3b   :  { %s10726_s8 = scalar_lea.vmem %s51_s26, 114688  ;;  %p10731_p0 = scmp.lt.s32.totalorder %s51_s26, %s51_s26 }
  0x3c   :  { %p10727_p13 = scmp.ne.s32.totalorder %s51_s26, %s10726_s8  ;;  %p10732_p1 = scmp.lt.s32.totalorder %s10726_s8, %s10726_s8 }
  0x3e   :  { %p10733_p2 = por %p10732_p1, %p10731_p0 }
  0x40   :  { %p10734_p3 = pnand %p10733_p2, %p10727_p13 }
  0x42   :  { %10737 = shalt.err (!%p10734_p3)
}
  0x43   :  { %56 = dma.hbm_to_vmem [thread:$0]  %s11006_s3, 114688, %s51_s26, [#allocation10], %s10771_s0, %s10771_s0, %s10772_s18  }
  0x44   :  { %10760 = dma.done.wait [#allocation4], 512  }
  0x45   :  { %10761 = vsyncadd [#allocation4], 4294966784 }
  0x46   :  { %10762 = dma.done.wait [#allocation7], 16896  }
  0x47   :  { %10763 = vsyncadd [#allocation7], 4294950400 }
  0x48   :  { %10764 = dma.done.wait [#allocation10], 114688  }
  0x49   :  { %10765 = vsyncadd [#allocation10], 4294852608  ;;  %v9114_v0 = vld [vmem:[#allocation8 + $0x4] ss:$16 sps:$4 sm:$0xff]   ;;  %v9116_v1 = vld [vmem:[#allocation8 + $0xc] ss:$16 sps:$4 sm:$0xff]  }
  0x4a   :  { %853 = vmatprep.subr.bf16.mxu0 %v9114_v0  ;;  %v9118_v2 = vld [vmem:[#allocation8] ss:$16 sps:$4 sm:$0xff]   ;;  %v9119_v3 = vld [vmem:[#allocation8 + $0x8] ss:$16 sps:$4 sm:$0xff]   ;;  %935 = vmatprep.subr.bf16.mxu1 %v9116_v1  ;;  %v9120_v4 = vld [vmem:[#allocation8 + $0x24] ss:$16 sps:$4 sm:$0xff]  }
  0x4b   :  { %854 = vmatpush1.bf16.msra.mxu0 %v9118_v2  ;;  %936 = vmatpush1.bf16.msra.mxu1 %v9119_v3  ;;  %v9122_v5 = vld [vmem:[#allocation8 + $0x2c] ss:$16 sps:$4 sm:$0xff]   ;;  %v9124_v6 = vld [vmem:[#allocation8 + $0x20] ss:$16 sps:$4 sm:$0xff]   ;;  %v9125_v7 = vld [vmem:[#allocation8 + $0x28] ss:$16 sps:$4 sm:$0xff]  }
  0x4c   :  { %855 = vmatprep.subr.bf16.mxu0 %v9120_v4  ;;  %937 = vmatprep.subr.bf16.mxu1 %v9122_v5  ;;  %v9126_v8 = vld [vmem:[#allocation8 + $0x44] ss:$16 sps:$4 sm:$0xff]   ;;  %v9128_v9 = vld [vmem:[#allocation8 + $0x4c] ss:$16 sps:$4 sm:$0xff]   ;;  %v9130_v10 = vld [vmem:[#allocation8 + $0x40] ss:$16 sps:$4 sm:$0xff]  }
  0x4d   :  { %v9131_v11 = vld [vmem:[#allocation8 + $0x48] ss:$16 sps:$4 sm:$0xff]   ;;  %v9132_v12 = vld [vmem:[#allocation8 + $0x64] ss:$16 sps:$4 sm:$0xff]   ;;  %v9134_v13 = vld [vmem:[#allocation8 + $0x6c] ss:$16 sps:$4 sm:$0xff]  }
  0x4e   :  { %v9136_v14 = vld [vmem:[#allocation8 + $0x60] ss:$16 sps:$4 sm:$0xff]   ;;  %v9137_v15 = vld [vmem:[#allocation8 + $0x68] ss:$16 sps:$4 sm:$0xff]   ;;  %v9138_v16 = vld [vmem:[#allocation8 + $0x84] ss:$16 sps:$4 sm:$0xff]  }
  0x4f   :  { %856 = vmatpush1.bf16.msra.mxu0 %v9124_v6  ;;  %938 = vmatpush1.bf16.msra.mxu1 %v9125_v7  ;;  %v9140_v17 = vld [vmem:[#allocation8 + $0x8c] ss:$16 sps:$4 sm:$0xff]   ;;  %v9142_v18 = vld [vmem:[#allocation8 + $0x80] ss:$16 sps:$4 sm:$0xff]   ;;  %v9143_v19 = vld [vmem:[#allocation8 + $0x88] ss:$16 sps:$4 sm:$0xff]  }
  0x50   :  { %857 = vmatprep.subr.bf16.mxu0 %v9126_v8  ;;  %939 = vmatprep.subr.bf16.mxu1 %v9128_v9  ;;  %v9144_v20 = vld [vmem:[#allocation8 + $0xa4] ss:$16 sps:$4 sm:$0xff]   ;;  %v9146_v21 = vld [vmem:[#allocation8 + $0xac] ss:$16 sps:$4 sm:$0xff]   ;;  %v9148_v22 = vld [vmem:[#allocation8 + $0xa0] ss:$16 sps:$4 sm:$0xff]  }
  0x51   :  { %v9149_v23 = vld [vmem:[#allocation8 + $0xa8] ss:$16 sps:$4 sm:$0xff]   ;;  %v9150_v24 = vld [vmem:[#allocation8 + $0xc4] ss:$16 sps:$4 sm:$0xff]   ;;  %v9152_v25 = vld [vmem:[#allocation8 + $0xcc] ss:$16 sps:$4 sm:$0xff]  }
  0x52   :  { %v9154_v26 = vld [vmem:[#allocation8 + $0xc0] ss:$16 sps:$4 sm:$0xff]   ;;  %v9155_v27 = vld [vmem:[#allocation8 + $0xc8] ss:$16 sps:$4 sm:$0xff]   ;;  %v9156_v28 = vld [vmem:[#allocation8 + $0xe4] ss:$16 sps:$4 sm:$0xff]  }
  0x53   :  { %858 = vmatpush1.bf16.msra.mxu0 %v9130_v10  ;;  %940 = vmatpush1.bf16.msra.mxu1 %v9131_v11  ;;  %v9158_v29 = vld [vmem:[#allocation8 + $0xec] ss:$16 sps:$4 sm:$0xff]   ;;  %v9160_v30 = vld [vmem:[#allocation8 + $0xe0] ss:$16 sps:$4 sm:$0xff]   ;;  %v9161_v31 = vld [vmem:[#allocation8 + $0xe8] ss:$16 sps:$4 sm:$0xff]  }
  0x54   :  { %859 = vmatprep.subr.bf16.mxu0 %v9132_v12  ;;  %941 = vmatprep.subr.bf16.mxu1 %v9134_v13  ;;  %v9162_v32 = vld [vmem:[#allocation8 + $0x104] ss:$16 sps:$4 sm:$0xff]   ;;  %v9164_v33 = vld [vmem:[#allocation8 + $0x10c] ss:$16 sps:$4 sm:$0xff]   ;;  %v9166_v34 = vld [vmem:[#allocation8 + $0x100] ss:$16 sps:$4 sm:$0xff]  }
  0x55   :  { %v9167_v35 = vld [vmem:[#allocation8 + $0x108] ss:$16 sps:$4 sm:$0xff]   ;;  %v9168_v36 = vld [vmem:[#allocation8 + $0x124] ss:$16 sps:$4 sm:$0xff]   ;;  %v9170_v37 = vld [vmem:[#allocation8 + $0x12c] ss:$16 sps:$4 sm:$0xff]  }
  0x56   :  { %v9172_v38 = vld [vmem:[#allocation8 + $0x120] ss:$16 sps:$4 sm:$0xff]   ;;  %v9173_v39 = vld [vmem:[#allocation8 + $0x128] ss:$16 sps:$4 sm:$0xff]   ;;  %v9174_v40 = vld [vmem:[#allocation8 + $0x144] ss:$16 sps:$4 sm:$0xff]  }
  0x57   :  { %860 = vmatpush1.bf16.msra.mxu0 %v9136_v14  ;;  %942 = vmatpush1.bf16.msra.mxu1 %v9137_v15  ;;  %v9176_v41 = vld [vmem:[#allocation8 + $0x14c] ss:$16 sps:$4 sm:$0xff]   ;;  %v9178_v42 = vld [vmem:[#allocation8 + $0x140] ss:$16 sps:$4 sm:$0xff]   ;;  %v9179_v43 = vld [vmem:[#allocation8 + $0x148] ss:$16 sps:$4 sm:$0xff]  }
  0x58   :  { %861 = vmatprep.subr.bf16.mxu0 %v9138_v16  ;;  %943 = vmatprep.subr.bf16.mxu1 %v9140_v17  ;;  %v9180_v44 = vld [vmem:[#allocation8 + $0x164] ss:$16 sps:$4 sm:$0xff]   ;;  %v9182_v45 = vld [vmem:[#allocation8 + $0x16c] ss:$16 sps:$4 sm:$0xff]   ;;  %v9184_v48 = vld [vmem:[#allocation8 + $0x160] ss:$16 sps:$4 sm:$0xff]  }
  0x59   :  { %v70_v46 = vld [vmem:[#allocation3 + $0x8] sm:$0xff]  ;;  %v9186_v51 = vld [vmem:[#allocation8 + $0x184] ss:$16 sps:$4 sm:$0xff]   ;;  %v9190_v54 = vld [vmem:[#allocation8 + $0x180] ss:$16 sps:$4 sm:$0xff]   ;;  %s10775_s3 = smov [#allocation11]  }
  0x5a   :  { %v74_v47 = vld [vmem:[#allocation6 + $0x8] sm:$0xff]  ;;  %v9192_v56 = vld [vmem:[#allocation8 + $0x1a4] ss:$16 sps:$4 sm:$0xff]   ;;  %v9196_v58 = vld [vmem:[#allocation8 + $0x1a0] ss:$16 sps:$4 sm:$0xff]   ;;  %s8007_s10 = sshll.u32 %s10775_s3, 4  ;;  %s8008_s10 = int_to_ptr.vmem [resolvable:$true] %s8007_s10 }
  0x5b   :  { %862 = vmatpush1.bf16.msra.mxu0 %v9142_v18  ;;  %944 = vmatpush1.bf16.msra.mxu1 %v9143_v19  ;;  %v9185_v49 = vld [vmem:[#allocation8 + $0x168] ss:$16 sps:$4 sm:$0xff]   ;;  %v78_v50 = vmul.f32 %v74_v47, %v70_v46  ;;  %v9188_v52 = vld [vmem:[#allocation8 + $0x18c] ss:$16 sps:$4 sm:$0xff]   ;;  %v9198_v60 = vld [vmem:[#allocation8 + $0x1c4] ss:$16 sps:$4 sm:$0xff]   ;;  %p10743_p5 = scmp.lt.s32.totalorder %s8008_s10, %s8008_s10 }
  0x5c   :  { %863 = vmatprep.subr.bf16.mxu0 %v9144_v20  ;;  %945 = vmatprep.subr.bf16.mxu1 %v9146_v21  ;;  %v9191_v55 = vld [vmem:[#allocation8 + $0x188] ss:$16 sps:$4 sm:$0xff]   ;;  %v9194_v57 = vld [vmem:[#allocation8 + $0x1ac] ss:$16 sps:$4 sm:$0xff]   ;;  %v9202_v62 = vld [vmem:[#allocation8 + $0x1c0] ss:$16 sps:$4 sm:$0xff]  }
  0x5d   :  { %v82_v53 = vpack.c.bf16 %v78_v50, %v78_v50  ;;  %v9197_v59 = vld [vmem:[#allocation8 + $0x1a8] ss:$16 sps:$4 sm:$0xff]   ;;  %v9200_v61 = vld [vmem:[#allocation8 + $0x1cc] ss:$16 sps:$4 sm:$0xff]   ;;  %v9204_v0 = vld [vmem:[#allocation8 + $0x1e4] ss:$16 sps:$4 sm:$0xff]  }
  0x5e   :  { %v9203_v63 = vld [vmem:[#allocation8 + $0x1c8] ss:$16 sps:$4 sm:$0xff]   ;;  %v69_v1 = vld [vmem:[#allocation3] sm:$0xff]  ;;  %v9206_v3 = vld [vmem:[#allocation8 + $0x1ec] ss:$16 sps:$4 sm:$0xff]   ;;  %s10738_s1 = scalar_lea.vmem %s8008_s10, 256 }
  0x5f   :  { %864 = vmatpush1.bf16.msra.mxu0 %v9148_v22  ;;  %946 = vmatpush1.bf16.msra.mxu1 %v9149_v23  ;;  %v73_v2 = vld [vmem:[#allocation6] sm:$0xff]  ;;  %v9209_v5 = vld [vmem:[#allocation8 + $0x1e8] ss:$16 sps:$4 sm:$0xff]   ;;  %v9215_v8 = vld [vmem:[#allocation8 + $0x20c] ss:$16 sps:$4 sm:$0xff]   ;;  %p10739_p4 = scmp.ne.s32.totalorder %s8008_s10, %s10738_s1  ;;  %p10744_p6 = scmp.lt.s32.totalorder %s10738_s1, %s10738_s1 }
  0x60   :  { %865 = vmatprep.subr.bf16.mxu0 %v9150_v24  ;;  %947 = vmatprep.subr.bf16.mxu1 %v9152_v25  ;;  %v9208_v4 = vld [vmem:[#allocation8 + $0x1e0] ss:$16 sps:$4 sm:$0xff]   ;;  %v77_v6 = vmul.f32 %v73_v2, %v69_v1  ;;  %v9212_v7 = vld [vmem:[#allocation8 + $0x204] ss:$16 sps:$4 sm:$0xff]   ;;  %v9213_v10 = vld [vmem:[#allocation8 + $0x208] ss:$16 sps:$4 sm:$0xff]  }
  0x61   :  { %885 = vmatprep.mubr.bf16.mxu0 %v82_v53  ;;  %967 = vmatprep.mubr.bf16.mxu1 %v82_v53  ;;  %v9210_v9 = vld [vmem:[#allocation8 + $0x200] ss:$16 sps:$4 sm:$0xff]   ;;  %v9218_v12 = vld [vmem:[#allocation8 + $0x224] ss:$16 sps:$4 sm:$0xff]   ;;  %v9221_v13 = vld [vmem:[#allocation8 + $0x22c] ss:$16 sps:$4 sm:$0xff]   ;;  %p10745_p7 = por %p10744_p6, %p10743_p5 }
  0x62   :  { %v81_v11 = vpack.c.bf16 %v77_v6, %v77_v6  ;;  %v9216_v14 = vld [vmem:[#allocation8 + $0x220] ss:$16 sps:$4 sm:$0xff]   ;;  %v9219_v15 = vld [vmem:[#allocation8 + $0x228] ss:$16 sps:$4 sm:$0xff]   ;;  %v9224_v16 = vld [vmem:[#allocation8 + $0x244] ss:$16 sps:$4 sm:$0xff]  }
  0x63   :  { %866 = vmatpush1.bf16.msra.mxu0 %v9154_v26  ;;  %948 = vmatpush1.bf16.msra.mxu1 %v9155_v27  ;;  %v9227_v17 = vld [vmem:[#allocation8 + $0x24c] ss:$16 sps:$4 sm:$0xff]   ;;  %v9222_v18 = vld [vmem:[#allocation8 + $0x240] ss:$16 sps:$4 sm:$0xff]   ;;  %v9225_v19 = vld [vmem:[#allocation8 + $0x248] ss:$16 sps:$4 sm:$0xff]   ;;  %p10746_p8 = pnand %p10745_p7, %p10739_p4 }
  0x64   :  { %867 = vmatprep.subr.bf16.mxu0 %v9156_v28  ;;  %949 = vmatprep.subr.bf16.mxu1 %v9158_v29  ;;  %v9230_v20 = vld [vmem:[#allocation8 + $0x264] ss:$16 sps:$4 sm:$0xff]   ;;  %v9233_v21 = vld [vmem:[#allocation8 + $0x26c] ss:$16 sps:$4 sm:$0xff]   ;;  %v9228_v22 = vld [vmem:[#allocation8 + $0x260] ss:$16 sps:$4 sm:$0xff]  }
  0x65   :  { %v9231_v23 = vld [vmem:[#allocation8 + $0x268] ss:$16 sps:$4 sm:$0xff]   ;;  %v9236_v24 = vld [vmem:[#allocation8 + $0x284] ss:$16 sps:$4 sm:$0xff]   ;;  %v9239_v25 = vld [vmem:[#allocation8 + $0x28c] ss:$16 sps:$4 sm:$0xff]  }
  0x66   :  { %v9234_v26 = vld [vmem:[#allocation8 + $0x280] ss:$16 sps:$4 sm:$0xff]   ;;  %v9237_v27 = vld [vmem:[#allocation8 + $0x288] ss:$16 sps:$4 sm:$0xff]   ;;  %v9242_v28 = vld [vmem:[#allocation8 + $0x2a4] ss:$16 sps:$4 sm:$0xff]  }
  0x67   :  { %868 = vmatpush1.bf16.msra.mxu0 %v9160_v30  ;;  %950 = vmatpush1.bf16.msra.mxu1 %v9161_v31  ;;  %v9245_v29 = vld [vmem:[#allocation8 + $0x2ac] ss:$16 sps:$4 sm:$0xff]   ;;  %v9240_v30 = vld [vmem:[#allocation8 + $0x2a0] ss:$16 sps:$4 sm:$0xff]   ;;  %v9243_v31 = vld [vmem:[#allocation8 + $0x2a8] ss:$16 sps:$4 sm:$0xff]  }
  0x68   :  { %869 = vmatprep.subr.bf16.mxu0 %v9162_v32  ;;  %951 = vmatprep.subr.bf16.mxu1 %v9164_v33  ;;  %v9248_v32 = vld [vmem:[#allocation8 + $0x2c4] ss:$16 sps:$4 sm:$0xff]   ;;  %v9251_v33 = vld [vmem:[#allocation8 + $0x2cc] ss:$16 sps:$4 sm:$0xff]   ;;  %v9258_v46 = vld [vmem:[#allocation8 + $0x300] ss:$16 sps:$4 sm:$0xff]  }
  0x69   :  { %v9261_v47 = vld [vmem:[#allocation8 + $0x308] ss:$16 sps:$4 sm:$0xff]   ;;  %v9264_v50 = vld [vmem:[#allocation8 + $0x320] ss:$16 sps:$4 sm:$0xff]   ;;  %v9275_v53 = vld [vmem:[#allocation8 + $0x34c] ss:$16 sps:$4 sm:$0xff]  }
  0x6a   :  { %v9293_v1 = vld [vmem:[#allocation8 + $0x3ac] ss:$16 sps:$4 sm:$0xff]   ;;  %v9288_v2 = vld [vmem:[#allocation8 + $0x3a0] ss:$16 sps:$4 sm:$0xff]  }
  0x6b   :  { %870 = vmatpush1.bf16.msra.mxu0 %v9166_v34  ;;  %952 = vmatpush1.bf16.msra.mxu1 %v9167_v35  ;;  %v72_v34 = vld [vmem:[#allocation3 + $0x18] sm:$0xff]  ;;  %v9246_v35 = vld [vmem:[#allocation8 + $0x2c0] ss:$16 sps:$4 sm:$0xff]  }
  0x6c   :  { %871 = vmatprep.subr.bf16.mxu0 %v9168_v36  ;;  %953 = vmatprep.subr.bf16.mxu1 %v9170_v37  ;;  %v9249_v36 = vld [vmem:[#allocation8 + $0x2c8] ss:$16 sps:$4 sm:$0xff]   ;;  %v9294_v6 = vld [vmem:[#allocation8 + $0x3c0] ss:$16 sps:$4 sm:$0xff]  }
  0x6d   :  { %v76_v37 = vld [vmem:[#allocation6 + $0x18] sm:$0xff] }
  0x6f   :  { %872 = vmatpush1.bf16.msra.mxu0 %v9172_v38  ;;  %954 = vmatpush1.bf16.msra.mxu1 %v9173_v39  ;;  %v9254_v38 = vld [vmem:[#allocation8 + $0x2e4] ss:$16 sps:$4 sm:$0xff]   ;;  %v80_v39 = vmul.f32 %v76_v37, %v72_v34  ;;  %v9330_v34 = vld [vmem:[#allocation9 + $0x80] ss:$16 sps:$4 sm:$0xff]   ;;  %v9341_v37 = vld [vmem:[#allocation9 + $0xac] ss:$16 sps:$4 sm:$0xff]  }
  0x70   :  { %873 = vmatprep.subr.bf16.mxu0 %v9174_v40  ;;  %955 = vmatprep.subr.bf16.mxu1 %v9176_v41  ;;  %v9257_v40 = vld [vmem:[#allocation8 + $0x2ec] ss:$16 sps:$4 sm:$0xff]  }
  0x71   :  { %v84_v41 = vpack.c.bf16 %v80_v39, %v80_v39  ;;  %v9339_v39 = vld [vmem:[#allocation9 + $0xa8] ss:$16 sps:$4 sm:$0xff]  }
  0x73   :  { %874 = vmatpush1.bf16.msra.mxu0 %v9178_v42  ;;  %956 = vmatpush1.bf16.msra.mxu1 %v9179_v43  ;;  %v9252_v42 = vld [vmem:[#allocation8 + $0x2e0] ss:$16 sps:$4 sm:$0xff]   ;;  %v9255_v43 = vld [vmem:[#allocation8 + $0x2e8] ss:$16 sps:$4 sm:$0xff]  }
  0x74   :  { %875 = vmatprep.subr.bf16.mxu0 %v9180_v44  ;;  %957 = vmatprep.subr.bf16.mxu1 %v9182_v45  ;;  %v9260_v44 = vld [vmem:[#allocation8 + $0x304] ss:$16 sps:$4 sm:$0xff]   ;;  %v9263_v45 = vld [vmem:[#allocation8 + $0x30c] ss:$16 sps:$4 sm:$0xff]  }
  0x77   :  { %876 = vmatpush1.bf16.msra.mxu0 %v9184_v48  ;;  %958 = vmatpush1.bf16.msra.mxu1 %v9185_v49  ;;  %v9266_v48 = vld [vmem:[#allocation8 + $0x324] ss:$16 sps:$4 sm:$0xff]   ;;  %v9269_v49 = vld [vmem:[#allocation8 + $0x32c] ss:$16 sps:$4 sm:$0xff]  }
  0x78   :  { %877 = vmatprep.subr.bf16.mxu0 %v9186_v51  ;;  %959 = vmatprep.subr.bf16.mxu1 %v9188_v52  ;;  %v9267_v51 = vld [vmem:[#allocation8 + $0x328] ss:$16 sps:$4 sm:$0xff]   ;;  %v9272_v52 = vld [vmem:[#allocation8 + $0x344] ss:$16 sps:$4 sm:$0xff]  }
  0x7b   :  { %878 = vmatpush1.bf16.msra.mxu0 %v9190_v54  ;;  %960 = vmatpush1.bf16.msra.mxu1 %v9191_v55  ;;  %v9270_v54 = vld [vmem:[#allocation8 + $0x340] ss:$16 sps:$4 sm:$0xff]   ;;  %v9273_v55 = vld [vmem:[#allocation8 + $0x348] ss:$16 sps:$4 sm:$0xff]  }
  0x7c   :  { %879 = vmatprep.subr.bf16.mxu0 %v9192_v56  ;;  %961 = vmatprep.subr.bf16.mxu1 %v9194_v57  ;;  %v9278_v56 = vld [vmem:[#allocation8 + $0x364] ss:$16 sps:$4 sm:$0xff]   ;;  %v9281_v57 = vld [vmem:[#allocation8 + $0x36c] ss:$16 sps:$4 sm:$0xff]  }
  0x7f   :  { %880 = vmatpush1.bf16.msra.mxu0 %v9196_v58  ;;  %962 = vmatpush1.bf16.msra.mxu1 %v9197_v59  ;;  %v9276_v58 = vld [vmem:[#allocation8 + $0x360] ss:$16 sps:$4 sm:$0xff]   ;;  %v9279_v59 = vld [vmem:[#allocation8 + $0x368] ss:$16 sps:$4 sm:$0xff]  }
  0x80   :  { %881 = vmatprep.subr.bf16.mxu0 %v9198_v60  ;;  %963 = vmatprep.subr.bf16.mxu1 %v9200_v61  ;;  %v9284_v60 = vld [vmem:[#allocation8 + $0x384] ss:$16 sps:$4 sm:$0xff]   ;;  %v9287_v61 = vld [vmem:[#allocation8 + $0x38c] ss:$16 sps:$4 sm:$0xff]  }
  0x83   :  { %882 = vmatpush1.bf16.msra.mxu0 %v9202_v62  ;;  %964 = vmatpush1.bf16.msra.mxu1 %v9203_v63  ;;  %v9282_v62 = vld [vmem:[#allocation8 + $0x380] ss:$16 sps:$4 sm:$0xff]   ;;  %v9285_v63 = vld [vmem:[#allocation8 + $0x388] ss:$16 sps:$4 sm:$0xff]  }
  0x84   :  { %883 = vmatprep.subr.bf16.mxu0 %v9204_v0  ;;  %965 = vmatprep.subr.bf16.mxu1 %v9206_v3  ;;  %v9290_v0 = vld [vmem:[#allocation8 + $0x3a4] ss:$16 sps:$4 sm:$0xff]   ;;  %v9291_v3 = vld [vmem:[#allocation8 + $0x3a8] ss:$16 sps:$4 sm:$0xff]  }
  0x87   :  { %884 = vmatpush1.bf16.msra.mxu0 %v9208_v4  ;;  %966 = vmatpush1.bf16.msra.mxu1 %v9209_v5  ;;  %v9296_v4 = vld [vmem:[#allocation8 + $0x3c4] ss:$16 sps:$4 sm:$0xff]   ;;  %v9299_v5 = vld [vmem:[#allocation8 + $0x3cc] ss:$16 sps:$4 sm:$0xff]  }
  0x88   :  { %894 = vmatprep.subr.bf16.mxu0 %v9212_v7  ;;  %976 = vmatprep.subr.bf16.mxu1 %v9215_v8  ;;  %v9297_v7 = vld [vmem:[#allocation8 + $0x3c8] ss:$16 sps:$4 sm:$0xff]   ;;  %v9302_v8 = vld [vmem:[#allocation8 + $0x3e4] ss:$16 sps:$4 sm:$0xff]  }
  0x8a   :  { %886 = vmatmul.mubr.bf16.vlgmr.msra.gmra.mrb[0].mxu0 %v81_v11  ;;  %968 = vmatmul.mubr.bf16.vlgmr.msra.gmra.mrb[0].mxu1 %v81_v11  ;;  %v9305_v11 = vld [vmem:[#allocation8 + $0x3ec] ss:$16 sps:$4 sm:$0xff]  }
  0x8b   :  { %895 = vmatpush1.bf16.msra.mxu0 %v9210_v9  ;;  %977 = vmatpush1.bf16.msra.mxu1 %v9213_v10  ;;  %v71_v9 = vld [vmem:[#allocation3 + $0x10] sm:$0xff] }
  0x8c   :  { %896 = vmatprep.subr.bf16.mxu0 %v9218_v12  ;;  %978 = vmatprep.subr.bf16.mxu1 %v9221_v13  ;;  %v75_v10 = vld [vmem:[#allocation6 + $0x10] sm:$0xff]  ;;  %v9303_v13 = vld [vmem:[#allocation8 + $0x3e8] ss:$16 sps:$4 sm:$0xff]  }
  0x8d   :  { %926 = vmatprep.mubr.bf16.mxu0 %v84_v41  ;;  %1008 = vmatprep.mubr.bf16.mxu1 %v84_v41  ;;  %v9300_v12 = vld [vmem:[#allocation8 + $0x3e0] ss:$16 sps:$4 sm:$0xff]   ;;  %v9347_v41 = vld [vmem:[#allocation9 + $0xcc] ss:$16 sps:$4 sm:$0xff]  }
  0x8f   :  { %897 = vmatpush1.bf16.msra.mxu0 %v9216_v14  ;;  %979 = vmatpush1.bf16.msra.mxu1 %v9219_v15  ;;  %v79_v14 = vmul.f32 %v75_v10, %v71_v9  ;;  %v9308_v15 = vld [vmem:[#allocation9 + $0x4] ss:$16 sps:$4 sm:$0xff]   ;;  %v9393_v10 = vld [vmem:[#allocation9 + $0x1c8] ss:$16 sps:$4 sm:$0xff]  }
  0x90   :  { %898 = vmatprep.subr.bf16.mxu0 %v9224_v16  ;;  %980 = vmatprep.subr.bf16.mxu1 %v9227_v17  ;;  %v9311_v16 = vld [vmem:[#allocation9 + $0xc] ss:$16 sps:$4 sm:$0xff]   ;;  %v9306_v17 = vld [vmem:[#allocation9] ss:$16 sps:$4 sm:$0xff]   ;;  %v9392_v9 = vld [vmem:[#allocation9 + $0x1c4] ss:$16 sps:$4 sm:$0xff]  }
  0x93   :  { %899 = vmatpush1.bf16.msra.mxu0 %v9222_v18  ;;  %981 = vmatpush1.bf16.msra.mxu1 %v9225_v19  ;;  %v9309_v18 = vld [vmem:[#allocation9 + $0x8] ss:$16 sps:$4 sm:$0xff]   ;;  %v83_v19 = vpack.c.bf16 %v79_v14, %v79_v14 }
  0x94   :  { %900 = vmatprep.subr.bf16.mxu0 %v9230_v20  ;;  %982 = vmatprep.subr.bf16.mxu1 %v9233_v21  ;;  %v9314_v20 = vld [vmem:[#allocation9 + $0x24] ss:$16 sps:$4 sm:$0xff]   ;;  %v9317_v21 = vld [vmem:[#allocation9 + $0x2c] ss:$16 sps:$4 sm:$0xff]   ;;  %v9399_v14 = vld [vmem:[#allocation9 + $0x1e8] ss:$16 sps:$4 sm:$0xff]  }
  0x97   :  { %901 = vmatpush1.bf16.msra.mxu0 %v9228_v22  ;;  %983 = vmatpush1.bf16.msra.mxu1 %v9231_v23  ;;  %v9312_v22 = vld [vmem:[#allocation9 + $0x20] ss:$16 sps:$4 sm:$0xff]   ;;  %v9315_v23 = vld [vmem:[#allocation9 + $0x28] ss:$16 sps:$4 sm:$0xff]  }
  0x98   :  { %902 = vmatprep.subr.bf16.mxu0 %v9236_v24  ;;  %984 = vmatprep.subr.bf16.mxu1 %v9239_v25  ;;  %v9320_v24 = vld [vmem:[#allocation9 + $0x44] ss:$16 sps:$4 sm:$0xff]   ;;  %v9323_v25 = vld [vmem:[#allocation9 + $0x4c] ss:$16 sps:$4 sm:$0xff]  }
  0x9b   :  { %903 = vmatpush1.bf16.msra.mxu0 %v9234_v26  ;;  %985 = vmatpush1.bf16.msra.mxu1 %v9237_v27  ;;  %v9318_v26 = vld [vmem:[#allocation9 + $0x40] ss:$16 sps:$4 sm:$0xff]   ;;  %v9321_v27 = vld [vmem:[#allocation9 + $0x48] ss:$16 sps:$4 sm:$0xff]  }
  0x9c   :  { %904 = vmatprep.subr.bf16.mxu0 %v9242_v28  ;;  %986 = vmatprep.subr.bf16.mxu1 %v9245_v29  ;;  %v9326_v28 = vld [vmem:[#allocation9 + $0x64] ss:$16 sps:$4 sm:$0xff]   ;;  %v9329_v29 = vld [vmem:[#allocation9 + $0x6c] ss:$16 sps:$4 sm:$0xff]  }
  0x9f   :  { %905 = vmatpush1.bf16.msra.mxu0 %v9240_v30  ;;  %987 = vmatpush1.bf16.msra.mxu1 %v9243_v31  ;;  %v9324_v30 = vld [vmem:[#allocation9 + $0x60] ss:$16 sps:$4 sm:$0xff]   ;;  %v9327_v31 = vld [vmem:[#allocation9 + $0x68] ss:$16 sps:$4 sm:$0xff]  }
  0xa0   :  { %906 = vmatprep.subr.bf16.mxu0 %v9248_v32  ;;  %988 = vmatprep.subr.bf16.mxu1 %v9251_v33  ;;  %v9332_v32 = vld [vmem:[#allocation9 + $0x84] ss:$16 sps:$4 sm:$0xff]   ;;  %v9335_v33 = vld [vmem:[#allocation9 + $0x8c] ss:$16 sps:$4 sm:$0xff]  }
  0xa3   :  { %907 = vmatpush1.bf16.msra.mxu0 %v9246_v35  ;;  %989 = vmatpush1.bf16.msra.mxu1 %v9249_v36  ;;  %v9333_v35 = vld [vmem:[#allocation9 + $0x88] ss:$16 sps:$4 sm:$0xff]   ;;  %v9338_v36 = vld [vmem:[#allocation9 + $0xa4] ss:$16 sps:$4 sm:$0xff]  }
  0xa4   :  { %908 = vmatprep.subr.bf16.mxu0 %v9254_v38  ;;  %990 = vmatprep.subr.bf16.mxu1 %v9257_v40  ;;  %v9336_v38 = vld [vmem:[#allocation9 + $0xa0] ss:$16 sps:$4 sm:$0xff]   ;;  %v9344_v40 = vld [vmem:[#allocation9 + $0xc4] ss:$16 sps:$4 sm:$0xff]  }
  0xa7   :  { %909 = vmatpush1.bf16.msra.mxu0 %v9252_v42  ;;  %991 = vmatpush1.bf16.msra.mxu1 %v9255_v43  ;;  %v9342_v42 = vld [vmem:[#allocation9 + $0xc0] ss:$16 sps:$4 sm:$0xff]   ;;  %v9345_v43 = vld [vmem:[#allocation9 + $0xc8] ss:$16 sps:$4 sm:$0xff]  }
  0xa8   :  { %910 = vmatprep.subr.bf16.mxu0 %v9260_v44  ;;  %992 = vmatprep.subr.bf16.mxu1 %v9263_v45  ;;  %v9350_v44 = vld [vmem:[#allocation9 + $0xe4] ss:$16 sps:$4 sm:$0xff]   ;;  %v9353_v45 = vld [vmem:[#allocation9 + $0xec] ss:$16 sps:$4 sm:$0xff]  }
  0xab   :  { %911 = vmatpush1.bf16.msra.mxu0 %v9258_v46  ;;  %993 = vmatpush1.bf16.msra.mxu1 %v9261_v47  ;;  %v9348_v46 = vld [vmem:[#allocation9 + $0xe0] ss:$16 sps:$4 sm:$0xff]   ;;  %v9351_v47 = vld [vmem:[#allocation9 + $0xe8] ss:$16 sps:$4 sm:$0xff]  }
  0xac   :  { %912 = vmatprep.subr.bf16.mxu0 %v9266_v48  ;;  %994 = vmatprep.subr.bf16.mxu1 %v9269_v49  ;;  %v9356_v48 = vld [vmem:[#allocation9 + $0x104] ss:$16 sps:$4 sm:$0xff]   ;;  %v9359_v49 = vld [vmem:[#allocation9 + $0x10c] ss:$16 sps:$4 sm:$0xff]  }
  0xaf   :  { %913 = vmatpush1.bf16.msra.mxu0 %v9264_v50  ;;  %995 = vmatpush1.bf16.msra.mxu1 %v9267_v51  ;;  %v9354_v50 = vld [vmem:[#allocation9 + $0x100] ss:$16 sps:$4 sm:$0xff]   ;;  %v9357_v51 = vld [vmem:[#allocation9 + $0x108] ss:$16 sps:$4 sm:$0xff]  }
  0xb0   :  { %914 = vmatprep.subr.bf16.mxu0 %v9272_v52  ;;  %996 = vmatprep.subr.bf16.mxu1 %v9275_v53  ;;  %v9362_v52 = vld [vmem:[#allocation9 + $0x124] ss:$16 sps:$4 sm:$0xff]   ;;  %v9365_v53 = vld [vmem:[#allocation9 + $0x12c] ss:$16 sps:$4 sm:$0xff]  }
  0xb3   :  { %915 = vmatpush1.bf16.msra.mxu0 %v9270_v54  ;;  %997 = vmatpush1.bf16.msra.mxu1 %v9273_v55  ;;  %v9360_v54 = vld [vmem:[#allocation9 + $0x120] ss:$16 sps:$4 sm:$0xff]   ;;  %v9363_v55 = vld [vmem:[#allocation9 + $0x128] ss:$16 sps:$4 sm:$0xff]  }
  0xb4   :  { %916 = vmatprep.subr.bf16.mxu0 %v9278_v56  ;;  %998 = vmatprep.subr.bf16.mxu1 %v9281_v57  ;;  %v9368_v56 = vld [vmem:[#allocation9 + $0x144] ss:$16 sps:$4 sm:$0xff]   ;;  %v9371_v57 = vld [vmem:[#allocation9 + $0x14c] ss:$16 sps:$4 sm:$0xff]  }
  0xb7   :  { %917 = vmatpush1.bf16.msra.mxu0 %v9276_v58  ;;  %999 = vmatpush1.bf16.msra.mxu1 %v9279_v59  ;;  %v9366_v58 = vld [vmem:[#allocation9 + $0x140] ss:$16 sps:$4 sm:$0xff]   ;;  %v9369_v59 = vld [vmem:[#allocation9 + $0x148] ss:$16 sps:$4 sm:$0xff]  }
  0xb8   :  { %918 = vmatprep.subr.bf16.mxu0 %v9284_v60  ;;  %1000 = vmatprep.subr.bf16.mxu1 %v9287_v61  ;;  %v9374_v60 = vld [vmem:[#allocation9 + $0x164] ss:$16 sps:$4 sm:$0xff]   ;;  %v9377_v61 = vld [vmem:[#allocation9 + $0x16c] ss:$16 sps:$4 sm:$0xff]  }
  0xbb   :  { %919 = vmatpush1.bf16.msra.mxu0 %v9282_v62  ;;  %1001 = vmatpush1.bf16.msra.mxu1 %v9285_v63  ;;  %v9372_v62 = vld [vmem:[#allocation9 + $0x160] ss:$16 sps:$4 sm:$0xff]   ;;  %v9375_v63 = vld [vmem:[#allocation9 + $0x168] ss:$16 sps:$4 sm:$0xff]  }
  0xbc   :  { %920 = vmatprep.subr.bf16.mxu0 %v9290_v0  ;;  %1002 = vmatprep.subr.bf16.mxu1 %v9293_v1  ;;  %v9380_v0 = vld [vmem:[#allocation9 + $0x184] ss:$16 sps:$4 sm:$0xff]   ;;  %v9383_v1 = vld [vmem:[#allocation9 + $0x18c] ss:$16 sps:$4 sm:$0xff]  }
  0xbf   :  { %921 = vmatpush1.bf16.msra.mxu0 %v9288_v2  ;;  %1003 = vmatpush1.bf16.msra.mxu1 %v9291_v3  ;;  %v9378_v2 = vld [vmem:[#allocation9 + $0x180] ss:$16 sps:$4 sm:$0xff]   ;;  %v9381_v3 = vld [vmem:[#allocation9 + $0x188] ss:$16 sps:$4 sm:$0xff]  }
  0xc0   :  { %922 = vmatprep.subr.bf16.mxu0 %v9296_v4  ;;  %1004 = vmatprep.subr.bf16.mxu1 %v9299_v5  ;;  %v9386_v4 = vld [vmem:[#allocation9 + $0x1a4] ss:$16 sps:$4 sm:$0xff]   ;;  %v9389_v5 = vld [vmem:[#allocation9 + $0x1ac] ss:$16 sps:$4 sm:$0xff]  }
  0xc3   :  { %923 = vmatpush1.bf16.msra.mxu0 %v9294_v6  ;;  %1005 = vmatpush1.bf16.msra.mxu1 %v9297_v7  ;;  %v9384_v6 = vld [vmem:[#allocation9 + $0x1a0] ss:$16 sps:$4 sm:$0xff]   ;;  %v9387_v7 = vld [vmem:[#allocation9 + $0x1a8] ss:$16 sps:$4 sm:$0xff]  }
  0xc4   :  { %924 = vmatprep.subr.bf16.mxu0 %v9302_v8  ;;  %1006 = vmatprep.subr.bf16.mxu1 %v9305_v11  ;;  %v9390_v8 = vld [vmem:[#allocation9 + $0x1c0] ss:$16 sps:$4 sm:$0xff]   ;;  %v9395_v11 = vld [vmem:[#allocation9 + $0x1cc] ss:$16 sps:$4 sm:$0xff]  }
  0xc7   :  { %925 = vmatpush1.bf16.msra.mxu0 %v9300_v12  ;;  %1007 = vmatpush1.bf16.msra.mxu1 %v9303_v13  ;;  %v9398_v12 = vld [vmem:[#allocation9 + $0x1e4] ss:$16 sps:$4 sm:$0xff]   ;;  %v9396_v13 = vld [vmem:[#allocation9 + $0x1e0] ss:$16 sps:$4 sm:$0xff]  }
  0xc8   :  { %1823 = vmatprep.subr.bf16.mxu0 %v9308_v15  ;;  %1905 = vmatprep.subr.bf16.mxu1 %v9311_v16  ;;  %v9401_v15 = vld [vmem:[#allocation9 + $0x1ec] ss:$16 sps:$4 sm:$0xff]   ;;  %v9404_v16 = vld [vmem:[#allocation9 + $0x204] ss:$16 sps:$4 sm:$0xff]  }
  0xca   :  { %927 = vmatmul.mubr.bf16.vlgmr.msra.gmra.mrb[0].mxu0 %v83_v19  ;;  %1009 = vmatmul.mubr.bf16.vlgmr.msra.gmra.mrb[0].mxu1 %v83_v19 }
  0xcb   :  { %1824 = vmatpush1.bf16.msra.mxu0 %v9306_v17  ;;  %1906 = vmatpush1.bf16.msra.mxu1 %v9309_v18  ;;  %v9407_v17 = vld [vmem:[#allocation9 + $0x20c] ss:$16 sps:$4 sm:$0xff]   ;;  %v1024_v18 = vlaneseq }
  0xcc   :  { %1825 = vmatprep.subr.bf16.mxu0 %v9314_v20  ;;  %1907 = vmatprep.subr.bf16.mxu1 %v9317_v21 }
  0xcd   :  { %vm10857_vm0 = vcmp.lt.s32.totalorder %v1024_v18, 256 }
  0xcf   :  { %1826 = vmatpush1.bf16.msra.mxu0 %v9312_v22  ;;  %1908 = vmatpush1.bf16.msra.mxu1 %v9315_v23 }
  0xd0   :  { %1827 = vmatprep.subr.bf16.mxu0 %v9320_v24  ;;  %1909 = vmatprep.subr.bf16.mxu1 %v9323_v25  ;;  %v10849_v25 = vshrl.u32 %v1024_v18, 7  ;;  %v9473_v18 = vld [vmem:[#allocation9 + $0x36c] ss:$16 sps:$4 sm:$0xff]  }
  0xd3   :  { %1828 = vmatpush1.bf16.msra.mxu0 %v9318_v26  ;;  %1910 = vmatpush1.bf16.msra.mxu1 %v9321_v27 }
  0xd4   :  { %1829 = vmatprep.subr.bf16.mxu0 %v9326_v28  ;;  %1911 = vmatprep.subr.bf16.mxu1 %v9329_v29  ;;  %v10852_v28 = vsub.s32 1, %v10849_v25  ;;  %v10855_v29 = vsub.s32 0, %v10849_v25 }
  0xd7   :  { %1830 = vmatpush1.bf16.msra.mxu0 %v9324_v30  ;;  %1912 = vmatpush1.bf16.msra.mxu1 %v9327_v31  ;;  %v10862_v31 = vsub.s32 3, %v10849_v25 }
  0xd8   :  { %1831 = vmatprep.subr.bf16.mxu0 %v9332_v32  ;;  %1913 = vmatprep.subr.bf16.mxu1 %v9335_v33 }
  0xdb   :  { %1832 = vmatpush1.bf16.msra.mxu0 %v9330_v34  ;;  %1914 = vmatpush1.bf16.msra.mxu1 %v9333_v35  ;;  %v9402_v35 = vld [vmem:[#allocation9 + $0x200] ss:$16 sps:$4 sm:$0xff]  }
  0xdc   :  { %1833 = vmatprep.subr.bf16.mxu0 %v9338_v36  ;;  %1915 = vmatprep.subr.bf16.mxu1 %v9341_v37  ;;  %v9405_v36 = vld [vmem:[#allocation9 + $0x208] ss:$16 sps:$4 sm:$0xff]  }
  0xdf   :  { %1834 = vmatpush1.bf16.msra.mxu0 %v9336_v38  ;;  %1916 = vmatpush1.bf16.msra.mxu1 %v9339_v39 }
  0xe0   :  { %1835 = vmatprep.subr.bf16.mxu0 %v9344_v40  ;;  %1917 = vmatprep.subr.bf16.mxu1 %v9347_v41  ;;  %v9410_v40 = vld [vmem:[#allocation9 + $0x224] ss:$16 sps:$4 sm:$0xff]   ;;  %v9413_v41 = vld [vmem:[#allocation9 + $0x22c] ss:$16 sps:$4 sm:$0xff]  }
  0xe3   :  { %1836 = vmatpush1.bf16.msra.mxu0 %v9342_v42  ;;  %1918 = vmatpush1.bf16.msra.mxu1 %v9345_v43  ;;  %v9408_v42 = vld [vmem:[#allocation9 + $0x220] ss:$16 sps:$4 sm:$0xff]   ;;  %v9411_v43 = vld [vmem:[#allocation9 + $0x228] ss:$16 sps:$4 sm:$0xff]  }
  0xe4   :  { %1837 = vmatprep.subr.bf16.mxu0 %v9350_v44  ;;  %1919 = vmatprep.subr.bf16.mxu1 %v9353_v45  ;;  %v9416_v45 = vld [vmem:[#allocation9 + $0x244] ss:$16 sps:$4 sm:$0xff]  }
  0xe7   :  { %1838 = vmatpush1.bf16.msra.mxu0 %v9348_v46  ;;  %1920 = vmatpush1.bf16.msra.mxu1 %v9351_v47  ;;  %v9419_v46 = vld [vmem:[#allocation9 + $0x24c] ss:$16 sps:$4 sm:$0xff]   ;;  %v9414_v47 = vld [vmem:[#allocation9 + $0x240] ss:$16 sps:$4 sm:$0xff]  }
  0xe8   :  { %1839 = vmatprep.subr.bf16.mxu0 %v9356_v48  ;;  %1921 = vmatprep.subr.bf16.mxu1 %v9359_v49  ;;  %v9417_v48 = vld [vmem:[#allocation9 + $0x248] ss:$16 sps:$4 sm:$0xff]   ;;  %v9422_v49 = vld [vmem:[#allocation9 + $0x264] ss:$16 sps:$4 sm:$0xff]  }
  0xeb   :  { %1840 = vmatpush1.bf16.msra.mxu0 %v9354_v50  ;;  %1922 = vmatpush1.bf16.msra.mxu1 %v9357_v51  ;;  %v9425_v50 = vld [vmem:[#allocation9 + $0x26c] ss:$16 sps:$4 sm:$0xff]   ;;  %v9420_v51 = vld [vmem:[#allocation9 + $0x260] ss:$16 sps:$4 sm:$0xff]  }
  0xec   :  { %1841 = vmatprep.subr.bf16.mxu0 %v9362_v52  ;;  %1923 = vmatprep.subr.bf16.mxu1 %v9365_v53  ;;  %v9423_v52 = vld [vmem:[#allocation9 + $0x268] ss:$16 sps:$4 sm:$0xff]   ;;  %v9428_v53 = vld [vmem:[#allocation9 + $0x284] ss:$16 sps:$4 sm:$0xff]  }
  0xef   :  { %1842 = vmatpush1.bf16.msra.mxu0 %v9360_v54  ;;  %1924 = vmatpush1.bf16.msra.mxu1 %v9363_v55  ;;  %v9431_v54 = vld [vmem:[#allocation9 + $0x28c] ss:$16 sps:$4 sm:$0xff]   ;;  %v9426_v55 = vld [vmem:[#allocation9 + $0x280] ss:$16 sps:$4 sm:$0xff]  }
  0xf0   :  { %1843 = vmatprep.subr.bf16.mxu0 %v9368_v56  ;;  %1925 = vmatprep.subr.bf16.mxu1 %v9371_v57  ;;  %v9429_v56 = vld [vmem:[#allocation9 + $0x288] ss:$16 sps:$4 sm:$0xff]   ;;  %v9434_v57 = vld [vmem:[#allocation9 + $0x2a4] ss:$16 sps:$4 sm:$0xff]  }
  0xf3   :  { %1844 = vmatpush1.bf16.msra.mxu0 %v9366_v58  ;;  %1926 = vmatpush1.bf16.msra.mxu1 %v9369_v59  ;;  %v9437_v58 = vld [vmem:[#allocation9 + $0x2ac] ss:$16 sps:$4 sm:$0xff]   ;;  %v9432_v59 = vld [vmem:[#allocation9 + $0x2a0] ss:$16 sps:$4 sm:$0xff]  }
  0xf4   :  { %1845 = vmatprep.subr.bf16.mxu0 %v9374_v60  ;;  %1927 = vmatprep.subr.bf16.mxu1 %v9377_v61  ;;  %v9435_v60 = vld [vmem:[#allocation9 + $0x2a8] ss:$16 sps:$4 sm:$0xff]   ;;  %v9440_v61 = vld [vmem:[#allocation9 + $0x2c4] ss:$16 sps:$4 sm:$0xff]  }
  0xf7   :  { %1846 = vmatpush1.bf16.msra.mxu0 %v9372_v62  ;;  %1928 = vmatpush1.bf16.msra.mxu1 %v9375_v63  ;;  %v9443_v62 = vld [vmem:[#allocation9 + $0x2cc] ss:$16 sps:$4 sm:$0xff]   ;;  %v9438_v63 = vld [vmem:[#allocation9 + $0x2c0] ss:$16 sps:$4 sm:$0xff]  }
  0xf8   :  { %1847 = vmatprep.subr.bf16.mxu0 %v9380_v0  ;;  %1929 = vmatprep.subr.bf16.mxu1 %v9383_v1  ;;  %v9441_v0 = vld [vmem:[#allocation9 + $0x2c8] ss:$16 sps:$4 sm:$0xff]   ;;  %v9446_v1 = vld [vmem:[#allocation9 + $0x2e4] ss:$16 sps:$4 sm:$0xff]  }
  0xfb   :  { %1848 = vmatpush1.bf16.msra.mxu0 %v9378_v2  ;;  %1930 = vmatpush1.bf16.msra.mxu1 %v9381_v3  ;;  %v9449_v2 = vld [vmem:[#allocation9 + $0x2ec] ss:$16 sps:$4 sm:$0xff]   ;;  %v9444_v3 = vld [vmem:[#allocation9 + $0x2e0] ss:$16 sps:$4 sm:$0xff]  }
  0xfc   :  { %1849 = vmatprep.subr.bf16.mxu0 %v9386_v4  ;;  %1931 = vmatprep.subr.bf16.mxu1 %v9389_v5  ;;  %v9447_v4 = vld [vmem:[#allocation9 + $0x2e8] ss:$16 sps:$4 sm:$0xff]   ;;  %v9452_v5 = vld [vmem:[#allocation9 + $0x304] ss:$16 sps:$4 sm:$0xff]  }
  0xff   :  { %1850 = vmatpush1.bf16.msra.mxu0 %v9384_v6  ;;  %1932 = vmatpush1.bf16.msra.mxu1 %v9387_v7  ;;  %v9455_v6 = vld [vmem:[#allocation9 + $0x30c] ss:$16 sps:$4 sm:$0xff]   ;;  %v9450_v7 = vld [vmem:[#allocation9 + $0x300] ss:$16 sps:$4 sm:$0xff]  }
 0x100   :  { %1851 = vmatprep.subr.bf16.mxu0 %v9392_v9  ;;  %1933 = vmatprep.subr.bf16.mxu1 %v9395_v11  ;;  %v9458_v9 = vld [vmem:[#allocation9 + $0x324] ss:$16 sps:$4 sm:$0xff]   ;;  %v9456_v11 = vld [vmem:[#allocation9 + $0x320] ss:$16 sps:$4 sm:$0xff]  }
 0x103   :  { %1852 = vmatpush1.bf16.msra.mxu0 %v9390_v8  ;;  %1934 = vmatpush1.bf16.msra.mxu1 %v9393_v10  ;;  %v9453_v8 = vld [vmem:[#allocation9 + $0x308] ss:$16 sps:$4 sm:$0xff]   ;;  %v9461_v10 = vld [vmem:[#allocation9 + $0x32c] ss:$16 sps:$4 sm:$0xff]  }
 0x104   :  { %1853 = vmatprep.subr.bf16.mxu0 %v9398_v12  ;;  %1935 = vmatprep.subr.bf16.mxu1 %v9401_v15  ;;  %v9459_v12 = vld [vmem:[#allocation9 + $0x328] ss:$16 sps:$4 sm:$0xff]   ;;  %v9462_v15 = vld [vmem:[#allocation9 + $0x340] ss:$16 sps:$4 sm:$0xff]  }
 0x107   :  { %1854 = vmatpush1.bf16.msra.mxu0 %v9396_v13  ;;  %1936 = vmatpush1.bf16.msra.mxu1 %v9399_v14  ;;  %v9464_v13 = vld [vmem:[#allocation9 + $0x344] ss:$16 sps:$4 sm:$0xff]   ;;  %v9467_v14 = vld [vmem:[#allocation9 + $0x34c] ss:$16 sps:$4 sm:$0xff]  }
 0x108   :  { %1864 = vmatprep.subr.bf16.mxu0 %v9404_v16  ;;  %1946 = vmatprep.subr.bf16.mxu1 %v9407_v17  ;;  %v9465_v16 = vld [vmem:[#allocation9 + $0x348] ss:$16 sps:$4 sm:$0xff]   ;;  %v9470_v17 = vld [vmem:[#allocation9 + $0x364] ss:$16 sps:$4 sm:$0xff]  }
 0x19d   :  { %v928_v19 = vpop.f32.mrb[0].mxu0  ;;  %v1010_v20 = vpop.f32.mrb[0].mxu1 }
 0x19e   :  { %1017 = vst [vmem:[#allocation2] sm:$0xff] %v928_v19  ;;  %1019 = vst [vmem:[#allocation2 + $0x10] sm:$0xff] %v1010_v20  ;;  %v930_v21 = vpop.f32.mrb[1].mxu0  ;;  %v1012_v22 = vpop.f32.mrb[1].mxu1  ;;  %v9468_v19 = vld [vmem:[#allocation9 + $0x360] ss:$16 sps:$4 sm:$0xff]  }
 0x19f   :  { %1018 = vst [vmem:[#allocation2 + $0x8] sm:$0xff] %v930_v21  ;;  %1020 = vst [vmem:[#allocation2 + $0x18] sm:$0xff] %v1012_v22  ;;  %v932_v23 = vpop.f32.mrb[2].mxu0  ;;  %v1014_v24 = vpop.f32.mrb[2].mxu1  ;;  %v9471_v20 = vld [vmem:[#allocation9 + $0x368] ss:$16 sps:$4 sm:$0xff]  }
 0x1a0   :  { %v933_v26 = vpop.f32.mrb[3].mxu0  ;;  %v1015_v27 = vpop.f32.mrb[3].mxu1  ;;  %v9476_v21 = vld [vmem:[#allocation9 + $0x384] ss:$16 sps:$4 sm:$0xff]   ;;  %v9479_v22 = vld [vmem:[#allocation9 + $0x38c] ss:$16 sps:$4 sm:$0xff]  }
 0x1a1   :  { %v9474_v23 = vld [vmem:[#allocation9 + $0x380] ss:$16 sps:$4 sm:$0xff]   ;;  %v9477_v24 = vld [vmem:[#allocation9 + $0x388] ss:$16 sps:$4 sm:$0xff]   ;;  %v9482_v26 = vld [vmem:[#allocation9 + $0x3a4] ss:$16 sps:$4 sm:$0xff]  }
 0x1a2   :  { %v9485_v27 = vld [vmem:[#allocation9 + $0x3ac] ss:$16 sps:$4 sm:$0xff]  }
 0x1a6   :  { %v10864_v32 = vld [vmem:[#allocation2] ss:$8 sm:$0xf] }
 0x1a7   :  { %1028 = vst.msk [vmem:[#allocation11] ss:$8 sm:$0x3] %vm10857_vm0, %v10864_v32  ;;  %v1038_v33 = vrot.slane %v10864_v32, %v10852_v28  ;;  %v1034_v34 = vrot.slane %v10864_v32, %v10855_v29  ;;  %v1046_v37 = vrot.slane %v10864_v32, %v10862_v31 }
 0x1a9   :  { %v1052_v38 = vpack.c.bf16 %v1038_v33, %v1038_v33  ;;  %v1051_v39 = vpack.c.bf16 %v1034_v34, %v1034_v34  ;;  %v1054_v44 = vpack.c.bf16 %v1046_v37, %v1046_v37  ;;  %v9480_v33 = vld [vmem:[#allocation9 + $0x3a0] ss:$16 sps:$4 sm:$0xff]   ;;  %v9483_v34 = vld [vmem:[#allocation9 + $0x3a8] ss:$16 sps:$4 sm:$0xff]  }
 0x1aa   :  { %v9486_v37 = vld [vmem:[#allocation9 + $0x3c0] ss:$16 sps:$4 sm:$0xff]  }
 0x1ab   :  { %1855 = vmatprep.mubr.bf16.mxu0 %v1052_v38  ;;  %1937 = vmatprep.mubr.bf16.mxu1 %v1052_v38  ;;  %v9489_v38 = vld [vmem:[#allocation9 + $0x3c8] ss:$16 sps:$4 sm:$0xff]  }
 0x1ac   :  { %1856 = vmatmul.mubr.bf16.vlgmr.msra.gmra.mrb[4].mxu0 %v1051_v39  ;;  %1938 = vmatmul.mubr.bf16.vlgmr.msra.gmra.mrb[4].mxu1 %v1051_v39  ;;  %v9494_v39 = vld [vmem:[#allocation9 + $0x3e4] ss:$16 sps:$4 sm:$0xff]  }
 0x1ad   :  { %1865 = vmatpush1.bf16.msra.mxu0 %v9402_v35  ;;  %1947 = vmatpush1.bf16.msra.mxu1 %v9405_v36  ;;  %v9488_v35 = vld [vmem:[#allocation9 + $0x3c4] ss:$16 sps:$4 sm:$0xff]   ;;  %v9491_v36 = vld [vmem:[#allocation9 + $0x3cc] ss:$16 sps:$4 sm:$0xff]  }
 0x1ae   :  { %1896 = vmatprep.mubr.bf16.mxu0 %v1054_v44  ;;  %1978 = vmatprep.mubr.bf16.mxu1 %v1054_v44  ;;  %v9500_v44 = vld [vmem:[#allocation9 + $0x404] ss:$16 sps:$4 sm:$0xff]  }
 0x1af   :  { %1866 = vmatprep.subr.bf16.mxu0 %v9410_v40  ;;  %1948 = vmatprep.subr.bf16.mxu1 %v9413_v41  ;;  %v9497_v40 = vld [vmem:[#allocation9 + $0x3ec] ss:$16 sps:$4 sm:$0xff]   ;;  %v10876_v41 = vsub.s32 2, %v10849_v25 }
 0x1b1   :  { %1867 = vmatpush1.bf16.msra.mxu0 %v9408_v42  ;;  %1949 = vmatpush1.bf16.msra.mxu1 %v9411_v43  ;;  %v9492_v42 = vld [vmem:[#allocation9 + $0x3e0] ss:$16 sps:$4 sm:$0xff]   ;;  %v9495_v43 = vld [vmem:[#allocation9 + $0x3e8] ss:$16 sps:$4 sm:$0xff]  }
 0x1b2   :  { %1868 = vmatprep.subr.bf16.mxu0 %v9416_v45  ;;  %1950 = vmatprep.subr.bf16.mxu1 %v9419_v46  ;;  %v9503_v45 = vld [vmem:[#allocation9 + $0x40c] ss:$16 sps:$4 sm:$0xff]   ;;  %v1042_v46 = vrot.slane %v10864_v32, %v10876_v41 }
 0x1b5   :  { %1869 = vmatpush1.bf16.msra.mxu0 %v9414_v47  ;;  %1951 = vmatpush1.bf16.msra.mxu1 %v9417_v48  ;;  %v9498_v47 = vld [vmem:[#allocation9 + $0x400] ss:$16 sps:$4 sm:$0xff]   ;;  %v9501_v48 = vld [vmem:[#allocation9 + $0x408] ss:$16 sps:$4 sm:$0xff]  }
 0x1b6   :  { %1870 = vmatprep.subr.bf16.mxu0 %v9422_v49  ;;  %1952 = vmatprep.subr.bf16.mxu1 %v9425_v50  ;;  %v9506_v49 = vld [vmem:[#allocation9 + $0x424] ss:$16 sps:$4 sm:$0xff]   ;;  %v9509_v50 = vld [vmem:[#allocation9 + $0x42c] ss:$16 sps:$4 sm:$0xff]  }
 0x1b9   :  { %1871 = vmatpush1.bf16.msra.mxu0 %v9420_v51  ;;  %1953 = vmatpush1.bf16.msra.mxu1 %v9423_v52  ;;  %v1053_v51 = vpack.c.bf16 %v1042_v46, %v1042_v46  ;;  %v9504_v52 = vld [vmem:[#allocation9 + $0x420] ss:$16 sps:$4 sm:$0xff]   ;;  %v9587_v46 = vld [vmem:[#allocation9 + $0x5cc] ss:$16 sps:$4 sm:$0xff]  }
 0x1ba   :  { %1872 = vmatprep.subr.bf16.mxu0 %v9428_v53  ;;  %1954 = vmatprep.subr.bf16.mxu1 %v9431_v54  ;;  %v9507_v53 = vld [vmem:[#allocation9 + $0x428] ss:$16 sps:$4 sm:$0xff]   ;;  %v9512_v54 = vld [vmem:[#allocation9 + $0x444] ss:$16 sps:$4 sm:$0xff]  }
 0x1bd   :  { %1873 = vmatpush1.bf16.msra.mxu0 %v9426_v55  ;;  %1955 = vmatpush1.bf16.msra.mxu1 %v9429_v56  ;;  %v9515_v55 = vld [vmem:[#allocation9 + $0x44c] ss:$16 sps:$4 sm:$0xff]   ;;  %v9510_v56 = vld [vmem:[#allocation9 + $0x440] ss:$16 sps:$4 sm:$0xff]  }
 0x1be   :  { %1874 = vmatprep.subr.bf16.mxu0 %v9434_v57  ;;  %1956 = vmatprep.subr.bf16.mxu1 %v9437_v58  ;;  %v9513_v57 = vld [vmem:[#allocation9 + $0x448] ss:$16 sps:$4 sm:$0xff]   ;;  %v9518_v58 = vld [vmem:[#allocation9 + $0x464] ss:$16 sps:$4 sm:$0xff]  }
 0x1c1   :  { %1875 = vmatpush1.bf16.msra.mxu0 %v9432_v59  ;;  %1957 = vmatpush1.bf16.msra.mxu1 %v9435_v60  ;;  %v9521_v59 = vld [vmem:[#allocation9 + $0x46c] ss:$16 sps:$4 sm:$0xff]   ;;  %v9516_v60 = vld [vmem:[#allocation9 + $0x460] ss:$16 sps:$4 sm:$0xff]  }
 0x1c2   :  { %1876 = vmatprep.subr.bf16.mxu0 %v9440_v61  ;;  %1958 = vmatprep.subr.bf16.mxu1 %v9443_v62  ;;  %v9519_v61 = vld [vmem:[#allocation9 + $0x468] ss:$16 sps:$4 sm:$0xff]   ;;  %v9524_v62 = vld [vmem:[#allocation9 + $0x484] ss:$16 sps:$4 sm:$0xff]  }
 0x1c5   :  { %1877 = vmatpush1.bf16.msra.mxu0 %v9438_v63  ;;  %1959 = vmatpush1.bf16.msra.mxu1 %v9441_v0  ;;  %v9527_v63 = vld [vmem:[#allocation9 + $0x48c] ss:$16 sps:$4 sm:$0xff]   ;;  %v9522_v0 = vld [vmem:[#allocation9 + $0x480] ss:$16 sps:$4 sm:$0xff]  }
 0x1c6   :  { %1878 = vmatprep.subr.bf16.mxu0 %v9446_v1  ;;  %1960 = vmatprep.subr.bf16.mxu1 %v9449_v2  ;;  %v9525_v1 = vld [vmem:[#allocation9 + $0x488] ss:$16 sps:$4 sm:$0xff]   ;;  %v9530_v2 = vld [vmem:[#allocation9 + $0x4a4] ss:$16 sps:$4 sm:$0xff]  }
 0x1c9   :  { %1879 = vmatpush1.bf16.msra.mxu0 %v9444_v3  ;;  %1961 = vmatpush1.bf16.msra.mxu1 %v9447_v4  ;;  %v9533_v3 = vld [vmem:[#allocation9 + $0x4ac] ss:$16 sps:$4 sm:$0xff]   ;;  %v9528_v4 = vld [vmem:[#allocation9 + $0x4a0] ss:$16 sps:$4 sm:$0xff]  }
 0x1ca   :  { %1880 = vmatprep.subr.bf16.mxu0 %v9452_v5  ;;  %1962 = vmatprep.subr.bf16.mxu1 %v9455_v6  ;;  %v9531_v5 = vld [vmem:[#allocation9 + $0x4a8] ss:$16 sps:$4 sm:$0xff]   ;;  %v9536_v6 = vld [vmem:[#allocation9 + $0x4c4] ss:$16 sps:$4 sm:$0xff]  }
 0x1cd   :  { %1881 = vmatpush1.bf16.msra.mxu0 %v9450_v7  ;;  %1963 = vmatpush1.bf16.msra.mxu1 %v9453_v8  ;;  %v9539_v7 = vld [vmem:[#allocation9 + $0x4cc] ss:$16 sps:$4 sm:$0xff]   ;;  %v9534_v8 = vld [vmem:[#allocation9 + $0x4c0] ss:$16 sps:$4 sm:$0xff]  }
 0x1ce   :  { %1882 = vmatprep.subr.bf16.mxu0 %v9458_v9  ;;  %1964 = vmatprep.subr.bf16.mxu1 %v9461_v10  ;;  %v9537_v9 = vld [vmem:[#allocation9 + $0x4c8] ss:$16 sps:$4 sm:$0xff]   ;;  %v9542_v10 = vld [vmem:[#allocation9 + $0x4e4] ss:$16 sps:$4 sm:$0xff]  }
 0x1d1   :  { %1883 = vmatpush1.bf16.msra.mxu0 %v9456_v11  ;;  %1965 = vmatpush1.bf16.msra.mxu1 %v9459_v12  ;;  %v9545_v11 = vld [vmem:[#allocation9 + $0x4ec] ss:$16 sps:$4 sm:$0xff]   ;;  %v9540_v12 = vld [vmem:[#allocation9 + $0x4e0] ss:$16 sps:$4 sm:$0xff]  }
 0x1d2   :  { %1884 = vmatprep.subr.bf16.mxu0 %v9464_v13  ;;  %1966 = vmatprep.subr.bf16.mxu1 %v9467_v14  ;;  %v9543_v13 = vld [vmem:[#allocation9 + $0x4e8] ss:$16 sps:$4 sm:$0xff]   ;;  %v9548_v14 = vld [vmem:[#allocation9 + $0x504] ss:$16 sps:$4 sm:$0xff]  }
 0x1d5   :  { %1885 = vmatpush1.bf16.msra.mxu0 %v9462_v15  ;;  %1967 = vmatpush1.bf16.msra.mxu1 %v9465_v16  ;;  %v9551_v15 = vld [vmem:[#allocation9 + $0x50c] ss:$16 sps:$4 sm:$0xff]   ;;  %v9546_v16 = vld [vmem:[#allocation9 + $0x500] ss:$16 sps:$4 sm:$0xff]  }
 0x1d6   :  { %1886 = vmatprep.subr.bf16.mxu0 %v9470_v17  ;;  %1968 = vmatprep.subr.bf16.mxu1 %v9473_v18  ;;  %v9549_v17 = vld [vmem:[#allocation9 + $0x508] ss:$16 sps:$4 sm:$0xff]   ;;  %v9554_v18 = vld [vmem:[#allocation9 + $0x524] ss:$16 sps:$4 sm:$0xff]  }
 0x1d9   :  { %1887 = vmatpush1.bf16.msra.mxu0 %v9468_v19  ;;  %1969 = vmatpush1.bf16.msra.mxu1 %v9471_v20  ;;  %v9557_v19 = vld [vmem:[#allocation9 + $0x52c] ss:$16 sps:$4 sm:$0xff]   ;;  %v9552_v20 = vld [vmem:[#allocation9 + $0x520] ss:$16 sps:$4 sm:$0xff]  }
 0x1da   :  { %1888 = vmatprep.subr.bf16.mxu0 %v9476_v21  ;;  %1970 = vmatprep.subr.bf16.mxu1 %v9479_v22  ;;  %v9555_v21 = vld [vmem:[#allocation9 + $0x528] ss:$16 sps:$4 sm:$0xff]   ;;  %v9560_v22 = vld [vmem:[#allocation9 + $0x544] ss:$16 sps:$4 sm:$0xff]  }
 0x1dd   :  { %1889 = vmatpush1.bf16.msra.mxu0 %v9474_v23  ;;  %1971 = vmatpush1.bf16.msra.mxu1 %v9477_v24  ;;  %v9563_v23 = vld [vmem:[#allocation9 + $0x54c] ss:$16 sps:$4 sm:$0xff]   ;;  %v9558_v24 = vld [vmem:[#allocation9 + $0x540] ss:$16 sps:$4 sm:$0xff]  }
 0x1de   :  { %1890 = vmatprep.subr.bf16.mxu0 %v9482_v26  ;;  %1972 = vmatprep.subr.bf16.mxu1 %v9485_v27  ;;  %v9561_v26 = vld [vmem:[#allocation9 + $0x548] ss:$16 sps:$4 sm:$0xff]   ;;  %v9566_v27 = vld [vmem:[#allocation9 + $0x564] ss:$16 sps:$4 sm:$0xff]  }
 0x1e1   :  { %1891 = vmatpush1.bf16.msra.mxu0 %v9480_v33  ;;  %1973 = vmatpush1.bf16.msra.mxu1 %v9483_v34  ;;  %v9569_v33 = vld [vmem:[#allocation9 + $0x56c] ss:$16 sps:$4 sm:$0xff]   ;;  %v9564_v34 = vld [vmem:[#allocation9 + $0x560] ss:$16 sps:$4 sm:$0xff]  }
 0x1e2   :  { %1892 = vmatprep.subr.bf16.mxu0 %v9488_v35  ;;  %1974 = vmatprep.subr.bf16.mxu1 %v9491_v36  ;;  %v9567_v35 = vld [vmem:[#allocation9 + $0x568] ss:$16 sps:$4 sm:$0xff]   ;;  %v9572_v36 = vld [vmem:[#allocation9 + $0x584] ss:$16 sps:$4 sm:$0xff]  }
 0x1e5   :  { %1893 = vmatpush1.bf16.msra.mxu0 %v9486_v37  ;;  %1975 = vmatpush1.bf16.msra.mxu1 %v9489_v38  ;;  %v9575_v37 = vld [vmem:[#allocation9 + $0x58c] ss:$16 sps:$4 sm:$0xff]   ;;  %v9570_v38 = vld [vmem:[#allocation9 + $0x580] ss:$16 sps:$4 sm:$0xff]  }
 0x1e6   :  { %1894 = vmatprep.subr.bf16.mxu0 %v9494_v39  ;;  %1976 = vmatprep.subr.bf16.mxu1 %v9497_v40  ;;  %v9573_v39 = vld [vmem:[#allocation9 + $0x588] ss:$16 sps:$4 sm:$0xff]   ;;  %v9578_v40 = vld [vmem:[#allocation9 + $0x5a4] ss:$16 sps:$4 sm:$0xff]  }
 0x1e9   :  { %1895 = vmatpush1.bf16.msra.mxu0 %v9492_v42  ;;  %1977 = vmatpush1.bf16.msra.mxu1 %v9495_v43  ;;  %v9581_v42 = vld [vmem:[#allocation9 + $0x5ac] ss:$16 sps:$4 sm:$0xff]   ;;  %v9576_v43 = vld [vmem:[#allocation9 + $0x5a0] ss:$16 sps:$4 sm:$0xff]  }
 0x1ea   :  { %2819 = vmatprep.subr.bf16.mxu0 %v9500_v44  ;;  %2901 = vmatprep.subr.bf16.mxu1 %v9503_v45  ;;  %v9579_v44 = vld [vmem:[#allocation9 + $0x5a8] ss:$16 sps:$4 sm:$0xff]   ;;  %v9584_v45 = vld [vmem:[#allocation9 + $0x5c4] ss:$16 sps:$4 sm:$0xff]  }
 0x1ec   :  { %1897 = vmatmul.mubr.bf16.vlgmr.msra.gmra.mrb[4].mxu0 %v1053_v51  ;;  %1979 = vmatmul.mubr.bf16.vlgmr.msra.gmra.mrb[4].mxu1 %v1053_v51  ;;  %v9588_v51 = vld [vmem:[#allocation9 + $0x5e0] ss:$16 sps:$4 sm:$0xff]  }
 0x1ed   :  { %2820 = vmatpush1.bf16.msra.mxu0 %v9498_v47  ;;  %2902 = vmatpush1.bf16.msra.mxu1 %v9501_v48  ;;  %v9582_v47 = vld [vmem:[#allocation9 + $0x5c0] ss:$16 sps:$4 sm:$0xff]   ;;  %v9585_v48 = vld [vmem:[#allocation9 + $0x5c8] ss:$16 sps:$4 sm:$0xff]  }
 0x1ee   :  { %2821 = vmatprep.subr.bf16.mxu0 %v9506_v49  ;;  %2903 = vmatprep.subr.bf16.mxu1 %v9509_v50  ;;  %v9590_v49 = vld [vmem:[#allocation9 + $0x5e4] ss:$16 sps:$4 sm:$0xff]   ;;  %v9593_v50 = vld [vmem:[#allocation9 + $0x5ec] ss:$16 sps:$4 sm:$0xff]  }
 0x1f1   :  { %2822 = vmatpush1.bf16.msra.mxu0 %v9504_v52  ;;  %2904 = vmatpush1.bf16.msra.mxu1 %v9507_v53  ;;  %v9591_v52 = vld [vmem:[#allocation9 + $0x5e8] ss:$16 sps:$4 sm:$0xff]   ;;  %v9596_v53 = vld [vmem:[#allocation9 + $0x604] ss:$16 sps:$4 sm:$0xff]  }
 0x1f2   :  { %2823 = vmatprep.subr.bf16.mxu0 %v9512_v54  ;;  %2905 = vmatprep.subr.bf16.mxu1 %v9515_v55  ;;  %v9599_v54 = vld [vmem:[#allocation9 + $0x60c] ss:$16 sps:$4 sm:$0xff]   ;;  %v10774_v55 = vmov 1966171168  }
 0x1f5   :  { %2824 = vmatpush1.bf16.msra.mxu0 %v9510_v56  ;;  %2906 = vmatpush1.bf16.msra.mxu1 %v9513_v57  ;;  %v1996_v56 = vunpack.c.l.s4 %v10774_v55  ;;  %v9647_v55 = vld [vmem:[#allocation9 + $0x70c] ss:$16 sps:$4 sm:$0xff]  }
 0x1f6   :  { %2825 = vmatprep.subr.bf16.mxu0 %v9518_v58  ;;  %2907 = vmatprep.subr.bf16.mxu1 %v9521_v59 }
 0x1f7   :  { %v1997_v57 = vunpack.c.0.s8 %v1996_v56  ;;  %v9642_v56 = vld [vmem:[#allocation9 + $0x700] ss:$16 sps:$4 sm:$0xff]  }
 0x1f9   :  { %2826 = vmatpush1.bf16.msra.mxu0 %v9516_v60  ;;  %2908 = vmatpush1.bf16.msra.mxu1 %v9519_v61  ;;  %v10881_v58 = vsub.s32 %v1997_v57, %v10849_v25  ;;  %v2019_v25 = vrot.slane %v10864_v32, 2  ;;  %v9645_v57 = vld [vmem:[#allocation9 + $0x708] ss:$16 sps:$4 sm:$0xff]  }
 0x1fa   :  { %2827 = vmatprep.subr.bf16.mxu0 %v9524_v62  ;;  %2909 = vmatprep.subr.bf16.mxu1 %v9527_v63 }
 0x1fd   :  { %2828 = vmatpush1.bf16.msra.mxu0 %v9522_v0  ;;  %2910 = vmatpush1.bf16.msra.mxu1 %v9525_v1 }
 0x1fe   :  { %2829 = vmatprep.subr.bf16.mxu0 %v9530_v2  ;;  %2911 = vmatprep.subr.bf16.mxu1 %v9533_v3 }
 0x201   :  { %2830 = vmatpush1.bf16.msra.mxu0 %v9528_v4  ;;  %2912 = vmatpush1.bf16.msra.mxu1 %v9531_v5 }
 0x202   :  { %2831 = vmatprep.subr.bf16.mxu0 %v9536_v6  ;;  %2913 = vmatprep.subr.bf16.mxu1 %v9539_v7 }
 0x205   :  { %2832 = vmatpush1.bf16.msra.mxu0 %v9534_v8  ;;  %2914 = vmatpush1.bf16.msra.mxu1 %v9537_v9  ;;  %v1988_v9 = vld [vmem:[#allocation2 + $0x1] ss:$8 sm:$0xf] }
 0x206   :  { %2833 = vmatprep.subr.bf16.mxu0 %v9542_v10  ;;  %2915 = vmatprep.subr.bf16.mxu1 %v9545_v11 }
 0x209   :  { %2834 = vmatpush1.bf16.msra.mxu0 %v9540_v12  ;;  %2916 = vmatpush1.bf16.msra.mxu1 %v9543_v13 }
 0x20a   :  { %2835 = vmatprep.subr.bf16.mxu0 %v9548_v14  ;;  %2917 = vmatprep.subr.bf16.mxu1 %v9551_v15 }
 0x20d   :  { %2836 = vmatpush1.bf16.msra.mxu0 %v9546_v16  ;;  %2918 = vmatpush1.bf16.msra.mxu1 %v9549_v17  ;;  %v9594_v16 = vld [vmem:[#allocation9 + $0x600] ss:$16 sps:$4 sm:$0xff]   ;;  %v9597_v17 = vld [vmem:[#allocation9 + $0x608] ss:$16 sps:$4 sm:$0xff]  }
 0x20e   :  { %2837 = vmatprep.subr.bf16.mxu0 %v9554_v18  ;;  %2919 = vmatprep.subr.bf16.mxu1 %v9557_v19  ;;  %v9602_v18 = vld [vmem:[#allocation9 + $0x624] ss:$16 sps:$4 sm:$0xff]   ;;  %v9605_v19 = vld [vmem:[#allocation9 + $0x62c] ss:$16 sps:$4 sm:$0xff]  }
 0x211   :  { %2838 = vmatpush1.bf16.msra.mxu0 %v9552_v20  ;;  %2920 = vmatpush1.bf16.msra.mxu1 %v9555_v21  ;;  %v9600_v21 = vld [vmem:[#allocation9 + $0x620] ss:$16 sps:$4 sm:$0xff]  }
 0x212   :  { %2839 = vmatprep.subr.bf16.mxu0 %v9560_v22  ;;  %2921 = vmatprep.subr.bf16.mxu1 %v9563_v23  ;;  %v9603_v22 = vld [vmem:[#allocation9 + $0x628] ss:$16 sps:$4 sm:$0xff]   ;;  %v9608_v23 = vld [vmem:[#allocation9 + $0x644] ss:$16 sps:$4 sm:$0xff]  }
 0x215   :  { %2840 = vmatpush1.bf16.msra.mxu0 %v9558_v24  ;;  %2922 = vmatpush1.bf16.msra.mxu1 %v9561_v26  ;;  %v9611_v24 = vld [vmem:[#allocation9 + $0x64c] ss:$16 sps:$4 sm:$0xff]   ;;  %v9606_v26 = vld [vmem:[#allocation9 + $0x640] ss:$16 sps:$4 sm:$0xff]  }
 0x216   :  { %2841 = vmatprep.subr.bf16.mxu0 %v9566_v27  ;;  %2923 = vmatprep.subr.bf16.mxu1 %v9569_v33  ;;  %v9609_v27 = vld [vmem:[#allocation9 + $0x648] ss:$16 sps:$4 sm:$0xff]   ;;  %v9614_v33 = vld [vmem:[#allocation9 + $0x664] ss:$16 sps:$4 sm:$0xff]  }
 0x219   :  { %2842 = vmatpush1.bf16.msra.mxu0 %v9564_v34  ;;  %2924 = vmatpush1.bf16.msra.mxu1 %v9567_v35  ;;  %v9617_v34 = vld [vmem:[#allocation9 + $0x66c] ss:$16 sps:$4 sm:$0xff]   ;;  %v9612_v35 = vld [vmem:[#allocation9 + $0x660] ss:$16 sps:$4 sm:$0xff]  }
 0x21a   :  { %2843 = vmatprep.subr.bf16.mxu0 %v9572_v36  ;;  %2925 = vmatprep.subr.bf16.mxu1 %v9575_v37  ;;  %v9615_v36 = vld [vmem:[#allocation9 + $0x668] ss:$16 sps:$4 sm:$0xff]   ;;  %v9620_v37 = vld [vmem:[#allocation9 + $0x684] ss:$16 sps:$4 sm:$0xff]  }
 0x21d   :  { %2844 = vmatpush1.bf16.msra.mxu0 %v9570_v38  ;;  %2926 = vmatpush1.bf16.msra.mxu1 %v9573_v39  ;;  %v9623_v38 = vld [vmem:[#allocation9 + $0x68c] ss:$16 sps:$4 sm:$0xff]   ;;  %v9618_v39 = vld [vmem:[#allocation9 + $0x680] ss:$16 sps:$4 sm:$0xff]  }
 0x21e   :  { %2845 = vmatprep.subr.bf16.mxu0 %v9578_v40  ;;  %2927 = vmatprep.subr.bf16.mxu1 %v9581_v42  ;;  %v9621_v40 = vld [vmem:[#allocation9 + $0x688] ss:$16 sps:$4 sm:$0xff]   ;;  %v9626_v42 = vld [vmem:[#allocation9 + $0x6a4] ss:$16 sps:$4 sm:$0xff]  }
 0x221   :  { %2846 = vmatpush1.bf16.msra.mxu0 %v9576_v43  ;;  %2928 = vmatpush1.bf16.msra.mxu1 %v9579_v44  ;;  %v9629_v43 = vld [vmem:[#allocation9 + $0x6ac] ss:$16 sps:$4 sm:$0xff]   ;;  %v9624_v44 = vld [vmem:[#allocation9 + $0x6a0] ss:$16 sps:$4 sm:$0xff]  }
 0x222   :  { %2847 = vmatprep.subr.bf16.mxu0 %v9584_v45  ;;  %2929 = vmatprep.subr.bf16.mxu1 %v9587_v46  ;;  %v9627_v45 = vld [vmem:[#allocation9 + $0x6a8] ss:$16 sps:$4 sm:$0xff]   ;;  %v9632_v46 = vld [vmem:[#allocation9 + $0x6c4] ss:$16 sps:$4 sm:$0xff]  }
 0x225   :  { %2848 = vmatpush1.bf16.msra.mxu0 %v9582_v47  ;;  %2930 = vmatpush1.bf16.msra.mxu1 %v9585_v48  ;;  %v9635_v47 = vld [vmem:[#allocation9 + $0x6cc] ss:$16 sps:$4 sm:$0xff]   ;;  %v9630_v48 = vld [vmem:[#allocation9 + $0x6c0] ss:$16 sps:$4 sm:$0xff]  }
 0x226   :  { %2849 = vmatprep.subr.bf16.mxu0 %v9590_v49  ;;  %2931 = vmatprep.subr.bf16.mxu1 %v9593_v50  ;;  %v9633_v49 = vld [vmem:[#allocation9 + $0x6c8] ss:$16 sps:$4 sm:$0xff]   ;;  %v9638_v50 = vld [vmem:[#allocation9 + $0x6e4] ss:$16 sps:$4 sm:$0xff]  }
 0x229   :  { %2850 = vmatpush1.bf16.msra.mxu0 %v9588_v51  ;;  %2932 = vmatpush1.bf16.msra.mxu1 %v9591_v52  ;;  %v9641_v51 = vld [vmem:[#allocation9 + $0x6ec] ss:$16 sps:$4 sm:$0xff]   ;;  %v9636_v52 = vld [vmem:[#allocation9 + $0x6e0] ss:$16 sps:$4 sm:$0xff]  }
 0x22a   :  { %2860 = vmatprep.subr.bf16.mxu0 %v9596_v53  ;;  %2942 = vmatprep.subr.bf16.mxu1 %v9599_v54  ;;  %v9639_v53 = vld [vmem:[#allocation9 + $0x6e8] ss:$16 sps:$4 sm:$0xff]   ;;  %v9644_v54 = vld [vmem:[#allocation9 + $0x704] ss:$16 sps:$4 sm:$0xff]  }
 0x2bf   :  { %v1898_v59 = vpop.f32.mrb[4].mxu0  ;;  %v1980_v60 = vpop.f32.mrb[4].mxu1 }
 0x2c0   :  { %v1900_v61 = vpop.f32.mrb[5].mxu0  ;;  %v1982_v62 = vpop.f32.mrb[5].mxu1 }
 0x2c1   :  { %v1993_v63 = vcombine.low %v1898_v59, %v1900_v61  ;;  %v1994_v0 = vcombine.low %v1980_v60, %v1982_v62  ;;  %v1902_v1 = vpop.f32.mrb[6].mxu0  ;;  %v1984_v2 = vpop.f32.mrb[6].mxu1  ;;  %v9650_v59 = vld [vmem:[#allocation9 + $0x724] ss:$16 sps:$4 sm:$0xff]   ;;  %v9653_v60 = vld [vmem:[#allocation9 + $0x72c] ss:$16 sps:$4 sm:$0xff]  }
 0x2c2   :  { %v1903_v3 = vpop.f32.mrb[7].mxu0  ;;  %v1985_v4 = vpop.f32.mrb[7].mxu1  ;;  %v9648_v61 = vld [vmem:[#allocation9 + $0x720] ss:$16 sps:$4 sm:$0xff]   ;;  %v9651_v62 = vld [vmem:[#allocation9 + $0x728] ss:$16 sps:$4 sm:$0xff]  }
 0x2c3   :  { %v2001_v5 = vrot.slane %v1993_v63, %v10881_v58  ;;  %v2008_v6 = vrot.slane %v1994_v0, %v10881_v58  ;;  %v9656_v63 = vld [vmem:[#allocation9 + $0x744] ss:$16 sps:$4 sm:$0xff]   ;;  %v9659_v0 = vld [vmem:[#allocation9 + $0x74c] ss:$16 sps:$4 sm:$0xff]   ;;  %v9654_v1 = vld [vmem:[#allocation9 + $0x740] ss:$16 sps:$4 sm:$0xff]  }
 0x2c4   :  { %v9657_v2 = vld [vmem:[#allocation9 + $0x748] ss:$16 sps:$4 sm:$0xff]   ;;  %v9662_v3 = vld [vmem:[#allocation9 + $0x764] ss:$16 sps:$4 sm:$0xff]   ;;  %v9665_v4 = vld [vmem:[#allocation9 + $0x76c] ss:$16 sps:$4 sm:$0xff]  }
 0x2c5   :  { %v2009_v7 = vcombine.low %v2001_v5, %v2008_v6  ;;  %v9660_v5 = vld [vmem:[#allocation9 + $0x760] ss:$16 sps:$4 sm:$0xff]   ;;  %v9663_v6 = vld [vmem:[#allocation9 + $0x768] ss:$16 sps:$4 sm:$0xff]  }
 0x2c7   :  { %v2016_v8 = vrot.slane %v2009_v7, %v10881_v58  ;;  %v9668_v7 = vld [vmem:[#allocation9 + $0x784] ss:$16 sps:$4 sm:$0xff]  }
 0x2c9   :  { %v10887_v10 = vadd.f32 %v2016_v8, %v1988_v9  ;;  %v9671_v8 = vld [vmem:[#allocation9 + $0x78c] ss:$16 sps:$4 sm:$0xff]   ;;  %v9666_v9 = vld [vmem:[#allocation9 + $0x780] ss:$16 sps:$4 sm:$0xff]  }
 0x2cb   :  { %v2021_v11 = vadd.f32 %v2019_v25, %v10887_v10  ;;  %v2033_v12 = vrot.slane %v10887_v10, %v10852_v28  ;;  %v2029_v13 = vrot.slane %v10887_v10, %v10855_v29  ;;  %v2041_v14 = vrot.slane %v10887_v10, %v10862_v31  ;;  %v9669_v25 = vld [vmem:[#allocation9 + $0x788] ss:$16 sps:$4 sm:$0xff]  }
 0x2cd   :  { %2023 = vst.msk [vmem:[#allocation11 + $0x1] ss:$8 sm:$0x3] %vm10857_vm0, %v2021_v11  ;;  %v2047_v15 = vpack.c.bf16 %v2033_v12, %v2033_v12  ;;  %v2046_v32 = vpack.c.bf16 %v2029_v13, %v2029_v13  ;;  %v2049_v20 = vpack.c.bf16 %v2041_v14, %v2041_v14  ;;  %v9674_v11 = vld [vmem:[#allocation9 + $0x7a4] ss:$16 sps:$4 sm:$0xff]  }
 0x2ce   :  { %v9677_v12 = vld [vmem:[#allocation9 + $0x7ac] ss:$16 sps:$4 sm:$0xff]   ;;  %v9672_v13 = vld [vmem:[#allocation9 + $0x7a0] ss:$16 sps:$4 sm:$0xff]   ;;  %v9675_v14 = vld [vmem:[#allocation9 + $0x7a8] ss:$16 sps:$4 sm:$0xff]  }
 0x2cf   :  { %2851 = vmatprep.mubr.bf16.mxu0 %v2047_v15  ;;  %2933 = vmatprep.mubr.bf16.mxu1 %v2047_v15  ;;  %v9680_v15 = vld [vmem:[#allocation9 + $0x7c4] ss:$16 sps:$4 sm:$0xff]  }
 0x2d0   :  { %2852 = vmatmul.mubr.bf16.vlgmr.msra.gmra.mrb[8].mxu0 %v2046_v32  ;;  %2934 = vmatmul.mubr.bf16.vlgmr.msra.gmra.mrb[8].mxu1 %v2046_v32  ;;  %v9681_v32 = vld [vmem:[#allocation9 + $0x7c8] ss:$16 sps:$4 sm:$0xff]  }
 0x2d1   :  { %2861 = vmatpush1.bf16.msra.mxu0 %v9594_v16  ;;  %2943 = vmatpush1.bf16.msra.mxu1 %v9597_v17  ;;  %v9683_v16 = vld [vmem:[#allocation9 + $0x7cc] ss:$16 sps:$4 sm:$0xff]   ;;  %v9678_v17 = vld [vmem:[#allocation9 + $0x7c0] ss:$16 sps:$4 sm:$0xff]  }
 0x2d2   :  { %2892 = vmatprep.mubr.bf16.mxu0 %v2049_v20  ;;  %2974 = vmatprep.mubr.bf16.mxu1 %v2049_v20  ;;  %v9684_v20 = vld [vmem:[#allocation9 + $0x7e0] ss:$16 sps:$4 sm:$0xff]  }
 0x2d3   :  { %2862 = vmatprep.subr.bf16.mxu0 %v9602_v18  ;;  %2944 = vmatprep.subr.bf16.mxu1 %v9605_v19  ;;  %v9686_v18 = vld [vmem:[#allocation9 + $0x7e4] ss:$16 sps:$4 sm:$0xff]   ;;  %v9689_v19 = vld [vmem:[#allocation9 + $0x7ec] ss:$16 sps:$4 sm:$0xff]  }
 0x2d5   :  { %2863 = vmatpush1.bf16.msra.mxu0 %v9600_v21  ;;  %2945 = vmatpush1.bf16.msra.mxu1 %v9603_v22  ;;  %v9687_v21 = vld [vmem:[#allocation9 + $0x7e8] ss:$16 sps:$4 sm:$0xff]   ;;  %v2037_v22 = vrot.slane %v10887_v10, %v10876_v41 }
 0x2d6   :  { %2864 = vmatprep.subr.bf16.mxu0 %v9608_v23  ;;  %2946 = vmatprep.subr.bf16.mxu1 %v9611_v24  ;;  %v9692_v23 = vld [vmem:[#allocation9 + $0x804] ss:$16 sps:$4 sm:$0xff]   ;;  %v9695_v24 = vld [vmem:[#allocation9 + $0x80c] ss:$16 sps:$4 sm:$0xff]  }
 0x2d9   :  { %2865 = vmatpush1.bf16.msra.mxu0 %v9606_v26  ;;  %2947 = vmatpush1.bf16.msra.mxu1 %v9609_v27  ;;  %v9690_v26 = vld [vmem:[#allocation9 + $0x800] ss:$16 sps:$4 sm:$0xff]   ;;  %v9693_v27 = vld [vmem:[#allocation9 + $0x808] ss:$16 sps:$4 sm:$0xff]  }
 0x2da   :  { %2866 = vmatprep.subr.bf16.mxu0 %v9614_v33  ;;  %2948 = vmatprep.subr.bf16.mxu1 %v9617_v34  ;;  %v2048_v33 = vpack.c.bf16 %v2037_v22, %v2037_v22  ;;  %v9698_v34 = vld [vmem:[#allocation9 + $0x824] ss:$16 sps:$4 sm:$0xff]   ;;  %v9771_v22 = vld [vmem:[#allocation9 + $0x9a8] ss:$16 sps:$4 sm:$0xff]  }
 0x2dd   :  { %2867 = vmatpush1.bf16.msra.mxu0 %v9612_v35  ;;  %2949 = vmatpush1.bf16.msra.mxu1 %v9615_v36  ;;  %v9701_v35 = vld [vmem:[#allocation9 + $0x82c] ss:$16 sps:$4 sm:$0xff]   ;;  %v9696_v36 = vld [vmem:[#allocation9 + $0x820] ss:$16 sps:$4 sm:$0xff]  }
 0x2de   :  { %2868 = vmatprep.subr.bf16.mxu0 %v9620_v37  ;;  %2950 = vmatprep.subr.bf16.mxu1 %v9623_v38  ;;  %v9699_v37 = vld [vmem:[#allocation9 + $0x828] ss:$16 sps:$4 sm:$0xff]   ;;  %v9704_v38 = vld [vmem:[#allocation9 + $0x844] ss:$16 sps:$4 sm:$0xff]  }
 0x2e1   :  { %2869 = vmatpush1.bf16.msra.mxu0 %v9618_v39  ;;  %2951 = vmatpush1.bf16.msra.mxu1 %v9621_v40  ;;  %v9707_v39 = vld [vmem:[#allocation9 + $0x84c] ss:$16 sps:$4 sm:$0xff]   ;;  %v9702_v40 = vld [vmem:[#allocation9 + $0x840] ss:$16 sps:$4 sm:$0xff]  }
 0x2e2   :  { %2870 = vmatprep.subr.bf16.mxu0 %v9626_v42  ;;  %2952 = vmatprep.subr.bf16.mxu1 %v9629_v43  ;;  %v9705_v42 = vld [vmem:[#allocation9 + $0x848] ss:$16 sps:$4 sm:$0xff]   ;;  %v9710_v43 = vld [vmem:[#allocation9 + $0x864] ss:$16 sps:$4 sm:$0xff]  }
 0x2e5   :  { %2871 = vmatpush1.bf16.msra.mxu0 %v9624_v44  ;;  %2953 = vmatpush1.bf16.msra.mxu1 %v9627_v45  ;;  %v9713_v44 = vld [vmem:[#allocation9 + $0x86c] ss:$16 sps:$4 sm:$0xff]   ;;  %v9708_v45 = vld [vmem:[#allocation9 + $0x860] ss:$16 sps:$4 sm:$0xff]  }
 0x2e6   :  { %2872 = vmatprep.subr.bf16.mxu0 %v9632_v46  ;;  %2954 = vmatprep.subr.bf16.mxu1 %v9635_v47  ;;  %v9711_v46 = vld [vmem:[#allocation9 + $0x868] ss:$16 sps:$4 sm:$0xff]   ;;  %v9716_v47 = vld [vmem:[#allocation9 + $0x884] ss:$16 sps:$4 sm:$0xff]  }
 0x2e9   :  { %2873 = vmatpush1.bf16.msra.mxu0 %v9630_v48  ;;  %2955 = vmatpush1.bf16.msra.mxu1 %v9633_v49  ;;  %v9719_v48 = vld [vmem:[#allocation9 + $0x88c] ss:$16 sps:$4 sm:$0xff]   ;;  %v9714_v49 = vld [vmem:[#allocation9 + $0x880] ss:$16 sps:$4 sm:$0xff]  }
 0x2ea   :  { %2874 = vmatprep.subr.bf16.mxu0 %v9638_v50  ;;  %2956 = vmatprep.subr.bf16.mxu1 %v9641_v51  ;;  %v9717_v50 = vld [vmem:[#allocation9 + $0x888] ss:$16 sps:$4 sm:$0xff]   ;;  %v9722_v51 = vld [vmem:[#allocation9 + $0x8a4] ss:$16 sps:$4 sm:$0xff]  }
 0x2ed   :  { %2875 = vmatpush1.bf16.msra.mxu0 %v9636_v52  ;;  %2957 = vmatpush1.bf16.msra.mxu1 %v9639_v53  ;;  %v9725_v52 = vld [vmem:[#allocation9 + $0x8ac] ss:$16 sps:$4 sm:$0xff]   ;;  %v9720_v53 = vld [vmem:[#allocation9 + $0x8a0] ss:$16 sps:$4 sm:$0xff]  }
 0x2ee   :  { %2876 = vmatprep.subr.bf16.mxu0 %v9644_v54  ;;  %2958 = vmatprep.subr.bf16.mxu1 %v9647_v55  ;;  %v9723_v54 = vld [vmem:[#allocation9 + $0x8a8] ss:$16 sps:$4 sm:$0xff]   ;;  %v9728_v55 = vld [vmem:[#allocation9 + $0x8c4] ss:$16 sps:$4 sm:$0xff]  }
 0x2f1   :  { %2877 = vmatpush1.bf16.msra.mxu0 %v9642_v56  ;;  %2959 = vmatpush1.bf16.msra.mxu1 %v9645_v57  ;;  %v9731_v56 = vld [vmem:[#allocation9 + $0x8cc] ss:$16 sps:$4 sm:$0xff]   ;;  %v9726_v57 = vld [vmem:[#allocation9 + $0x8c0] ss:$16 sps:$4 sm:$0xff]  }
 0x2f2   :  { %2878 = vmatprep.subr.bf16.mxu0 %v9650_v59  ;;  %2960 = vmatprep.subr.bf16.mxu1 %v9653_v60  ;;  %v9729_v59 = vld [vmem:[#allocation9 + $0x8c8] ss:$16 sps:$4 sm:$0xff]   ;;  %v9734_v60 = vld [vmem:[#allocation9 + $0x8e4] ss:$16 sps:$4 sm:$0xff]  }
 0x2f5   :  { %2879 = vmatpush1.bf16.msra.mxu0 %v9648_v61  ;;  %2961 = vmatpush1.bf16.msra.mxu1 %v9651_v62  ;;  %v9737_v61 = vld [vmem:[#allocation9 + $0x8ec] ss:$16 sps:$4 sm:$0xff]   ;;  %v9732_v62 = vld [vmem:[#allocation9 + $0x8e0] ss:$16 sps:$4 sm:$0xff]  }
 0x2f6   :  { %2880 = vmatprep.subr.bf16.mxu0 %v9656_v63  ;;  %2962 = vmatprep.subr.bf16.mxu1 %v9659_v0  ;;  %v9735_v63 = vld [vmem:[#allocation9 + $0x8e8] ss:$16 sps:$4 sm:$0xff]   ;;  %v9740_v0 = vld [vmem:[#allocation9 + $0x904] ss:$16 sps:$4 sm:$0xff]  }
 0x2f9   :  { %2881 = vmatpush1.bf16.msra.mxu0 %v9654_v1  ;;  %2963 = vmatpush1.bf16.msra.mxu1 %v9657_v2  ;;  %v9743_v1 = vld [vmem:[#allocation9 + $0x90c] ss:$16 sps:$4 sm:$0xff]   ;;  %v9738_v2 = vld [vmem:[#allocation9 + $0x900] ss:$16 sps:$4 sm:$0xff]  }
 0x2fa   :  { %2882 = vmatprep.subr.bf16.mxu0 %v9662_v3  ;;  %2964 = vmatprep.subr.bf16.mxu1 %v9665_v4  ;;  %v9741_v3 = vld [vmem:[#allocation9 + $0x908] ss:$16 sps:$4 sm:$0xff]   ;;  %v9746_v4 = vld [vmem:[#allocation9 + $0x924] ss:$16 sps:$4 sm:$0xff]  }
 0x2fd   :  { %2883 = vmatpush1.bf16.msra.mxu0 %v9660_v5  ;;  %2965 = vmatpush1.bf16.msra.mxu1 %v9663_v6  ;;  %v9749_v5 = vld [vmem:[#allocation9 + $0x92c] ss:$16 sps:$4 sm:$0xff]   ;;  %v9744_v6 = vld [vmem:[#allocation9 + $0x920] ss:$16 sps:$4 sm:$0xff]  }
 0x2fe   :  { %2884 = vmatprep.subr.bf16.mxu0 %v9668_v7  ;;  %2966 = vmatprep.subr.bf16.mxu1 %v9671_v8  ;;  %v9747_v7 = vld [vmem:[#allocation9 + $0x928] ss:$16 sps:$4 sm:$0xff]   ;;  %v9752_v8 = vld [vmem:[#allocation9 + $0x944] ss:$16 sps:$4 sm:$0xff]  }
 0x301   :  { %2885 = vmatpush1.bf16.msra.mxu0 %v9666_v9  ;;  %2967 = vmatpush1.bf16.msra.mxu1 %v9669_v25  ;;  %v9755_v9 = vld [vmem:[#allocation9 + $0x94c] ss:$16 sps:$4 sm:$0xff]   ;;  %v9750_v25 = vld [vmem:[#allocation9 + $0x940] ss:$16 sps:$4 sm:$0xff]  }
 0x302   :  { %2886 = vmatprep.subr.bf16.mxu0 %v9674_v11  ;;  %2968 = vmatprep.subr.bf16.mxu1 %v9677_v12  ;;  %v9753_v11 = vld [vmem:[#allocation9 + $0x948] ss:$16 sps:$4 sm:$0xff]   ;;  %v9758_v12 = vld [vmem:[#allocation9 + $0x964] ss:$16 sps:$4 sm:$0xff]  }
 0x305   :  { %2887 = vmatpush1.bf16.msra.mxu0 %v9672_v13  ;;  %2969 = vmatpush1.bf16.msra.mxu1 %v9675_v14  ;;  %v9761_v13 = vld [vmem:[#allocation9 + $0x96c] ss:$16 sps:$4 sm:$0xff]   ;;  %v9756_v14 = vld [vmem:[#allocation9 + $0x960] ss:$16 sps:$4 sm:$0xff]  }
 0x306   :  { %2888 = vmatprep.subr.bf16.mxu0 %v9680_v15  ;;  %2970 = vmatprep.subr.bf16.mxu1 %v9683_v16  ;;  %v9759_v15 = vld [vmem:[#allocation9 + $0x968] ss:$16 sps:$4 sm:$0xff]   ;;  %v9764_v16 = vld [vmem:[#allocation9 + $0x984] ss:$16 sps:$4 sm:$0xff]  }
 0x309   :  { %2889 = vmatpush1.bf16.msra.mxu0 %v9678_v17  ;;  %2971 = vmatpush1.bf16.msra.mxu1 %v9681_v32  ;;  %v9767_v17 = vld [vmem:[#allocation9 + $0x98c] ss:$16 sps:$4 sm:$0xff]   ;;  %v9762_v32 = vld [vmem:[#allocation9 + $0x980] ss:$16 sps:$4 sm:$0xff]  }
 0x30a   :  { %2890 = vmatprep.subr.bf16.mxu0 %v9686_v18  ;;  %2972 = vmatprep.subr.bf16.mxu1 %v9689_v19  ;;  %v9765_v18 = vld [vmem:[#allocation9 + $0x988] ss:$16 sps:$4 sm:$0xff]   ;;  %v9770_v19 = vld [vmem:[#allocation9 + $0x9a4] ss:$16 sps:$4 sm:$0xff]  }
 0x30d   :  { %2891 = vmatpush1.bf16.msra.mxu0 %v9684_v20  ;;  %2973 = vmatpush1.bf16.msra.mxu1 %v9687_v21  ;;  %v9773_v20 = vld [vmem:[#allocation9 + $0x9ac] ss:$16 sps:$4 sm:$0xff]   ;;  %v9768_v21 = vld [vmem:[#allocation9 + $0x9a0] ss:$16 sps:$4 sm:$0xff]  }
 0x30e   :  { %3815 = vmatprep.subr.bf16.mxu0 %v9692_v23  ;;  %3897 = vmatprep.subr.bf16.mxu1 %v9695_v24  ;;  %v9776_v23 = vld [vmem:[#allocation9 + $0x9c4] ss:$16 sps:$4 sm:$0xff]   ;;  %v9779_v24 = vld [vmem:[#allocation9 + $0x9cc] ss:$16 sps:$4 sm:$0xff]  }
 0x310   :  { %2893 = vmatmul.mubr.bf16.vlgmr.msra.gmra.mrb[8].mxu0 %v2048_v33  ;;  %2975 = vmatmul.mubr.bf16.vlgmr.msra.gmra.mrb[8].mxu1 %v2048_v33  ;;  %v9782_v33 = vld [vmem:[#allocation9 + $0x9e4] ss:$16 sps:$4 sm:$0xff]  }
 0x311   :  { %3816 = vmatpush1.bf16.msra.mxu0 %v9690_v26  ;;  %3898 = vmatpush1.bf16.msra.mxu1 %v9693_v27  ;;  %v9774_v26 = vld [vmem:[#allocation9 + $0x9c0] ss:$16 sps:$4 sm:$0xff]   ;;  %v9777_v27 = vld [vmem:[#allocation9 + $0x9c8] ss:$16 sps:$4 sm:$0xff]  }
 0x312   :  { %3817 = vmatprep.subr.bf16.mxu0 %v9698_v34  ;;  %3899 = vmatprep.subr.bf16.mxu1 %v9701_v35  ;;  %v9785_v34 = vld [vmem:[#allocation9 + $0x9ec] ss:$16 sps:$4 sm:$0xff]   ;;  %v9780_v35 = vld [vmem:[#allocation9 + $0x9e0] ss:$16 sps:$4 sm:$0xff]  }
 0x315   :  { %3818 = vmatpush1.bf16.msra.mxu0 %v9696_v36  ;;  %3900 = vmatpush1.bf16.msra.mxu1 %v9699_v37  ;;  %v9783_v36 = vld [vmem:[#allocation9 + $0x9e8] ss:$16 sps:$4 sm:$0xff]   ;;  %v9788_v37 = vld [vmem:[#allocation9 + $0xa04] ss:$16 sps:$4 sm:$0xff]  }
 0x316   :  { %3819 = vmatprep.subr.bf16.mxu0 %v9704_v38  ;;  %3901 = vmatprep.subr.bf16.mxu1 %v9707_v39  ;;  %v9791_v38 = vld [vmem:[#allocation9 + $0xa0c] ss:$16 sps:$4 sm:$0xff]  }
 0x319   :  { %3820 = vmatpush1.bf16.msra.mxu0 %v9702_v40  ;;  %3902 = vmatpush1.bf16.msra.mxu1 %v9705_v42 }
 0x31a   :  { %3821 = vmatprep.subr.bf16.mxu0 %v9710_v43  ;;  %3903 = vmatprep.subr.bf16.mxu1 %v9713_v44 }
 0x31d   :  { %3822 = vmatpush1.bf16.msra.mxu0 %v9708_v45  ;;  %3904 = vmatpush1.bf16.msra.mxu1 %v9711_v46 }
 0x31e   :  { %3823 = vmatprep.subr.bf16.mxu0 %v9716_v47  ;;  %3905 = vmatprep.subr.bf16.mxu1 %v9719_v48 }
 0x321   :  { %3824 = vmatpush1.bf16.msra.mxu0 %v9714_v49  ;;  %3906 = vmatpush1.bf16.msra.mxu1 %v9717_v50 }
 0x322   :  { %3825 = vmatprep.subr.bf16.mxu0 %v9722_v51  ;;  %3907 = vmatprep.subr.bf16.mxu1 %v9725_v52 }
 0x325   :  { %3826 = vmatpush1.bf16.msra.mxu0 %v9720_v53  ;;  %3908 = vmatpush1.bf16.msra.mxu1 %v9723_v54  ;;  %v2984_v54 = vld [vmem:[#allocation2 + $0x2] ss:$8 sm:$0xf] }
 0x326   :  { %3827 = vmatprep.subr.bf16.mxu0 %v9728_v55  ;;  %3909 = vmatprep.subr.bf16.mxu1 %v9731_v56  ;;  %v3015_v55 = vrot.slane %v10887_v10, 2 }
 0x329   :  { %3828 = vmatpush1.bf16.msra.mxu0 %v9726_v57  ;;  %3910 = vmatpush1.bf16.msra.mxu1 %v9729_v59 }
 0x32a   :  { %3829 = vmatprep.subr.bf16.mxu0 %v9734_v60  ;;  %3911 = vmatprep.subr.bf16.mxu1 %v9737_v61 }
 0x32d   :  { %3830 = vmatpush1.bf16.msra.mxu0 %v9732_v62  ;;  %3912 = vmatpush1.bf16.msra.mxu1 %v9735_v63  ;;  %v9786_v63 = vld [vmem:[#allocation9 + $0xa00] ss:$16 sps:$4 sm:$0xff]  }
 0x32e   :  { %3831 = vmatprep.subr.bf16.mxu0 %v9740_v0  ;;  %3913 = vmatprep.subr.bf16.mxu1 %v9743_v1  ;;  %v9789_v0 = vld [vmem:[#allocation9 + $0xa08] ss:$16 sps:$4 sm:$0xff]   ;;  %v9794_v1 = vld [vmem:[#allocation9 + $0xa24] ss:$16 sps:$4 sm:$0xff]  }
 0x331   :  { %3832 = vmatpush1.bf16.msra.mxu0 %v9738_v2  ;;  %3914 = vmatpush1.bf16.msra.mxu1 %v9741_v3  ;;  %v9797_v2 = vld [vmem:[#allocation9 + $0xa2c] ss:$16 sps:$4 sm:$0xff]  }
 0x332   :  { %3833 = vmatprep.subr.bf16.mxu0 %v9746_v4  ;;  %3915 = vmatprep.subr.bf16.mxu1 %v9749_v5  ;;  %v9792_v4 = vld [vmem:[#allocation9 + $0xa20] ss:$16 sps:$4 sm:$0xff]   ;;  %v9795_v5 = vld [vmem:[#allocation9 + $0xa28] ss:$16 sps:$4 sm:$0xff]  }
 0x335   :  { %3834 = vmatpush1.bf16.msra.mxu0 %v9744_v6  ;;  %3916 = vmatpush1.bf16.msra.mxu1 %v9747_v7  ;;  %v9800_v6 = vld [vmem:[#allocation9 + $0xa44] ss:$16 sps:$4 sm:$0xff]   ;;  %v9803_v7 = vld [vmem:[#allocation9 + $0xa4c] ss:$16 sps:$4 sm:$0xff]  }
 0x336   :  { %3835 = vmatprep.subr.bf16.mxu0 %v9752_v8  ;;  %3917 = vmatprep.subr.bf16.mxu1 %v9755_v9  ;;  %v9798_v8 = vld [vmem:[#allocation9 + $0xa40] ss:$16 sps:$4 sm:$0xff]   ;;  %v9801_v9 = vld [vmem:[#allocation9 + $0xa48] ss:$16 sps:$4 sm:$0xff]  }
 0x339   :  { %3836 = vmatpush1.bf16.msra.mxu0 %v9750_v25  ;;  %3918 = vmatpush1.bf16.msra.mxu1 %v9753_v11  ;;  %v9806_v25 = vld [vmem:[#allocation9 + $0xa64] ss:$16 sps:$4 sm:$0xff]   ;;  %v9809_v11 = vld [vmem:[#allocation9 + $0xa6c] ss:$16 sps:$4 sm:$0xff]  }
 0x33a   :  { %3837 = vmatprep.subr.bf16.mxu0 %v9758_v12  ;;  %3919 = vmatprep.subr.bf16.mxu1 %v9761_v13  ;;  %v9804_v12 = vld [vmem:[#allocation9 + $0xa60] ss:$16 sps:$4 sm:$0xff]   ;;  %v9807_v13 = vld [vmem:[#allocation9 + $0xa68] ss:$16 sps:$4 sm:$0xff]  }
 0x33d   :  { %3838 = vmatpush1.bf16.msra.mxu0 %v9756_v14  ;;  %3920 = vmatpush1.bf16.msra.mxu1 %v9759_v15  ;;  %v9812_v14 = vld [vmem:[#allocation9 + $0xa84] ss:$16 sps:$4 sm:$0xff]   ;;  %v9815_v15 = vld [vmem:[#allocation9 + $0xa8c] ss:$16 sps:$4 sm:$0xff]  }
 0x33e   :  { %3839 = vmatprep.subr.bf16.mxu0 %v9764_v16  ;;  %3921 = vmatprep.subr.bf16.mxu1 %v9767_v17  ;;  %v9810_v16 = vld [vmem:[#allocation9 + $0xa80] ss:$16 sps:$4 sm:$0xff]   ;;  %v9813_v17 = vld [vmem:[#allocation9 + $0xa88] ss:$16 sps:$4 sm:$0xff]  }
 0x341   :  { %3840 = vmatpush1.bf16.msra.mxu0 %v9762_v32  ;;  %3922 = vmatpush1.bf16.msra.mxu1 %v9765_v18  ;;  %v9818_v32 = vld [vmem:[#allocation9 + $0xaa4] ss:$16 sps:$4 sm:$0xff]   ;;  %v9821_v18 = vld [vmem:[#allocation9 + $0xaac] ss:$16 sps:$4 sm:$0xff]  }
 0x342   :  { %3841 = vmatprep.subr.bf16.mxu0 %v9770_v19  ;;  %3923 = vmatprep.subr.bf16.mxu1 %v9773_v20  ;;  %v9816_v19 = vld [vmem:[#allocation9 + $0xaa0] ss:$16 sps:$4 sm:$0xff]   ;;  %v9819_v20 = vld [vmem:[#allocation9 + $0xaa8] ss:$16 sps:$4 sm:$0xff]  }
 0x345   :  { %3842 = vmatpush1.bf16.msra.mxu0 %v9768_v21  ;;  %3924 = vmatpush1.bf16.msra.mxu1 %v9771_v22  ;;  %v9824_v21 = vld [vmem:[#allocation9 + $0xac4] ss:$16 sps:$4 sm:$0xff]   ;;  %v9827_v22 = vld [vmem:[#allocation9 + $0xacc] ss:$16 sps:$4 sm:$0xff]  }
 0x346   :  { %3843 = vmatprep.subr.bf16.mxu0 %v9776_v23  ;;  %3925 = vmatprep.subr.bf16.mxu1 %v9779_v24  ;;  %v9822_v23 = vld [vmem:[#allocation9 + $0xac0] ss:$16 sps:$4 sm:$0xff]   ;;  %v9825_v24 = vld [vmem:[#allocation9 + $0xac8] ss:$16 sps:$4 sm:$0xff]  }
 0x349   :  { %3844 = vmatpush1.bf16.msra.mxu0 %v9774_v26  ;;  %3926 = vmatpush1.bf16.msra.mxu1 %v9777_v27  ;;  %v9830_v26 = vld [vmem:[#allocation9 + $0xae4] ss:$16 sps:$4 sm:$0xff]   ;;  %v9833_v27 = vld [vmem:[#allocation9 + $0xaec] ss:$16 sps:$4 sm:$0xff]  }
 0x34a   :  { %3845 = vmatprep.subr.bf16.mxu0 %v9782_v33  ;;  %3927 = vmatprep.subr.bf16.mxu1 %v9785_v34  ;;  %v9828_v33 = vld [vmem:[#allocation9 + $0xae0] ss:$16 sps:$4 sm:$0xff]   ;;  %v9831_v34 = vld [vmem:[#allocation9 + $0xae8] ss:$16 sps:$4 sm:$0xff]  }
 0x34d   :  { %3846 = vmatpush1.bf16.msra.mxu0 %v9780_v35  ;;  %3928 = vmatpush1.bf16.msra.mxu1 %v9783_v36  ;;  %v9836_v35 = vld [vmem:[#allocation9 + $0xb04] ss:$16 sps:$4 sm:$0xff]   ;;  %v9839_v36 = vld [vmem:[#allocation9 + $0xb0c] ss:$16 sps:$4 sm:$0xff]  }
 0x34e   :  { %3856 = vmatprep.subr.bf16.mxu0 %v9788_v37  ;;  %3938 = vmatprep.subr.bf16.mxu1 %v9791_v38  ;;  %v9834_v37 = vld [vmem:[#allocation9 + $0xb00] ss:$16 sps:$4 sm:$0xff]   ;;  %v9837_v38 = vld [vmem:[#allocation9 + $0xb08] ss:$16 sps:$4 sm:$0xff]  }
 0x3e3   :  { %v2894_v39 = vpop.f32.mrb[8].mxu0  ;;  %v2976_v40 = vpop.f32.mrb[8].mxu1 }
 0x3e4   :  { %v2896_v42 = vpop.f32.mrb[9].mxu0  ;;  %v2978_v43 = vpop.f32.mrb[9].mxu1 }
 0x3e5   :  { %v2989_v44 = vcombine.low %v2894_v39, %v2896_v42  ;;  %v2990_v45 = vcombine.low %v2976_v40, %v2978_v43  ;;  %v2898_v46 = vpop.f32.mrb[10].mxu0  ;;  %v2980_v47 = vpop.f32.mrb[10].mxu1  ;;  %v9842_v39 = vld [vmem:[#allocation9 + $0xb24] ss:$16 sps:$4 sm:$0xff]   ;;  %v9845_v40 = vld [vmem:[#allocation9 + $0xb2c] ss:$16 sps:$4 sm:$0xff]  }
 0x3e6   :  { %v2899_v48 = vpop.f32.mrb[11].mxu0  ;;  %v2981_v49 = vpop.f32.mrb[11].mxu1  ;;  %v9840_v42 = vld [vmem:[#allocation9 + $0xb20] ss:$16 sps:$4 sm:$0xff]   ;;  %v9843_v43 = vld [vmem:[#allocation9 + $0xb28] ss:$16 sps:$4 sm:$0xff]  }
 0x3e7   :  { %v2997_v50 = vrot.slane %v2989_v44, %v10881_v58  ;;  %v3004_v51 = vrot.slane %v2990_v45, %v10881_v58  ;;  %v9848_v44 = vld [vmem:[#allocation9 + $0xb44] ss:$16 sps:$4 sm:$0xff]   ;;  %v9851_v45 = vld [vmem:[#allocation9 + $0xb4c] ss:$16 sps:$4 sm:$0xff]   ;;  %v9846_v46 = vld [vmem:[#allocation9 + $0xb40] ss:$16 sps:$4 sm:$0xff]  }
 0x3e8   :  { %v9849_v47 = vld [vmem:[#allocation9 + $0xb48] ss:$16 sps:$4 sm:$0xff]   ;;  %v9854_v48 = vld [vmem:[#allocation9 + $0xb64] ss:$16 sps:$4 sm:$0xff]   ;;  %v9857_v49 = vld [vmem:[#allocation9 + $0xb6c] ss:$16 sps:$4 sm:$0xff]  }
 0x3e9   :  { %v3005_v52 = vcombine.low %v2997_v50, %v3004_v51  ;;  %v9852_v50 = vld [vmem:[#allocation9 + $0xb60] ss:$16 sps:$4 sm:$0xff]   ;;  %v9855_v51 = vld [vmem:[#allocation9 + $0xb68] ss:$16 sps:$4 sm:$0xff]  }
 0x3eb   :  { %v3012_v53 = vrot.slane %v3005_v52, %v10881_v58  ;;  %v9860_v52 = vld [vmem:[#allocation9 + $0xb84] ss:$16 sps:$4 sm:$0xff]  }
 0x3ed   :  { %v10904_v56 = vadd.f32 %v3012_v53, %v2984_v54  ;;  %v9863_v53 = vld [vmem:[#allocation9 + $0xb8c] ss:$16 sps:$4 sm:$0xff]   ;;  %v9858_v54 = vld [vmem:[#allocation9 + $0xb80] ss:$16 sps:$4 sm:$0xff]  }
 0x3ef   :  { %v3017_v57 = vadd.f32 %v3015_v55, %v10904_v56  ;;  %v3029_v59 = vrot.slane %v10904_v56, %v10852_v28  ;;  %v3025_v60 = vrot.slane %v10904_v56, %v10855_v29  ;;  %v3037_v61 = vrot.slane %v10904_v56, %v10862_v31  ;;  %v9861_v55 = vld [vmem:[#allocation9 + $0xb88] ss:$16 sps:$4 sm:$0xff]  }
 0x3f1   :  { %3019 = vst.msk [vmem:[#allocation11 + $0x2] ss:$8 sm:$0x3] %vm10857_vm0, %v3017_v57  ;;  %v3043_v62 = vpack.c.bf16 %v3029_v59, %v3029_v59  ;;  %v3042_v10 = vpack.c.bf16 %v3025_v60, %v3025_v60  ;;  %v3045_v3 = vpack.c.bf16 %v3037_v61, %v3037_v61  ;;  %v9866_v57 = vld [vmem:[#allocation9 + $0xba4] ss:$16 sps:$4 sm:$0xff]  }
 0x3f2   :  { %v9869_v59 = vld [vmem:[#allocation9 + $0xbac] ss:$16 sps:$4 sm:$0xff]   ;;  %v9864_v60 = vld [vmem:[#allocation9 + $0xba0] ss:$16 sps:$4 sm:$0xff]   ;;  %v9867_v61 = vld [vmem:[#allocation9 + $0xba8] ss:$16 sps:$4 sm:$0xff]  }
 0x3f3   :  { %3847 = vmatprep.mubr.bf16.mxu0 %v3043_v62  ;;  %3929 = vmatprep.mubr.bf16.mxu1 %v3043_v62  ;;  %v9872_v62 = vld [vmem:[#allocation9 + $0xbc4] ss:$16 sps:$4 sm:$0xff]  }
 0x3f4   :  { %3848 = vmatmul.mubr.bf16.vlgmr.msra.gmra.mrb[12].mxu0 %v3042_v10  ;;  %3930 = vmatmul.mubr.bf16.vlgmr.msra.gmra.mrb[12].mxu1 %v3042_v10  ;;  %v9873_v10 = vld [vmem:[#allocation9 + $0xbc8] ss:$16 sps:$4 sm:$0xff]  }
 0x3f5   :  { %3857 = vmatpush1.bf16.msra.mxu0 %v9786_v63  ;;  %3939 = vmatpush1.bf16.msra.mxu1 %v9789_v0  ;;  %v9875_v63 = vld [vmem:[#allocation9 + $0xbcc] ss:$16 sps:$4 sm:$0xff]   ;;  %v9870_v0 = vld [vmem:[#allocation9 + $0xbc0] ss:$16 sps:$4 sm:$0xff]  }
 0x3f6   :  { %3888 = vmatprep.mubr.bf16.mxu0 %v3045_v3  ;;  %3970 = vmatprep.mubr.bf16.mxu1 %v3045_v3  ;;  %v9876_v3 = vld [vmem:[#allocation9 + $0xbe0] ss:$16 sps:$4 sm:$0xff]  }
 0x3f7   :  { %3858 = vmatprep.subr.bf16.mxu0 %v9794_v1  ;;  %3940 = vmatprep.subr.bf16.mxu1 %v9797_v2  ;;  %v9878_v1 = vld [vmem:[#allocation9 + $0xbe4] ss:$16 sps:$4 sm:$0xff]   ;;  %v9881_v2 = vld [vmem:[#allocation9 + $0xbec] ss:$16 sps:$4 sm:$0xff]  }
 0x3f9   :  { %3859 = vmatpush1.bf16.msra.mxu0 %v9792_v4  ;;  %3941 = vmatpush1.bf16.msra.mxu1 %v9795_v5  ;;  %v9879_v4 = vld [vmem:[#allocation9 + $0xbe8] ss:$16 sps:$4 sm:$0xff]   ;;  %v3033_v5 = vrot.slane %v10904_v56, %v10876_v41 }
 0x3fa   :  { %3860 = vmatprep.subr.bf16.mxu0 %v9800_v6  ;;  %3942 = vmatprep.subr.bf16.mxu1 %v9803_v7  ;;  %v9884_v6 = vld [vmem:[#allocation9 + $0xc04] ss:$16 sps:$4 sm:$0xff]   ;;  %v9887_v7 = vld [vmem:[#allocation9 + $0xc0c] ss:$16 sps:$4 sm:$0xff]  }
 0x3fd   :  { %3861 = vmatpush1.bf16.msra.mxu0 %v9798_v8  ;;  %3943 = vmatpush1.bf16.msra.mxu1 %v9801_v9  ;;  %v9882_v8 = vld [vmem:[#allocation9 + $0xc00] ss:$16 sps:$4 sm:$0xff]   ;;  %v9885_v9 = vld [vmem:[#allocation9 + $0xc08] ss:$16 sps:$4 sm:$0xff]  }
 0x3fe   :  { %3862 = vmatprep.subr.bf16.mxu0 %v9806_v25  ;;  %3944 = vmatprep.subr.bf16.mxu1 %v9809_v11  ;;  %v3044_v25 = vpack.c.bf16 %v3033_v5, %v3033_v5  ;;  %v9890_v11 = vld [vmem:[#allocation9 + $0xc24] ss:$16 sps:$4 sm:$0xff]   ;;  %v9963_v5 = vld [vmem:[#allocation9 + $0xda8] ss:$16 sps:$4 sm:$0xff]  }
 0x401   :  { %3863 = vmatpush1.bf16.msra.mxu0 %v9804_v12  ;;  %3945 = vmatpush1.bf16.msra.mxu1 %v9807_v13  ;;  %v9893_v12 = vld [vmem:[#allocation9 + $0xc2c] ss:$16 sps:$4 sm:$0xff]   ;;  %v9888_v13 = vld [vmem:[#allocation9 + $0xc20] ss:$16 sps:$4 sm:$0xff]  }
 0x402   :  { %3864 = vmatprep.subr.bf16.mxu0 %v9812_v14  ;;  %3946 = vmatprep.subr.bf16.mxu1 %v9815_v15  ;;  %v9891_v14 = vld [vmem:[#allocation9 + $0xc28] ss:$16 sps:$4 sm:$0xff]   ;;  %v9896_v15 = vld [vmem:[#allocation9 + $0xc44] ss:$16 sps:$4 sm:$0xff]  }
 0x405   :  { %3865 = vmatpush1.bf16.msra.mxu0 %v9810_v16  ;;  %3947 = vmatpush1.bf16.msra.mxu1 %v9813_v17  ;;  %v9899_v16 = vld [vmem:[#allocation9 + $0xc4c] ss:$16 sps:$4 sm:$0xff]   ;;  %v9894_v17 = vld [vmem:[#allocation9 + $0xc40] ss:$16 sps:$4 sm:$0xff]  }
 0x406   :  { %3866 = vmatprep.subr.bf16.mxu0 %v9818_v32  ;;  %3948 = vmatprep.subr.bf16.mxu1 %v9821_v18  ;;  %v9897_v32 = vld [vmem:[#allocation9 + $0xc48] ss:$16 sps:$4 sm:$0xff]   ;;  %v9902_v18 = vld [vmem:[#allocation9 + $0xc64] ss:$16 sps:$4 sm:$0xff]  }
 0x409   :  { %3867 = vmatpush1.bf16.msra.mxu0 %v9816_v19  ;;  %3949 = vmatpush1.bf16.msra.mxu1 %v9819_v20  ;;  %v9905_v19 = vld [vmem:[#allocation9 + $0xc6c] ss:$16 sps:$4 sm:$0xff]   ;;  %v9900_v20 = vld [vmem:[#allocation9 + $0xc60] ss:$16 sps:$4 sm:$0xff]  }
 0x40a   :  { %3868 = vmatprep.subr.bf16.mxu0 %v9824_v21  ;;  %3950 = vmatprep.subr.bf16.mxu1 %v9827_v22  ;;  %v9903_v21 = vld [vmem:[#allocation9 + $0xc68] ss:$16 sps:$4 sm:$0xff]   ;;  %v9908_v22 = vld [vmem:[#allocation9 + $0xc84] ss:$16 sps:$4 sm:$0xff]  }
 0x40d   :  { %3869 = vmatpush1.bf16.msra.mxu0 %v9822_v23  ;;  %3951 = vmatpush1.bf16.msra.mxu1 %v9825_v24  ;;  %v9911_v23 = vld [vmem:[#allocation9 + $0xc8c] ss:$16 sps:$4 sm:$0xff]   ;;  %v9906_v24 = vld [vmem:[#allocation9 + $0xc80] ss:$16 sps:$4 sm:$0xff]  }
 0x40e   :  { %3870 = vmatprep.subr.bf16.mxu0 %v9830_v26  ;;  %3952 = vmatprep.subr.bf16.mxu1 %v9833_v27  ;;  %v9909_v26 = vld [vmem:[#allocation9 + $0xc88] ss:$16 sps:$4 sm:$0xff]   ;;  %v9914_v27 = vld [vmem:[#allocation9 + $0xca4] ss:$16 sps:$4 sm:$0xff]  }
 0x411   :  { %3871 = vmatpush1.bf16.msra.mxu0 %v9828_v33  ;;  %3953 = vmatpush1.bf16.msra.mxu1 %v9831_v34  ;;  %v9917_v33 = vld [vmem:[#allocation9 + $0xcac] ss:$16 sps:$4 sm:$0xff]   ;;  %v9912_v34 = vld [vmem:[#allocation9 + $0xca0] ss:$16 sps:$4 sm:$0xff]  }
 0x412   :  { %3872 = vmatprep.subr.bf16.mxu0 %v9836_v35  ;;  %3954 = vmatprep.subr.bf16.mxu1 %v9839_v36  ;;  %v9915_v35 = vld [vmem:[#allocation9 + $0xca8] ss:$16 sps:$4 sm:$0xff]   ;;  %v9920_v36 = vld [vmem:[#allocation9 + $0xcc4] ss:$16 sps:$4 sm:$0xff]  }
 0x415   :  { %3873 = vmatpush1.bf16.msra.mxu0 %v9834_v37  ;;  %3955 = vmatpush1.bf16.msra.mxu1 %v9837_v38  ;;  %v9923_v37 = vld [vmem:[#allocation9 + $0xccc] ss:$16 sps:$4 sm:$0xff]   ;;  %v9918_v38 = vld [vmem:[#allocation9 + $0xcc0] ss:$16 sps:$4 sm:$0xff]  }
 0x416   :  { %3874 = vmatprep.subr.bf16.mxu0 %v9842_v39  ;;  %3956 = vmatprep.subr.bf16.mxu1 %v9845_v40  ;;  %v9921_v39 = vld [vmem:[#allocation9 + $0xcc8] ss:$16 sps:$4 sm:$0xff]   ;;  %v9926_v40 = vld [vmem:[#allocation9 + $0xce4] ss:$16 sps:$4 sm:$0xff]  }
 0x419   :  { %3875 = vmatpush1.bf16.msra.mxu0 %v9840_v42  ;;  %3957 = vmatpush1.bf16.msra.mxu1 %v9843_v43  ;;  %v9929_v42 = vld [vmem:[#allocation9 + $0xcec] ss:$16 sps:$4 sm:$0xff]   ;;  %v9924_v43 = vld [vmem:[#allocation9 + $0xce0] ss:$16 sps:$4 sm:$0xff]  }
 0x41a   :  { %3876 = vmatprep.subr.bf16.mxu0 %v9848_v44  ;;  %3958 = vmatprep.subr.bf16.mxu1 %v9851_v45  ;;  %v9927_v44 = vld [vmem:[#allocation9 + $0xce8] ss:$16 sps:$4 sm:$0xff]   ;;  %v9932_v45 = vld [vmem:[#allocation9 + $0xd04] ss:$16 sps:$4 sm:$0xff]  }
 0x41d   :  { %3877 = vmatpush1.bf16.msra.mxu0 %v9846_v46  ;;  %3959 = vmatpush1.bf16.msra.mxu1 %v9849_v47  ;;  %v9935_v46 = vld [vmem:[#allocation9 + $0xd0c] ss:$16 sps:$4 sm:$0xff]   ;;  %v9930_v47 = vld [vmem:[#allocation9 + $0xd00] ss:$16 sps:$4 sm:$0xff]  }
 0x41e   :  { %3878 = vmatprep.subr.bf16.mxu0 %v9854_v48  ;;  %3960 = vmatprep.subr.bf16.mxu1 %v9857_v49  ;;  %v9933_v48 = vld [vmem:[#allocation9 + $0xd08] ss:$16 sps:$4 sm:$0xff]   ;;  %v9938_v49 = vld [vmem:[#allocation9 + $0xd24] ss:$16 sps:$4 sm:$0xff]  }
 0x421   :  { %3879 = vmatpush1.bf16.msra.mxu0 %v9852_v50  ;;  %3961 = vmatpush1.bf16.msra.mxu1 %v9855_v51  ;;  %v9941_v50 = vld [vmem:[#allocation9 + $0xd2c] ss:$16 sps:$4 sm:$0xff]   ;;  %v9936_v51 = vld [vmem:[#allocation9 + $0xd20] ss:$16 sps:$4 sm:$0xff]  }
 0x422   :  { %3880 = vmatprep.subr.bf16.mxu0 %v9860_v52  ;;  %3962 = vmatprep.subr.bf16.mxu1 %v9863_v53  ;;  %v9939_v52 = vld [vmem:[#allocation9 + $0xd28] ss:$16 sps:$4 sm:$0xff]   ;;  %v9944_v53 = vld [vmem:[#allocation9 + $0xd44] ss:$16 sps:$4 sm:$0xff]  }
 0x425   :  { %3881 = vmatpush1.bf16.msra.mxu0 %v9858_v54  ;;  %3963 = vmatpush1.bf16.msra.mxu1 %v9861_v55  ;;  %v9947_v54 = vld [vmem:[#allocation9 + $0xd4c] ss:$16 sps:$4 sm:$0xff]   ;;  %v9942_v55 = vld [vmem:[#allocation9 + $0xd40] ss:$16 sps:$4 sm:$0xff]  }
 0x426   :  { %3882 = vmatprep.subr.bf16.mxu0 %v9866_v57  ;;  %3964 = vmatprep.subr.bf16.mxu1 %v9869_v59  ;;  %v9945_v57 = vld [vmem:[#allocation9 + $0xd48] ss:$16 sps:$4 sm:$0xff]   ;;  %v9950_v59 = vld [vmem:[#allocation9 + $0xd64] ss:$16 sps:$4 sm:$0xff]  }
 0x429   :  { %3883 = vmatpush1.bf16.msra.mxu0 %v9864_v60  ;;  %3965 = vmatpush1.bf16.msra.mxu1 %v9867_v61  ;;  %v9953_v60 = vld [vmem:[#allocation9 + $0xd6c] ss:$16 sps:$4 sm:$0xff]   ;;  %v9948_v61 = vld [vmem:[#allocation9 + $0xd60] ss:$16 sps:$4 sm:$0xff]  }
 0x42a   :  { %3884 = vmatprep.subr.bf16.mxu0 %v9872_v62  ;;  %3966 = vmatprep.subr.bf16.mxu1 %v9875_v63  ;;  %v9951_v62 = vld [vmem:[#allocation9 + $0xd68] ss:$16 sps:$4 sm:$0xff]   ;;  %v9956_v63 = vld [vmem:[#allocation9 + $0xd84] ss:$16 sps:$4 sm:$0xff]  }
 0x42d   :  { %3885 = vmatpush1.bf16.msra.mxu0 %v9870_v0  ;;  %3967 = vmatpush1.bf16.msra.mxu1 %v9873_v10  ;;  %v9959_v0 = vld [vmem:[#allocation9 + $0xd8c] ss:$16 sps:$4 sm:$0xff]   ;;  %v9954_v10 = vld [vmem:[#allocation9 + $0xd80] ss:$16 sps:$4 sm:$0xff]  }
 0x42e   :  { %3886 = vmatprep.subr.bf16.mxu0 %v9878_v1  ;;  %3968 = vmatprep.subr.bf16.mxu1 %v9881_v2  ;;  %v9957_v1 = vld [vmem:[#allocation9 + $0xd88] ss:$16 sps:$4 sm:$0xff]   ;;  %v9962_v2 = vld [vmem:[#allocation9 + $0xda4] ss:$16 sps:$4 sm:$0xff]  }
 0x431   :  { %3887 = vmatpush1.bf16.msra.mxu0 %v9876_v3  ;;  %3969 = vmatpush1.bf16.msra.mxu1 %v9879_v4  ;;  %v9965_v3 = vld [vmem:[#allocation9 + $0xdac] ss:$16 sps:$4 sm:$0xff]   ;;  %v9960_v4 = vld [vmem:[#allocation9 + $0xda0] ss:$16 sps:$4 sm:$0xff]  }
 0x432   :  { %4811 = vmatprep.subr.bf16.mxu0 %v9884_v6  ;;  %4893 = vmatprep.subr.bf16.mxu1 %v9887_v7  ;;  %v9968_v6 = vld [vmem:[#allocation9 + $0xdc4] ss:$16 sps:$4 sm:$0xff]   ;;  %v9971_v7 = vld [vmem:[#allocation9 + $0xdcc] ss:$16 sps:$4 sm:$0xff]  }
 0x434   :  { %3889 = vmatmul.mubr.bf16.vlgmr.msra.gmra.mrb[12].mxu0 %v3044_v25  ;;  %3971 = vmatmul.mubr.bf16.vlgmr.msra.gmra.mrb[12].mxu1 %v3044_v25  ;;  %v9974_v25 = vld [vmem:[#allocation9 + $0xde4] ss:$16 sps:$4 sm:$0xff]  }
 0x435   :  { %4812 = vmatpush1.bf16.msra.mxu0 %v9882_v8  ;;  %4894 = vmatpush1.bf16.msra.mxu1 %v9885_v9  ;;  %v9966_v8 = vld [vmem:[#allocation9 + $0xdc0] ss:$16 sps:$4 sm:$0xff]   ;;  %v9969_v9 = vld [vmem:[#allocation9 + $0xdc8] ss:$16 sps:$4 sm:$0xff]  }
 0x436   :  { %4813 = vmatprep.subr.bf16.mxu0 %v9890_v11  ;;  %4895 = vmatprep.subr.bf16.mxu1 %v9893_v12  ;;  %v9977_v11 = vld [vmem:[#allocation9 + $0xdec] ss:$16 sps:$4 sm:$0xff]   ;;  %v9972_v12 = vld [vmem:[#allocation9 + $0xde0] ss:$16 sps:$4 sm:$0xff]  }
 0x439   :  { %4814 = vmatpush1.bf16.msra.mxu0 %v9888_v13  ;;  %4896 = vmatpush1.bf16.msra.mxu1 %v9891_v14  ;;  %v9975_v13 = vld [vmem:[#allocation9 + $0xde8] ss:$16 sps:$4 sm:$0xff]   ;;  %v9980_v14 = vld [vmem:[#allocation9 + $0xe04] ss:$16 sps:$4 sm:$0xff]  }
 0x43a   :  { %4815 = vmatprep.subr.bf16.mxu0 %v9896_v15  ;;  %4897 = vmatprep.subr.bf16.mxu1 %v9899_v16  ;;  %v9983_v15 = vld [vmem:[#allocation9 + $0xe0c] ss:$16 sps:$4 sm:$0xff]  }
 0x43d   :  { %4816 = vmatpush1.bf16.msra.mxu0 %v9894_v17  ;;  %4898 = vmatpush1.bf16.msra.mxu1 %v9897_v32 }
 0x43e   :  { %4817 = vmatprep.subr.bf16.mxu0 %v9902_v18  ;;  %4899 = vmatprep.subr.bf16.mxu1 %v9905_v19 }
 0x441   :  { %4818 = vmatpush1.bf16.msra.mxu0 %v9900_v20  ;;  %4900 = vmatpush1.bf16.msra.mxu1 %v9903_v21 }
 0x442   :  { %4819 = vmatprep.subr.bf16.mxu0 %v9908_v22  ;;  %4901 = vmatprep.subr.bf16.mxu1 %v9911_v23 }
 0x445   :  { %4820 = vmatpush1.bf16.msra.mxu0 %v9906_v24  ;;  %4902 = vmatpush1.bf16.msra.mxu1 %v9909_v26 }
 0x446   :  { %4821 = vmatprep.subr.bf16.mxu0 %v9914_v27  ;;  %4903 = vmatprep.subr.bf16.mxu1 %v9917_v33 }
 0x449   :  { %4822 = vmatpush1.bf16.msra.mxu0 %v9912_v34  ;;  %4904 = vmatpush1.bf16.msra.mxu1 %v9915_v35  ;;  %v3980_v35 = vld [vmem:[#allocation2 + $0x3] ss:$8 sm:$0xf] }
 0x44a   :  { %4823 = vmatprep.subr.bf16.mxu0 %v9920_v36  ;;  %4905 = vmatprep.subr.bf16.mxu1 %v9923_v37  ;;  %v4011_v36 = vrot.slane %v10904_v56, 2 }
 0x44d   :  { %4824 = vmatpush1.bf16.msra.mxu0 %v9918_v38  ;;  %4906 = vmatpush1.bf16.msra.mxu1 %v9921_v39 }
 0x44e   :  { %4825 = vmatprep.subr.bf16.mxu0 %v9926_v40  ;;  %4907 = vmatprep.subr.bf16.mxu1 %v9929_v42 }
 0x451   :  { %4826 = vmatpush1.bf16.msra.mxu0 %v9924_v43  ;;  %4908 = vmatpush1.bf16.msra.mxu1 %v9927_v44  ;;  %v9978_v44 = vld [vmem:[#allocation9 + $0xe00] ss:$16 sps:$4 sm:$0xff]  }
 0x452   :  { %4827 = vmatprep.subr.bf16.mxu0 %v9932_v45  ;;  %4909 = vmatprep.subr.bf16.mxu1 %v9935_v46  ;;  %v9981_v45 = vld [vmem:[#allocation9 + $0xe08] ss:$16 sps:$4 sm:$0xff]   ;;  %v9986_v46 = vld [vmem:[#allocation9 + $0xe24] ss:$16 sps:$4 sm:$0xff]  }
 0x455   :  { %4828 = vmatpush1.bf16.msra.mxu0 %v9930_v47  ;;  %4910 = vmatpush1.bf16.msra.mxu1 %v9933_v48  ;;  %v9989_v47 = vld [vmem:[#allocation9 + $0xe2c] ss:$16 sps:$4 sm:$0xff]  }
 0x456   :  { %4829 = vmatprep.subr.bf16.mxu0 %v9938_v49  ;;  %4911 = vmatprep.subr.bf16.mxu1 %v9941_v50  ;;  %v9984_v49 = vld [vmem:[#allocation9 + $0xe20] ss:$16 sps:$4 sm:$0xff]   ;;  %v9987_v50 = vld [vmem:[#allocation9 + $0xe28] ss:$16 sps:$4 sm:$0xff]  }
 0x459   :  { %4830 = vmatpush1.bf16.msra.mxu0 %v9936_v51  ;;  %4912 = vmatpush1.bf16.msra.mxu1 %v9939_v52  ;;  %v9992_v51 = vld [vmem:[#allocation9 + $0xe44] ss:$16 sps:$4 sm:$0xff]   ;;  %v9995_v52 = vld [vmem:[#allocation9 + $0xe4c] ss:$16 sps:$4 sm:$0xff]  }
 0x45a   :  { %4831 = vmatprep.subr.bf16.mxu0 %v9944_v53  ;;  %4913 = vmatprep.subr.bf16.mxu1 %v9947_v54  ;;  %v9990_v53 = vld [vmem:[#allocation9 + $0xe40] ss:$16 sps:$4 sm:$0xff]   ;;  %v9993_v54 = vld [vmem:[#allocation9 + $0xe48] ss:$16 sps:$4 sm:$0xff]  }
 0x45d   :  { %4832 = vmatpush1.bf16.msra.mxu0 %v9942_v55  ;;  %4914 = vmatpush1.bf16.msra.mxu1 %v9945_v57  ;;  %v9998_v55 = vld [vmem:[#allocation9 + $0xe64] ss:$16 sps:$4 sm:$0xff]   ;;  %v10001_v57 = vld [vmem:[#allocation9 + $0xe6c] ss:$16 sps:$4 sm:$0xff]  }
 0x45e   :  { %4833 = vmatprep.subr.bf16.mxu0 %v9950_v59  ;;  %4915 = vmatprep.subr.bf16.mxu1 %v9953_v60  ;;  %v9996_v59 = vld [vmem:[#allocation9 + $0xe60] ss:$16 sps:$4 sm:$0xff]   ;;  %v9999_v60 = vld [vmem:[#allocation9 + $0xe68] ss:$16 sps:$4 sm:$0xff]  }
 0x461   :  { %4834 = vmatpush1.bf16.msra.mxu0 %v9948_v61  ;;  %4916 = vmatpush1.bf16.msra.mxu1 %v9951_v62  ;;  %v10004_v61 = vld [vmem:[#allocation9 + $0xe84] ss:$16 sps:$4 sm:$0xff]   ;;  %v10007_v62 = vld [vmem:[#allocation9 + $0xe8c] ss:$16 sps:$4 sm:$0xff]  }
 0x462   :  { %4835 = vmatprep.subr.bf16.mxu0 %v9956_v63  ;;  %4917 = vmatprep.subr.bf16.mxu1 %v9959_v0  ;;  %v10002_v63 = vld [vmem:[#allocation9 + $0xe80] ss:$16 sps:$4 sm:$0xff]   ;;  %v10005_v0 = vld [vmem:[#allocation9 + $0xe88] ss:$16 sps:$4 sm:$0xff]  }
 0x465   :  { %4836 = vmatpush1.bf16.msra.mxu0 %v9954_v10  ;;  %4918 = vmatpush1.bf16.msra.mxu1 %v9957_v1  ;;  %v10010_v10 = vld [vmem:[#allocation9 + $0xea4] ss:$16 sps:$4 sm:$0xff]   ;;  %v10013_v1 = vld [vmem:[#allocation9 + $0xeac] ss:$16 sps:$4 sm:$0xff]  }
 0x466   :  { %4837 = vmatprep.subr.bf16.mxu0 %v9962_v2  ;;  %4919 = vmatprep.subr.bf16.mxu1 %v9965_v3  ;;  %v10008_v2 = vld [vmem:[#allocation9 + $0xea0] ss:$16 sps:$4 sm:$0xff]   ;;  %v10011_v3 = vld [vmem:[#allocation9 + $0xea8] ss:$16 sps:$4 sm:$0xff]  }
 0x469   :  { %4838 = vmatpush1.bf16.msra.mxu0 %v9960_v4  ;;  %4920 = vmatpush1.bf16.msra.mxu1 %v9963_v5  ;;  %v10016_v4 = vld [vmem:[#allocation9 + $0xec4] ss:$16 sps:$4 sm:$0xff]   ;;  %v10019_v5 = vld [vmem:[#allocation9 + $0xecc] ss:$16 sps:$4 sm:$0xff]  }
 0x46a   :  { %4839 = vmatprep.subr.bf16.mxu0 %v9968_v6  ;;  %4921 = vmatprep.subr.bf16.mxu1 %v9971_v7  ;;  %v10014_v6 = vld [vmem:[#allocation9 + $0xec0] ss:$16 sps:$4 sm:$0xff]   ;;  %v10017_v7 = vld [vmem:[#allocation9 + $0xec8] ss:$16 sps:$4 sm:$0xff]  }
 0x46d   :  { %4840 = vmatpush1.bf16.msra.mxu0 %v9966_v8  ;;  %4922 = vmatpush1.bf16.msra.mxu1 %v9969_v9  ;;  %v10022_v8 = vld [vmem:[#allocation9 + $0xee4] ss:$16 sps:$4 sm:$0xff]   ;;  %v10025_v9 = vld [vmem:[#allocation9 + $0xeec] ss:$16 sps:$4 sm:$0xff]  }
 0x46e   :  { %4841 = vmatprep.subr.bf16.mxu0 %v9974_v25  ;;  %4923 = vmatprep.subr.bf16.mxu1 %v9977_v11  ;;  %v10020_v25 = vld [vmem:[#allocation9 + $0xee0] ss:$16 sps:$4 sm:$0xff]   ;;  %v10023_v11 = vld [vmem:[#allocation9 + $0xee8] ss:$16 sps:$4 sm:$0xff]  }
 0x471   :  { %4842 = vmatpush1.bf16.msra.mxu0 %v9972_v12  ;;  %4924 = vmatpush1.bf16.msra.mxu1 %v9975_v13  ;;  %v10028_v12 = vld [vmem:[#allocation9 + $0xf04] ss:$16 sps:$4 sm:$0xff]   ;;  %v10031_v13 = vld [vmem:[#allocation9 + $0xf0c] ss:$16 sps:$4 sm:$0xff]  }
 0x472   :  { %4852 = vmatprep.subr.bf16.mxu0 %v9980_v14  ;;  %4934 = vmatprep.subr.bf16.mxu1 %v9983_v15  ;;  %v10026_v14 = vld [vmem:[#allocation9 + $0xf00] ss:$16 sps:$4 sm:$0xff]   ;;  %v10029_v15 = vld [vmem:[#allocation9 + $0xf08] ss:$16 sps:$4 sm:$0xff]  }
 0x507   :  { %v3890_v16 = vpop.f32.mrb[12].mxu0  ;;  %v3972_v17 = vpop.f32.mrb[12].mxu1 }
 0x508   :  { %v3892_v32 = vpop.f32.mrb[13].mxu0  ;;  %v3974_v18 = vpop.f32.mrb[13].mxu1 }
 0x509   :  { %v3985_v19 = vcombine.low %v3890_v16, %v3892_v32  ;;  %v3986_v20 = vcombine.low %v3972_v17, %v3974_v18  ;;  %v3894_v21 = vpop.f32.mrb[14].mxu0  ;;  %v3976_v22 = vpop.f32.mrb[14].mxu1  ;;  %v10034_v16 = vld [vmem:[#allocation9 + $0xf24] ss:$16 sps:$4 sm:$0xff]   ;;  %v10037_v17 = vld [vmem:[#allocation9 + $0xf2c] ss:$16 sps:$4 sm:$0xff]  }
 0x50a   :  { %v3895_v23 = vpop.f32.mrb[15].mxu0  ;;  %v3977_v24 = vpop.f32.mrb[15].mxu1  ;;  %v10032_v32 = vld [vmem:[#allocation9 + $0xf20] ss:$16 sps:$4 sm:$0xff]   ;;  %v10035_v18 = vld [vmem:[#allocation9 + $0xf28] ss:$16 sps:$4 sm:$0xff]  }
 0x50b   :  { %v3993_v26 = vrot.slane %v3985_v19, %v10881_v58  ;;  %v4000_v27 = vrot.slane %v3986_v20, %v10881_v58  ;;  %v10040_v19 = vld [vmem:[#allocation9 + $0xf44] ss:$16 sps:$4 sm:$0xff]   ;;  %v10043_v20 = vld [vmem:[#allocation9 + $0xf4c] ss:$16 sps:$4 sm:$0xff]   ;;  %v10038_v21 = vld [vmem:[#allocation9 + $0xf40] ss:$16 sps:$4 sm:$0xff]  }
 0x50c   :  { %v10041_v22 = vld [vmem:[#allocation9 + $0xf48] ss:$16 sps:$4 sm:$0xff]   ;;  %v10046_v23 = vld [vmem:[#allocation9 + $0xf64] ss:$16 sps:$4 sm:$0xff]   ;;  %v10049_v24 = vld [vmem:[#allocation9 + $0xf6c] ss:$16 sps:$4 sm:$0xff]  }
 0x50d   :  { %v4001_v33 = vcombine.low %v3993_v26, %v4000_v27  ;;  %v10044_v26 = vld [vmem:[#allocation9 + $0xf60] ss:$16 sps:$4 sm:$0xff]   ;;  %v10047_v27 = vld [vmem:[#allocation9 + $0xf68] ss:$16 sps:$4 sm:$0xff]  }
 0x50f   :  { %v4008_v34 = vrot.slane %v4001_v33, %v10881_v58  ;;  %v10052_v33 = vld [vmem:[#allocation9 + $0xf84] ss:$16 sps:$4 sm:$0xff]  }
 0x511   :  { %v10921_v37 = vadd.f32 %v4008_v34, %v3980_v35  ;;  %v10055_v34 = vld [vmem:[#allocation9 + $0xf8c] ss:$16 sps:$4 sm:$0xff]   ;;  %v10050_v35 = vld [vmem:[#allocation9 + $0xf80] ss:$16 sps:$4 sm:$0xff]  }
 0x513   :  { %v4013_v38 = vadd.f32 %v4011_v36, %v10921_v37  ;;  %v4025_v39 = vrot.slane %v10921_v37, %v10852_v28  ;;  %v4021_v40 = vrot.slane %v10921_v37, %v10855_v29  ;;  %v4033_v42 = vrot.slane %v10921_v37, %v10862_v31  ;;  %v10053_v36 = vld [vmem:[#allocation9 + $0xf88] ss:$16 sps:$4 sm:$0xff]  }
 0x515   :  { %4015 = vst.msk [vmem:[#allocation11 + $0x3] ss:$8 sm:$0x3] %vm10857_vm0, %v4013_v38  ;;  %v4039_v43 = vpack.c.bf16 %v4025_v39, %v4025_v39  ;;  %v4038_v56 = vpack.c.bf16 %v4021_v40, %v4021_v40  ;;  %v4041_v48 = vpack.c.bf16 %v4033_v42, %v4033_v42  ;;  %v10058_v38 = vld [vmem:[#allocation9 + $0xfa4] ss:$16 sps:$4 sm:$0xff]  }
 0x516   :  { %v10061_v39 = vld [vmem:[#allocation9 + $0xfac] ss:$16 sps:$4 sm:$0xff]   ;;  %v10056_v40 = vld [vmem:[#allocation9 + $0xfa0] ss:$16 sps:$4 sm:$0xff]   ;;  %v10059_v42 = vld [vmem:[#allocation9 + $0xfa8] ss:$16 sps:$4 sm:$0xff]  }
 0x517   :  { %4843 = vmatprep.mubr.bf16.mxu0 %v4039_v43  ;;  %4925 = vmatprep.mubr.bf16.mxu1 %v4039_v43  ;;  %v10064_v43 = vld [vmem:[#allocation9 + $0xfc4] ss:$16 sps:$4 sm:$0xff]  }
 0x518   :  { %4844 = vmatmul.mubr.bf16.vlgmr.msra.gmra.mrb[16].mxu0 %v4038_v56  ;;  %4926 = vmatmul.mubr.bf16.vlgmr.msra.gmra.mrb[16].mxu1 %v4038_v56  ;;  %v10065_v56 = vld [vmem:[#allocation9 + $0xfc8] ss:$16 sps:$4 sm:$0xff]  }
 0x519   :  { %4853 = vmatpush1.bf16.msra.mxu0 %v9978_v44  ;;  %4935 = vmatpush1.bf16.msra.mxu1 %v9981_v45  ;;  %v10067_v44 = vld [vmem:[#allocation9 + $0xfcc] ss:$16 sps:$4 sm:$0xff]   ;;  %v10062_v45 = vld [vmem:[#allocation9 + $0xfc0] ss:$16 sps:$4 sm:$0xff]  }
 0x51a   :  { %4884 = vmatprep.mubr.bf16.mxu0 %v4041_v48  ;;  %4966 = vmatprep.mubr.bf16.mxu1 %v4041_v48  ;;  %v10068_v48 = vld [vmem:[#allocation9 + $0xfe0] ss:$16 sps:$4 sm:$0xff]  }
 0x51b   :  { %4854 = vmatprep.subr.bf16.mxu0 %v9986_v46  ;;  %4936 = vmatprep.subr.bf16.mxu1 %v9989_v47  ;;  %v10070_v46 = vld [vmem:[#allocation9 + $0xfe4] ss:$16 sps:$4 sm:$0xff]   ;;  %v10073_v47 = vld [vmem:[#allocation9 + $0xfec] ss:$16 sps:$4 sm:$0xff]  }
 0x51d   :  { %4855 = vmatpush1.bf16.msra.mxu0 %v9984_v49  ;;  %4937 = vmatpush1.bf16.msra.mxu1 %v9987_v50  ;;  %v10071_v49 = vld [vmem:[#allocation9 + $0xfe8] ss:$16 sps:$4 sm:$0xff]   ;;  %v4029_v50 = vrot.slane %v10921_v37, %v10876_v41 }
 0x51e   :  { %4856 = vmatprep.subr.bf16.mxu0 %v9992_v51  ;;  %4938 = vmatprep.subr.bf16.mxu1 %v9995_v52  ;;  %v10076_v51 = vld [vmem:[#allocation9 + $0x1004] ss:$16 sps:$4 sm:$0xff]   ;;  %v10079_v52 = vld [vmem:[#allocation9 + $0x100c] ss:$16 sps:$4 sm:$0xff]  }
 0x521   :  { %4857 = vmatpush1.bf16.msra.mxu0 %v9990_v53  ;;  %4939 = vmatpush1.bf16.msra.mxu1 %v9993_v54  ;;  %v10074_v53 = vld [vmem:[#allocation9 + $0x1000] ss:$16 sps:$4 sm:$0xff]   ;;  %v10077_v54 = vld [vmem:[#allocation9 + $0x1008] ss:$16 sps:$4 sm:$0xff]  }
 0x522   :  { %4858 = vmatprep.subr.bf16.mxu0 %v9998_v55  ;;  %4940 = vmatprep.subr.bf16.mxu1 %v10001_v57  ;;  %v4040_v55 = vpack.c.bf16 %v4029_v50, %v4029_v50  ;;  %v10082_v57 = vld [vmem:[#allocation9 + $0x1024] ss:$16 sps:$4 sm:$0xff]   ;;  %v10155_v50 = vld [vmem:[#allocation9 + $0x11a8] ss:$16 sps:$4 sm:$0xff]  }
 0x525   :  { %4859 = vmatpush1.bf16.msra.mxu0 %v9996_v59  ;;  %4941 = vmatpush1.bf16.msra.mxu1 %v9999_v60  ;;  %v10085_v59 = vld [vmem:[#allocation9 + $0x102c] ss:$16 sps:$4 sm:$0xff]   ;;  %v10080_v60 = vld [vmem:[#allocation9 + $0x1020] ss:$16 sps:$4 sm:$0xff]  }
 0x526   :  { %4860 = vmatprep.subr.bf16.mxu0 %v10004_v61  ;;  %4942 = vmatprep.subr.bf16.mxu1 %v10007_v62  ;;  %v10083_v61 = vld [vmem:[#allocation9 + $0x1028] ss:$16 sps:$4 sm:$0xff]   ;;  %v10088_v62 = vld [vmem:[#allocation9 + $0x1044] ss:$16 sps:$4 sm:$0xff]  }
 0x529   :  { %4861 = vmatpush1.bf16.msra.mxu0 %v10002_v63  ;;  %4943 = vmatpush1.bf16.msra.mxu1 %v10005_v0  ;;  %v10091_v63 = vld [vmem:[#allocation9 + $0x104c] ss:$16 sps:$4 sm:$0xff]   ;;  %v10086_v0 = vld [vmem:[#allocation9 + $0x1040] ss:$16 sps:$4 sm:$0xff]  }
 0x52a   :  { %4862 = vmatprep.subr.bf16.mxu0 %v10010_v10  ;;  %4944 = vmatprep.subr.bf16.mxu1 %v10013_v1  ;;  %v10089_v10 = vld [vmem:[#allocation9 + $0x1048] ss:$16 sps:$4 sm:$0xff]   ;;  %v10094_v1 = vld [vmem:[#allocation9 + $0x1064] ss:$16 sps:$4 sm:$0xff]  }
 0x52d   :  { %4863 = vmatpush1.bf16.msra.mxu0 %v10008_v2  ;;  %4945 = vmatpush1.bf16.msra.mxu1 %v10011_v3  ;;  %v10097_v2 = vld [vmem:[#allocation9 + $0x106c] ss:$16 sps:$4 sm:$0xff]   ;;  %v10092_v3 = vld [vmem:[#allocation9 + $0x1060] ss:$16 sps:$4 sm:$0xff]  }
 0x52e   :  { %4864 = vmatprep.subr.bf16.mxu0 %v10016_v4  ;;  %4946 = vmatprep.subr.bf16.mxu1 %v10019_v5  ;;  %v10095_v4 = vld [vmem:[#allocation9 + $0x1068] ss:$16 sps:$4 sm:$0xff]   ;;  %v10100_v5 = vld [vmem:[#allocation9 + $0x1084] ss:$16 sps:$4 sm:$0xff]  }
 0x531   :  { %4865 = vmatpush1.bf16.msra.mxu0 %v10014_v6  ;;  %4947 = vmatpush1.bf16.msra.mxu1 %v10017_v7  ;;  %v10103_v6 = vld [vmem:[#allocation9 + $0x108c] ss:$16 sps:$4 sm:$0xff]   ;;  %v10098_v7 = vld [vmem:[#allocation9 + $0x1080] ss:$16 sps:$4 sm:$0xff]  }
 0x532   :  { %4866 = vmatprep.subr.bf16.mxu0 %v10022_v8  ;;  %4948 = vmatprep.subr.bf16.mxu1 %v10025_v9  ;;  %v10101_v8 = vld [vmem:[#allocation9 + $0x1088] ss:$16 sps:$4 sm:$0xff]   ;;  %v10106_v9 = vld [vmem:[#allocation9 + $0x10a4] ss:$16 sps:$4 sm:$0xff]  }
 0x535   :  { %4867 = vmatpush1.bf16.msra.mxu0 %v10020_v25  ;;  %4949 = vmatpush1.bf16.msra.mxu1 %v10023_v11  ;;  %v10109_v25 = vld [vmem:[#allocation9 + $0x10ac] ss:$16 sps:$4 sm:$0xff]   ;;  %v10104_v11 = vld [vmem:[#allocation9 + $0x10a0] ss:$16 sps:$4 sm:$0xff]  }
 0x536   :  { %4868 = vmatprep.subr.bf16.mxu0 %v10028_v12  ;;  %4950 = vmatprep.subr.bf16.mxu1 %v10031_v13  ;;  %v10107_v12 = vld [vmem:[#allocation9 + $0x10a8] ss:$16 sps:$4 sm:$0xff]   ;;  %v10112_v13 = vld [vmem:[#allocation9 + $0x10c4] ss:$16 sps:$4 sm:$0xff]  }
 0x539   :  { %4869 = vmatpush1.bf16.msra.mxu0 %v10026_v14  ;;  %4951 = vmatpush1.bf16.msra.mxu1 %v10029_v15  ;;  %v10115_v14 = vld [vmem:[#allocation9 + $0x10cc] ss:$16 sps:$4 sm:$0xff]   ;;  %v10110_v15 = vld [vmem:[#allocation9 + $0x10c0] ss:$16 sps:$4 sm:$0xff]  }
 0x53a   :  { %4870 = vmatprep.subr.bf16.mxu0 %v10034_v16  ;;  %4952 = vmatprep.subr.bf16.mxu1 %v10037_v17  ;;  %v10113_v16 = vld [vmem:[#allocation9 + $0x10c8] ss:$16 sps:$4 sm:$0xff]   ;;  %v10118_v17 = vld [vmem:[#allocation9 + $0x10e4] ss:$16 sps:$4 sm:$0xff]  }
 0x53d   :  { %4871 = vmatpush1.bf16.msra.mxu0 %v10032_v32  ;;  %4953 = vmatpush1.bf16.msra.mxu1 %v10035_v18  ;;  %v10121_v32 = vld [vmem:[#allocation9 + $0x10ec] ss:$16 sps:$4 sm:$0xff]   ;;  %v10116_v18 = vld [vmem:[#allocation9 + $0x10e0] ss:$16 sps:$4 sm:$0xff]  }
 0x53e   :  { %4872 = vmatprep.subr.bf16.mxu0 %v10040_v19  ;;  %4954 = vmatprep.subr.bf16.mxu1 %v10043_v20  ;;  %v10119_v19 = vld [vmem:[#allocation9 + $0x10e8] ss:$16 sps:$4 sm:$0xff]   ;;  %v10124_v20 = vld [vmem:[#allocation9 + $0x1104] ss:$16 sps:$4 sm:$0xff]  }
 0x541   :  { %4873 = vmatpush1.bf16.msra.mxu0 %v10038_v21  ;;  %4955 = vmatpush1.bf16.msra.mxu1 %v10041_v22  ;;  %v10127_v21 = vld [vmem:[#allocation9 + $0x110c] ss:$16 sps:$4 sm:$0xff]   ;;  %v10122_v22 = vld [vmem:[#allocation9 + $0x1100] ss:$16 sps:$4 sm:$0xff]  }
 0x542   :  { %4874 = vmatprep.subr.bf16.mxu0 %v10046_v23  ;;  %4956 = vmatprep.subr.bf16.mxu1 %v10049_v24  ;;  %v10125_v23 = vld [vmem:[#allocation9 + $0x1108] ss:$16 sps:$4 sm:$0xff]   ;;  %v10130_v24 = vld [vmem:[#allocation9 + $0x1124] ss:$16 sps:$4 sm:$0xff]  }
 0x545   :  { %4875 = vmatpush1.bf16.msra.mxu0 %v10044_v26  ;;  %4957 = vmatpush1.bf16.msra.mxu1 %v10047_v27  ;;  %v10133_v26 = vld [vmem:[#allocation9 + $0x112c] ss:$16 sps:$4 sm:$0xff]   ;;  %v10128_v27 = vld [vmem:[#allocation9 + $0x1120] ss:$16 sps:$4 sm:$0xff]  }
 0x546   :  { %4876 = vmatprep.subr.bf16.mxu0 %v10052_v33  ;;  %4958 = vmatprep.subr.bf16.mxu1 %v10055_v34  ;;  %v10131_v33 = vld [vmem:[#allocation9 + $0x1128] ss:$16 sps:$4 sm:$0xff]   ;;  %v10136_v34 = vld [vmem:[#allocation9 + $0x1144] ss:$16 sps:$4 sm:$0xff]  }
 0x549   :  { %4877 = vmatpush1.bf16.msra.mxu0 %v10050_v35  ;;  %4959 = vmatpush1.bf16.msra.mxu1 %v10053_v36  ;;  %v10139_v35 = vld [vmem:[#allocation9 + $0x114c] ss:$16 sps:$4 sm:$0xff]   ;;  %v10134_v36 = vld [vmem:[#allocation9 + $0x1140] ss:$16 sps:$4 sm:$0xff]  }
 0x54a   :  { %4878 = vmatprep.subr.bf16.mxu0 %v10058_v38  ;;  %4960 = vmatprep.subr.bf16.mxu1 %v10061_v39  ;;  %v10137_v38 = vld [vmem:[#allocation9 + $0x1148] ss:$16 sps:$4 sm:$0xff]   ;;  %v10142_v39 = vld [vmem:[#allocation9 + $0x1164] ss:$16 sps:$4 sm:$0xff]  }
 0x54d   :  { %4879 = vmatpush1.bf16.msra.mxu0 %v10056_v40  ;;  %4961 = vmatpush1.bf16.msra.mxu1 %v10059_v42  ;;  %v10145_v40 = vld [vmem:[#allocation9 + $0x116c] ss:$16 sps:$4 sm:$0xff]   ;;  %v10140_v42 = vld [vmem:[#allocation9 + $0x1160] ss:$16 sps:$4 sm:$0xff]  }
 0x54e   :  { %4880 = vmatprep.subr.bf16.mxu0 %v10064_v43  ;;  %4962 = vmatprep.subr.bf16.mxu1 %v10067_v44  ;;  %v10143_v43 = vld [vmem:[#allocation9 + $0x1168] ss:$16 sps:$4 sm:$0xff]   ;;  %v10148_v44 = vld [vmem:[#allocation9 + $0x1184] ss:$16 sps:$4 sm:$0xff]  }
 0x551   :  { %4881 = vmatpush1.bf16.msra.mxu0 %v10062_v45  ;;  %4963 = vmatpush1.bf16.msra.mxu1 %v10065_v56  ;;  %v10151_v45 = vld [vmem:[#allocation9 + $0x118c] ss:$16 sps:$4 sm:$0xff]   ;;  %v10146_v56 = vld [vmem:[#allocation9 + $0x1180] ss:$16 sps:$4 sm:$0xff]  }
 0x552   :  { %4882 = vmatprep.subr.bf16.mxu0 %v10070_v46  ;;  %4964 = vmatprep.subr.bf16.mxu1 %v10073_v47  ;;  %v10149_v46 = vld [vmem:[#allocation9 + $0x1188] ss:$16 sps:$4 sm:$0xff]   ;;  %v10154_v47 = vld [vmem:[#allocation9 + $0x11a4] ss:$16 sps:$4 sm:$0xff]  }
 0x555   :  { %4883 = vmatpush1.bf16.msra.mxu0 %v10068_v48  ;;  %4965 = vmatpush1.bf16.msra.mxu1 %v10071_v49  ;;  %v10157_v48 = vld [vmem:[#allocation9 + $0x11ac] ss:$16 sps:$4 sm:$0xff]   ;;  %v10152_v49 = vld [vmem:[#allocation9 + $0x11a0] ss:$16 sps:$4 sm:$0xff]  }
 0x556   :  { %5807 = vmatprep.subr.bf16.mxu0 %v10076_v51  ;;  %5889 = vmatprep.subr.bf16.mxu1 %v10079_v52  ;;  %v10160_v51 = vld [vmem:[#allocation9 + $0x11c4] ss:$16 sps:$4 sm:$0xff]   ;;  %v10163_v52 = vld [vmem:[#allocation9 + $0x11cc] ss:$16 sps:$4 sm:$0xff]  }
 0x558   :  { %4885 = vmatmul.mubr.bf16.vlgmr.msra.gmra.mrb[16].mxu0 %v4040_v55  ;;  %4967 = vmatmul.mubr.bf16.vlgmr.msra.gmra.mrb[16].mxu1 %v4040_v55  ;;  %v10166_v55 = vld [vmem:[#allocation9 + $0x11e4] ss:$16 sps:$4 sm:$0xff]  }
 0x559   :  { %5808 = vmatpush1.bf16.msra.mxu0 %v10074_v53  ;;  %5890 = vmatpush1.bf16.msra.mxu1 %v10077_v54  ;;  %v10158_v53 = vld [vmem:[#allocation9 + $0x11c0] ss:$16 sps:$4 sm:$0xff]   ;;  %v10161_v54 = vld [vmem:[#allocation9 + $0x11c8] ss:$16 sps:$4 sm:$0xff]  }
 0x55a   :  { %5809 = vmatprep.subr.bf16.mxu0 %v10082_v57  ;;  %5891 = vmatprep.subr.bf16.mxu1 %v10085_v59  ;;  %v10169_v57 = vld [vmem:[#allocation9 + $0x11ec] ss:$16 sps:$4 sm:$0xff]   ;;  %v10164_v59 = vld [vmem:[#allocation9 + $0x11e0] ss:$16 sps:$4 sm:$0xff]  }
 0x55d   :  { %5810 = vmatpush1.bf16.msra.mxu0 %v10080_v60  ;;  %5892 = vmatpush1.bf16.msra.mxu1 %v10083_v61  ;;  %v10167_v60 = vld [vmem:[#allocation9 + $0x11e8] ss:$16 sps:$4 sm:$0xff]   ;;  %v10172_v61 = vld [vmem:[#allocation9 + $0x1204] ss:$16 sps:$4 sm:$0xff]  }
 0x55e   :  { %5811 = vmatprep.subr.bf16.mxu0 %v10088_v62  ;;  %5893 = vmatprep.subr.bf16.mxu1 %v10091_v63  ;;  %v10175_v62 = vld [vmem:[#allocation9 + $0x120c] ss:$16 sps:$4 sm:$0xff]  }
 0x561   :  { %5812 = vmatpush1.bf16.msra.mxu0 %v10086_v0  ;;  %5894 = vmatpush1.bf16.msra.mxu1 %v10089_v10 }
 0x562   :  { %5813 = vmatprep.subr.bf16.mxu0 %v10094_v1  ;;  %5895 = vmatprep.subr.bf16.mxu1 %v10097_v2 }
 0x565   :  { %5814 = vmatpush1.bf16.msra.mxu0 %v10092_v3  ;;  %5896 = vmatpush1.bf16.msra.mxu1 %v10095_v4 }
 0x566   :  { %5815 = vmatprep.subr.bf16.mxu0 %v10100_v5  ;;  %5897 = vmatprep.subr.bf16.mxu1 %v10103_v6 }
 0x569   :  { %5816 = vmatpush1.bf16.msra.mxu0 %v10098_v7  ;;  %5898 = vmatpush1.bf16.msra.mxu1 %v10101_v8 }
 0x56a   :  { %5817 = vmatprep.subr.bf16.mxu0 %v10106_v9  ;;  %5899 = vmatprep.subr.bf16.mxu1 %v10109_v25 }
 0x56d   :  { %5818 = vmatpush1.bf16.msra.mxu0 %v10104_v11  ;;  %5900 = vmatpush1.bf16.msra.mxu1 %v10107_v12  ;;  %v4976_v12 = vld [vmem:[#allocation2 + $0x4] ss:$8 sm:$0xf] }
 0x56e   :  { %5819 = vmatprep.subr.bf16.mxu0 %v10112_v13  ;;  %5901 = vmatprep.subr.bf16.mxu1 %v10115_v14  ;;  %v5007_v13 = vrot.slane %v10921_v37, 2 }
 0x571   :  { %5820 = vmatpush1.bf16.msra.mxu0 %v10110_v15  ;;  %5902 = vmatpush1.bf16.msra.mxu1 %v10113_v16 }
 0x572   :  { %5821 = vmatprep.subr.bf16.mxu0 %v10118_v17  ;;  %5903 = vmatprep.subr.bf16.mxu1 %v10121_v32 }
 0x575   :  { %5822 = vmatpush1.bf16.msra.mxu0 %v10116_v18  ;;  %5904 = vmatpush1.bf16.msra.mxu1 %v10119_v19  ;;  %v10170_v19 = vld [vmem:[#allocation9 + $0x1200] ss:$16 sps:$4 sm:$0xff]  }
 0x576   :  { %5823 = vmatprep.subr.bf16.mxu0 %v10124_v20  ;;  %5905 = vmatprep.subr.bf16.mxu1 %v10127_v21  ;;  %v10173_v20 = vld [vmem:[#allocation9 + $0x1208] ss:$16 sps:$4 sm:$0xff]   ;;  %v10178_v21 = vld [vmem:[#allocation9 + $0x1224] ss:$16 sps:$4 sm:$0xff]  }
 0x579   :  { %5824 = vmatpush1.bf16.msra.mxu0 %v10122_v22  ;;  %5906 = vmatpush1.bf16.msra.mxu1 %v10125_v23  ;;  %v10181_v22 = vld [vmem:[#allocation9 + $0x122c] ss:$16 sps:$4 sm:$0xff]  }
 0x57a   :  { %5825 = vmatprep.subr.bf16.mxu0 %v10130_v24  ;;  %5907 = vmatprep.subr.bf16.mxu1 %v10133_v26  ;;  %v10176_v24 = vld [vmem:[#allocation9 + $0x1220] ss:$16 sps:$4 sm:$0xff]   ;;  %v10179_v26 = vld [vmem:[#allocation9 + $0x1228] ss:$16 sps:$4 sm:$0xff]  }
 0x57d   :  { %5826 = vmatpush1.bf16.msra.mxu0 %v10128_v27  ;;  %5908 = vmatpush1.bf16.msra.mxu1 %v10131_v33  ;;  %v10184_v27 = vld [vmem:[#allocation9 + $0x1244] ss:$16 sps:$4 sm:$0xff]   ;;  %v10187_v33 = vld [vmem:[#allocation9 + $0x124c] ss:$16 sps:$4 sm:$0xff]  }
 0x57e   :  { %5827 = vmatprep.subr.bf16.mxu0 %v10136_v34  ;;  %5909 = vmatprep.subr.bf16.mxu1 %v10139_v35  ;;  %v10182_v34 = vld [vmem:[#allocation9 + $0x1240] ss:$16 sps:$4 sm:$0xff]   ;;  %v10185_v35 = vld [vmem:[#allocation9 + $0x1248] ss:$16 sps:$4 sm:$0xff]  }
 0x581   :  { %5828 = vmatpush1.bf16.msra.mxu0 %v10134_v36  ;;  %5910 = vmatpush1.bf16.msra.mxu1 %v10137_v38  ;;  %v10190_v36 = vld [vmem:[#allocation9 + $0x1264] ss:$16 sps:$4 sm:$0xff]   ;;  %v10193_v38 = vld [vmem:[#allocation9 + $0x126c] ss:$16 sps:$4 sm:$0xff]  }
 0x582   :  { %5829 = vmatprep.subr.bf16.mxu0 %v10142_v39  ;;  %5911 = vmatprep.subr.bf16.mxu1 %v10145_v40  ;;  %v10188_v39 = vld [vmem:[#allocation9 + $0x1260] ss:$16 sps:$4 sm:$0xff]   ;;  %v10191_v40 = vld [vmem:[#allocation9 + $0x1268] ss:$16 sps:$4 sm:$0xff]  }
 0x585   :  { %5830 = vmatpush1.bf16.msra.mxu0 %v10140_v42  ;;  %5912 = vmatpush1.bf16.msra.mxu1 %v10143_v43  ;;  %v10196_v42 = vld [vmem:[#allocation9 + $0x1284] ss:$16 sps:$4 sm:$0xff]   ;;  %v10199_v43 = vld [vmem:[#allocation9 + $0x128c] ss:$16 sps:$4 sm:$0xff]  }
 0x586   :  { %5831 = vmatprep.subr.bf16.mxu0 %v10148_v44  ;;  %5913 = vmatprep.subr.bf16.mxu1 %v10151_v45  ;;  %v10194_v44 = vld [vmem:[#allocation9 + $0x1280] ss:$16 sps:$4 sm:$0xff]   ;;  %v10197_v45 = vld [vmem:[#allocation9 + $0x1288] ss:$16 sps:$4 sm:$0xff]  }
 0x589   :  { %5832 = vmatpush1.bf16.msra.mxu0 %v10146_v56  ;;  %5914 = vmatpush1.bf16.msra.mxu1 %v10149_v46  ;;  %v10202_v56 = vld [vmem:[#allocation9 + $0x12a4] ss:$16 sps:$4 sm:$0xff]   ;;  %v10205_v46 = vld [vmem:[#allocation9 + $0x12ac] ss:$16 sps:$4 sm:$0xff]  }
 0x58a   :  { %5833 = vmatprep.subr.bf16.mxu0 %v10154_v47  ;;  %5915 = vmatprep.subr.bf16.mxu1 %v10157_v48  ;;  %v10200_v47 = vld [vmem:[#allocation9 + $0x12a0] ss:$16 sps:$4 sm:$0xff]   ;;  %v10203_v48 = vld [vmem:[#allocation9 + $0x12a8] ss:$16 sps:$4 sm:$0xff]  }
 0x58d   :  { %5834 = vmatpush1.bf16.msra.mxu0 %v10152_v49  ;;  %5916 = vmatpush1.bf16.msra.mxu1 %v10155_v50  ;;  %v10208_v49 = vld [vmem:[#allocation9 + $0x12c4] ss:$16 sps:$4 sm:$0xff]   ;;  %v10211_v50 = vld [vmem:[#allocation9 + $0x12cc] ss:$16 sps:$4 sm:$0xff]  }
 0x58e   :  { %5835 = vmatprep.subr.bf16.mxu0 %v10160_v51  ;;  %5917 = vmatprep.subr.bf16.mxu1 %v10163_v52  ;;  %v10206_v51 = vld [vmem:[#allocation9 + $0x12c0] ss:$16 sps:$4 sm:$0xff]   ;;  %v10209_v52 = vld [vmem:[#allocation9 + $0x12c8] ss:$16 sps:$4 sm:$0xff]  }
 0x591   :  { %5836 = vmatpush1.bf16.msra.mxu0 %v10158_v53  ;;  %5918 = vmatpush1.bf16.msra.mxu1 %v10161_v54  ;;  %v10214_v53 = vld [vmem:[#allocation9 + $0x12e4] ss:$16 sps:$4 sm:$0xff]   ;;  %v10217_v54 = vld [vmem:[#allocation9 + $0x12ec] ss:$16 sps:$4 sm:$0xff]  }
 0x592   :  { %5837 = vmatprep.subr.bf16.mxu0 %v10166_v55  ;;  %5919 = vmatprep.subr.bf16.mxu1 %v10169_v57  ;;  %v10212_v55 = vld [vmem:[#allocation9 + $0x12e0] ss:$16 sps:$4 sm:$0xff]   ;;  %v10215_v57 = vld [vmem:[#allocation9 + $0x12e8] ss:$16 sps:$4 sm:$0xff]  }
 0x595   :  { %5838 = vmatpush1.bf16.msra.mxu0 %v10164_v59  ;;  %5920 = vmatpush1.bf16.msra.mxu1 %v10167_v60  ;;  %v10220_v59 = vld [vmem:[#allocation9 + $0x1304] ss:$16 sps:$4 sm:$0xff]   ;;  %v10223_v60 = vld [vmem:[#allocation9 + $0x130c] ss:$16 sps:$4 sm:$0xff]  }
 0x596   :  { %5848 = vmatprep.subr.bf16.mxu0 %v10172_v61  ;;  %5930 = vmatprep.subr.bf16.mxu1 %v10175_v62  ;;  %v10218_v61 = vld [vmem:[#allocation9 + $0x1300] ss:$16 sps:$4 sm:$0xff]   ;;  %v10221_v62 = vld [vmem:[#allocation9 + $0x1308] ss:$16 sps:$4 sm:$0xff]  }
 0x62b   :  { %v4886_v63 = vpop.f32.mrb[16].mxu0  ;;  %v4968_v0 = vpop.f32.mrb[16].mxu1 }
 0x62c   :  { %v4888_v10 = vpop.f32.mrb[17].mxu0  ;;  %v4970_v1 = vpop.f32.mrb[17].mxu1 }
 0x62d   :  { %v4981_v2 = vcombine.low %v4886_v63, %v4888_v10  ;;  %v4982_v3 = vcombine.low %v4968_v0, %v4970_v1  ;;  %v4890_v4 = vpop.f32.mrb[18].mxu0  ;;  %v4972_v5 = vpop.f32.mrb[18].mxu1  ;;  %v10226_v63 = vld [vmem:[#allocation9 + $0x1324] ss:$16 sps:$4 sm:$0xff]   ;;  %v10229_v0 = vld [vmem:[#allocation9 + $0x132c] ss:$16 sps:$4 sm:$0xff]  }
 0x62e   :  { %v4891_v6 = vpop.f32.mrb[19].mxu0  ;;  %v4973_v7 = vpop.f32.mrb[19].mxu1  ;;  %v10224_v10 = vld [vmem:[#allocation9 + $0x1320] ss:$16 sps:$4 sm:$0xff]   ;;  %v10227_v1 = vld [vmem:[#allocation9 + $0x1328] ss:$16 sps:$4 sm:$0xff]  }
 0x62f   :  { %v4989_v8 = vrot.slane %v4981_v2, %v10881_v58  ;;  %v4996_v9 = vrot.slane %v4982_v3, %v10881_v58  ;;  %v10232_v2 = vld [vmem:[#allocation9 + $0x1344] ss:$16 sps:$4 sm:$0xff]   ;;  %v10235_v3 = vld [vmem:[#allocation9 + $0x134c] ss:$16 sps:$4 sm:$0xff]   ;;  %v10230_v4 = vld [vmem:[#allocation9 + $0x1340] ss:$16 sps:$4 sm:$0xff]  }
 0x630   :  { %v10233_v5 = vld [vmem:[#allocation9 + $0x1348] ss:$16 sps:$4 sm:$0xff]   ;;  %v10238_v6 = vld [vmem:[#allocation9 + $0x1364] ss:$16 sps:$4 sm:$0xff]   ;;  %v10241_v7 = vld [vmem:[#allocation9 + $0x136c] ss:$16 sps:$4 sm:$0xff]  }
 0x631   :  { %v4997_v25 = vcombine.low %v4989_v8, %v4996_v9  ;;  %v10236_v8 = vld [vmem:[#allocation9 + $0x1360] ss:$16 sps:$4 sm:$0xff]   ;;  %v10239_v9 = vld [vmem:[#allocation9 + $0x1368] ss:$16 sps:$4 sm:$0xff]  }
 0x633   :  { %v5004_v11 = vrot.slane %v4997_v25, %v10881_v58  ;;  %v10244_v25 = vld [vmem:[#allocation9 + $0x1384] ss:$16 sps:$4 sm:$0xff]  }
 0x635   :  { %v10938_v14 = vadd.f32 %v5004_v11, %v4976_v12  ;;  %v10247_v11 = vld [vmem:[#allocation9 + $0x138c] ss:$16 sps:$4 sm:$0xff]   ;;  %v10242_v12 = vld [vmem:[#allocation9 + $0x1380] ss:$16 sps:$4 sm:$0xff]  }
 0x637   :  { %v5009_v15 = vadd.f32 %v5007_v13, %v10938_v14  ;;  %v5021_v16 = vrot.slane %v10938_v14, %v10852_v28  ;;  %v5017_v17 = vrot.slane %v10938_v14, %v10855_v29  ;;  %v5029_v32 = vrot.slane %v10938_v14, %v10862_v31  ;;  %v10245_v13 = vld [vmem:[#allocation9 + $0x1388] ss:$16 sps:$4 sm:$0xff]  }
 0x639   :  { %5011 = vst.msk [vmem:[#allocation11 + $0x4] ss:$8 sm:$0x3] %vm10857_vm0, %v5009_v15  ;;  %v5035_v18 = vpack.c.bf16 %v5021_v16, %v5021_v16  ;;  %v5034_v37 = vpack.c.bf16 %v5017_v17, %v5017_v17  ;;  %v5037_v23 = vpack.c.bf16 %v5029_v32, %v5029_v32  ;;  %v10250_v15 = vld [vmem:[#allocation9 + $0x13a4] ss:$16 sps:$4 sm:$0xff]  }
 0x63a   :  { %v10253_v16 = vld [vmem:[#allocation9 + $0x13ac] ss:$16 sps:$4 sm:$0xff]   ;;  %v10248_v17 = vld [vmem:[#allocation9 + $0x13a0] ss:$16 sps:$4 sm:$0xff]   ;;  %v10251_v32 = vld [vmem:[#allocation9 + $0x13a8] ss:$16 sps:$4 sm:$0xff]  }
 0x63b   :  { %5839 = vmatprep.mubr.bf16.mxu0 %v5035_v18  ;;  %5921 = vmatprep.mubr.bf16.mxu1 %v5035_v18  ;;  %v10256_v18 = vld [vmem:[#allocation9 + $0x13c4] ss:$16 sps:$4 sm:$0xff]  }
 0x63c   :  { %5840 = vmatmul.mubr.bf16.vlgmr.msra.gmra.mrb[20].mxu0 %v5034_v37  ;;  %5922 = vmatmul.mubr.bf16.vlgmr.msra.gmra.mrb[20].mxu1 %v5034_v37  ;;  %v10257_v37 = vld [vmem:[#allocation9 + $0x13c8] ss:$16 sps:$4 sm:$0xff]  }
 0x63d   :  { %5849 = vmatpush1.bf16.msra.mxu0 %v10170_v19  ;;  %5931 = vmatpush1.bf16.msra.mxu1 %v10173_v20  ;;  %v10259_v19 = vld [vmem:[#allocation9 + $0x13cc] ss:$16 sps:$4 sm:$0xff]   ;;  %v10254_v20 = vld [vmem:[#allocation9 + $0x13c0] ss:$16 sps:$4 sm:$0xff]  }
 0x63e   :  { %5880 = vmatprep.mubr.bf16.mxu0 %v5037_v23  ;;  %5962 = vmatprep.mubr.bf16.mxu1 %v5037_v23  ;;  %v10260_v23 = vld [vmem:[#allocation9 + $0x13e0] ss:$16 sps:$4 sm:$0xff]  }
 0x63f   :  { %5850 = vmatprep.subr.bf16.mxu0 %v10178_v21  ;;  %5932 = vmatprep.subr.bf16.mxu1 %v10181_v22  ;;  %v10262_v21 = vld [vmem:[#allocation9 + $0x13e4] ss:$16 sps:$4 sm:$0xff]   ;;  %v10265_v22 = vld [vmem:[#allocation9 + $0x13ec] ss:$16 sps:$4 sm:$0xff]  }
 0x641   :  { %5851 = vmatpush1.bf16.msra.mxu0 %v10176_v24  ;;  %5933 = vmatpush1.bf16.msra.mxu1 %v10179_v26  ;;  %v10263_v24 = vld [vmem:[#allocation9 + $0x13e8] ss:$16 sps:$4 sm:$0xff]   ;;  %v5025_v26 = vrot.slane %v10938_v14, %v10876_v41 }
 0x642   :  { %5852 = vmatprep.subr.bf16.mxu0 %v10184_v27  ;;  %5934 = vmatprep.subr.bf16.mxu1 %v10187_v33  ;;  %v10268_v27 = vld [vmem:[#allocation9 + $0x1404] ss:$16 sps:$4 sm:$0xff]   ;;  %v10271_v33 = vld [vmem:[#allocation9 + $0x140c] ss:$16 sps:$4 sm:$0xff]  }
 0x645   :  { %5853 = vmatpush1.bf16.msra.mxu0 %v10182_v34  ;;  %5935 = vmatpush1.bf16.msra.mxu1 %v10185_v35  ;;  %v10266_v34 = vld [vmem:[#allocation9 + $0x1400] ss:$16 sps:$4 sm:$0xff]   ;;  %v10269_v35 = vld [vmem:[#allocation9 + $0x1408] ss:$16 sps:$4 sm:$0xff]  }
 0x646   :  { %5854 = vmatprep.subr.bf16.mxu0 %v10190_v36  ;;  %5936 = vmatprep.subr.bf16.mxu1 %v10193_v38  ;;  %v5036_v36 = vpack.c.bf16 %v5025_v26, %v5025_v26  ;;  %v10274_v38 = vld [vmem:[#allocation9 + $0x1424] ss:$16 sps:$4 sm:$0xff]   ;;  %v10349_v26 = vld [vmem:[#allocation9 + $0x15ac] ss:$16 sps:$4 sm:$0xff]  }
 0x649   :  { %5855 = vmatpush1.bf16.msra.mxu0 %v10188_v39  ;;  %5937 = vmatpush1.bf16.msra.mxu1 %v10191_v40  ;;  %v10277_v39 = vld [vmem:[#allocation9 + $0x142c] ss:$16 sps:$4 sm:$0xff]   ;;  %v10272_v40 = vld [vmem:[#allocation9 + $0x1420] ss:$16 sps:$4 sm:$0xff]  }
 0x64a   :  { %5856 = vmatprep.subr.bf16.mxu0 %v10196_v42  ;;  %5938 = vmatprep.subr.bf16.mxu1 %v10199_v43  ;;  %v10275_v42 = vld [vmem:[#allocation9 + $0x1428] ss:$16 sps:$4 sm:$0xff]   ;;  %v10280_v43 = vld [vmem:[#allocation9 + $0x1444] ss:$16 sps:$4 sm:$0xff]  }
 0x64d   :  { %5857 = vmatpush1.bf16.msra.mxu0 %v10194_v44  ;;  %5939 = vmatpush1.bf16.msra.mxu1 %v10197_v45  ;;  %v10283_v44 = vld [vmem:[#allocation9 + $0x144c] ss:$16 sps:$4 sm:$0xff]   ;;  %v10278_v45 = vld [vmem:[#allocation9 + $0x1440] ss:$16 sps:$4 sm:$0xff]  }
 0x64e   :  { %5858 = vmatprep.subr.bf16.mxu0 %v10202_v56  ;;  %5940 = vmatprep.subr.bf16.mxu1 %v10205_v46  ;;  %v10281_v56 = vld [vmem:[#allocation9 + $0x1448] ss:$16 sps:$4 sm:$0xff]   ;;  %v10286_v46 = vld [vmem:[#allocation9 + $0x1464] ss:$16 sps:$4 sm:$0xff]  }
 0x651   :  { %5859 = vmatpush1.bf16.msra.mxu0 %v10200_v47  ;;  %5941 = vmatpush1.bf16.msra.mxu1 %v10203_v48  ;;  %v10289_v47 = vld [vmem:[#allocation9 + $0x146c] ss:$16 sps:$4 sm:$0xff]   ;;  %v10284_v48 = vld [vmem:[#allocation9 + $0x1460] ss:$16 sps:$4 sm:$0xff]  }
 0x652   :  { %5860 = vmatprep.subr.bf16.mxu0 %v10208_v49  ;;  %5942 = vmatprep.subr.bf16.mxu1 %v10211_v50  ;;  %v10287_v49 = vld [vmem:[#allocation9 + $0x1468] ss:$16 sps:$4 sm:$0xff]   ;;  %v10292_v50 = vld [vmem:[#allocation9 + $0x1484] ss:$16 sps:$4 sm:$0xff]  }
 0x655   :  { %5861 = vmatpush1.bf16.msra.mxu0 %v10206_v51  ;;  %5943 = vmatpush1.bf16.msra.mxu1 %v10209_v52  ;;  %v10295_v51 = vld [vmem:[#allocation9 + $0x148c] ss:$16 sps:$4 sm:$0xff]   ;;  %v10290_v52 = vld [vmem:[#allocation9 + $0x1480] ss:$16 sps:$4 sm:$0xff]  }
 0x656   :  { %5862 = vmatprep.subr.bf16.mxu0 %v10214_v53  ;;  %5944 = vmatprep.subr.bf16.mxu1 %v10217_v54  ;;  %v10293_v53 = vld [vmem:[#allocation9 + $0x1488] ss:$16 sps:$4 sm:$0xff]   ;;  %v10298_v54 = vld [vmem:[#allocation9 + $0x14a4] ss:$16 sps:$4 sm:$0xff]  }
 0x659   :  { %5863 = vmatpush1.bf16.msra.mxu0 %v10212_v55  ;;  %5945 = vmatpush1.bf16.msra.mxu1 %v10215_v57  ;;  %v10301_v55 = vld [vmem:[#allocation9 + $0x14ac] ss:$16 sps:$4 sm:$0xff]   ;;  %v10296_v57 = vld [vmem:[#allocation9 + $0x14a0] ss:$16 sps:$4 sm:$0xff]  }
 0x65a   :  { %5864 = vmatprep.subr.bf16.mxu0 %v10220_v59  ;;  %5946 = vmatprep.subr.bf16.mxu1 %v10223_v60  ;;  %v10299_v59 = vld [vmem:[#allocation9 + $0x14a8] ss:$16 sps:$4 sm:$0xff]   ;;  %v10304_v60 = vld [vmem:[#allocation9 + $0x14c4] ss:$16 sps:$4 sm:$0xff]  }
 0x65d   :  { %5865 = vmatpush1.bf16.msra.mxu0 %v10218_v61  ;;  %5947 = vmatpush1.bf16.msra.mxu1 %v10221_v62  ;;  %v10307_v61 = vld [vmem:[#allocation9 + $0x14cc] ss:$16 sps:$4 sm:$0xff]   ;;  %v10302_v62 = vld [vmem:[#allocation9 + $0x14c0] ss:$16 sps:$4 sm:$0xff]  }
 0x65e   :  { %5866 = vmatprep.subr.bf16.mxu0 %v10226_v63  ;;  %5948 = vmatprep.subr.bf16.mxu1 %v10229_v0  ;;  %v10305_v63 = vld [vmem:[#allocation9 + $0x14c8] ss:$16 sps:$4 sm:$0xff]   ;;  %v10310_v0 = vld [vmem:[#allocation9 + $0x14e4] ss:$16 sps:$4 sm:$0xff]  }
 0x661   :  { %5867 = vmatpush1.bf16.msra.mxu0 %v10224_v10  ;;  %5949 = vmatpush1.bf16.msra.mxu1 %v10227_v1  ;;  %v10313_v10 = vld [vmem:[#allocation9 + $0x14ec] ss:$16 sps:$4 sm:$0xff]   ;;  %v10308_v1 = vld [vmem:[#allocation9 + $0x14e0] ss:$16 sps:$4 sm:$0xff]  }
 0x662   :  { %5868 = vmatprep.subr.bf16.mxu0 %v10232_v2  ;;  %5950 = vmatprep.subr.bf16.mxu1 %v10235_v3  ;;  %v10311_v2 = vld [vmem:[#allocation9 + $0x14e8] ss:$16 sps:$4 sm:$0xff]   ;;  %v10316_v3 = vld [vmem:[#allocation9 + $0x1504] ss:$16 sps:$4 sm:$0xff]  }
 0x665   :  { %5869 = vmatpush1.bf16.msra.mxu0 %v10230_v4  ;;  %5951 = vmatpush1.bf16.msra.mxu1 %v10233_v5  ;;  %v10319_v4 = vld [vmem:[#allocation9 + $0x150c] ss:$16 sps:$4 sm:$0xff]   ;;  %v10314_v5 = vld [vmem:[#allocation9 + $0x1500] ss:$16 sps:$4 sm:$0xff]  }
 0x666   :  { %5870 = vmatprep.subr.bf16.mxu0 %v10238_v6  ;;  %5952 = vmatprep.subr.bf16.mxu1 %v10241_v7  ;;  %v10317_v6 = vld [vmem:[#allocation9 + $0x1508] ss:$16 sps:$4 sm:$0xff]   ;;  %v10322_v7 = vld [vmem:[#allocation9 + $0x1524] ss:$16 sps:$4 sm:$0xff]  }
 0x669   :  { %5871 = vmatpush1.bf16.msra.mxu0 %v10236_v8  ;;  %5953 = vmatpush1.bf16.msra.mxu1 %v10239_v9  ;;  %v10325_v8 = vld [vmem:[#allocation9 + $0x152c] ss:$16 sps:$4 sm:$0xff]   ;;  %v10320_v9 = vld [vmem:[#allocation9 + $0x1520] ss:$16 sps:$4 sm:$0xff]  }
 0x66a   :  { %5872 = vmatprep.subr.bf16.mxu0 %v10244_v25  ;;  %5954 = vmatprep.subr.bf16.mxu1 %v10247_v11  ;;  %v10323_v25 = vld [vmem:[#allocation9 + $0x1528] ss:$16 sps:$4 sm:$0xff]   ;;  %v10328_v11 = vld [vmem:[#allocation9 + $0x1544] ss:$16 sps:$4 sm:$0xff]  }
 0x66d   :  { %5873 = vmatpush1.bf16.msra.mxu0 %v10242_v12  ;;  %5955 = vmatpush1.bf16.msra.mxu1 %v10245_v13  ;;  %v10331_v12 = vld [vmem:[#allocation9 + $0x154c] ss:$16 sps:$4 sm:$0xff]   ;;  %v10326_v13 = vld [vmem:[#allocation9 + $0x1540] ss:$16 sps:$4 sm:$0xff]  }
 0x66e   :  { %5874 = vmatprep.subr.bf16.mxu0 %v10250_v15  ;;  %5956 = vmatprep.subr.bf16.mxu1 %v10253_v16  ;;  %v10329_v15 = vld [vmem:[#allocation9 + $0x1548] ss:$16 sps:$4 sm:$0xff]   ;;  %v10334_v16 = vld [vmem:[#allocation9 + $0x1564] ss:$16 sps:$4 sm:$0xff]  }
 0x671   :  { %5875 = vmatpush1.bf16.msra.mxu0 %v10248_v17  ;;  %5957 = vmatpush1.bf16.msra.mxu1 %v10251_v32  ;;  %v10337_v17 = vld [vmem:[#allocation9 + $0x156c] ss:$16 sps:$4 sm:$0xff]   ;;  %v10332_v32 = vld [vmem:[#allocation9 + $0x1560] ss:$16 sps:$4 sm:$0xff]  }
 0x672   :  { %5876 = vmatprep.subr.bf16.mxu0 %v10256_v18  ;;  %5958 = vmatprep.subr.bf16.mxu1 %v10259_v19  ;;  %v10335_v18 = vld [vmem:[#allocation9 + $0x1568] ss:$16 sps:$4 sm:$0xff]   ;;  %v10340_v19 = vld [vmem:[#allocation9 + $0x1584] ss:$16 sps:$4 sm:$0xff]  }
 0x675   :  { %5877 = vmatpush1.bf16.msra.mxu0 %v10254_v20  ;;  %5959 = vmatpush1.bf16.msra.mxu1 %v10257_v37  ;;  %v10343_v20 = vld [vmem:[#allocation9 + $0x158c] ss:$16 sps:$4 sm:$0xff]   ;;  %v10338_v37 = vld [vmem:[#allocation9 + $0x1580] ss:$16 sps:$4 sm:$0xff]  }
 0x676   :  { %5878 = vmatprep.subr.bf16.mxu0 %v10262_v21  ;;  %5960 = vmatprep.subr.bf16.mxu1 %v10265_v22  ;;  %v10341_v21 = vld [vmem:[#allocation9 + $0x1588] ss:$16 sps:$4 sm:$0xff]   ;;  %v10344_v22 = vld [vmem:[#allocation9 + $0x15a0] ss:$16 sps:$4 sm:$0xff]  }
 0x679   :  { %5879 = vmatpush1.bf16.msra.mxu0 %v10260_v23  ;;  %5961 = vmatpush1.bf16.msra.mxu1 %v10263_v24  ;;  %v10346_v23 = vld [vmem:[#allocation9 + $0x15a4] ss:$16 sps:$4 sm:$0xff]   ;;  %v10347_v24 = vld [vmem:[#allocation9 + $0x15a8] ss:$16 sps:$4 sm:$0xff]  }
 0x67a   :  { %6803 = vmatprep.subr.bf16.mxu0 %v10268_v27  ;;  %6885 = vmatprep.subr.bf16.mxu1 %v10271_v33  ;;  %v10352_v27 = vld [vmem:[#allocation9 + $0x15c4] ss:$16 sps:$4 sm:$0xff]   ;;  %v10355_v33 = vld [vmem:[#allocation9 + $0x15cc] ss:$16 sps:$4 sm:$0xff]  }
 0x67c   :  { %5881 = vmatmul.mubr.bf16.vlgmr.msra.gmra.mrb[20].mxu0 %v5036_v36  ;;  %5963 = vmatmul.mubr.bf16.vlgmr.msra.gmra.mrb[20].mxu1 %v5036_v36  ;;  %v10358_v36 = vld [vmem:[#allocation9 + $0x15e4] ss:$16 sps:$4 sm:$0xff]  }
 0x67d   :  { %6804 = vmatpush1.bf16.msra.mxu0 %v10266_v34  ;;  %6886 = vmatpush1.bf16.msra.mxu1 %v10269_v35  ;;  %v10350_v34 = vld [vmem:[#allocation9 + $0x15c0] ss:$16 sps:$4 sm:$0xff]   ;;  %v10353_v35 = vld [vmem:[#allocation9 + $0x15c8] ss:$16 sps:$4 sm:$0xff]  }
 0x67e   :  { %6805 = vmatprep.subr.bf16.mxu0 %v10274_v38  ;;  %6887 = vmatprep.subr.bf16.mxu1 %v10277_v39  ;;  %v10361_v38 = vld [vmem:[#allocation9 + $0x15ec] ss:$16 sps:$4 sm:$0xff]   ;;  %v10356_v39 = vld [vmem:[#allocation9 + $0x15e0] ss:$16 sps:$4 sm:$0xff]  }
 0x681   :  { %6806 = vmatpush1.bf16.msra.mxu0 %v10272_v40  ;;  %6888 = vmatpush1.bf16.msra.mxu1 %v10275_v42  ;;  %v10359_v40 = vld [vmem:[#allocation9 + $0x15e8] ss:$16 sps:$4 sm:$0xff]   ;;  %v10364_v42 = vld [vmem:[#allocation9 + $0x1604] ss:$16 sps:$4 sm:$0xff]  }
 0x682   :  { %6807 = vmatprep.subr.bf16.mxu0 %v10280_v43  ;;  %6889 = vmatprep.subr.bf16.mxu1 %v10283_v44  ;;  %v10367_v43 = vld [vmem:[#allocation9 + $0x160c] ss:$16 sps:$4 sm:$0xff]  }
 0x685   :  { %6808 = vmatpush1.bf16.msra.mxu0 %v10278_v45  ;;  %6890 = vmatpush1.bf16.msra.mxu1 %v10281_v56 }
 0x686   :  { %6809 = vmatprep.subr.bf16.mxu0 %v10286_v46  ;;  %6891 = vmatprep.subr.bf16.mxu1 %v10289_v47 }
 0x689   :  { %6810 = vmatpush1.bf16.msra.mxu0 %v10284_v48  ;;  %6892 = vmatpush1.bf16.msra.mxu1 %v10287_v49 }
 0x68a   :  { %6811 = vmatprep.subr.bf16.mxu0 %v10292_v50  ;;  %6893 = vmatprep.subr.bf16.mxu1 %v10295_v51 }
 0x68d   :  { %6812 = vmatpush1.bf16.msra.mxu0 %v10290_v52  ;;  %6894 = vmatpush1.bf16.msra.mxu1 %v10293_v53 }
 0x68e   :  { %6813 = vmatprep.subr.bf16.mxu0 %v10298_v54  ;;  %6895 = vmatprep.subr.bf16.mxu1 %v10301_v55 }
 0x691   :  { %6814 = vmatpush1.bf16.msra.mxu0 %v10296_v57  ;;  %6896 = vmatpush1.bf16.msra.mxu1 %v10299_v59  ;;  %v5972_v59 = vld [vmem:[#allocation2 + $0x5] ss:$8 sm:$0xf] }
 0x692   :  { %6815 = vmatprep.subr.bf16.mxu0 %v10304_v60  ;;  %6897 = vmatprep.subr.bf16.mxu1 %v10307_v61  ;;  %v6003_v60 = vrot.slane %v10938_v14, 2 }
 0x695   :  { %6816 = vmatpush1.bf16.msra.mxu0 %v10302_v62  ;;  %6898 = vmatpush1.bf16.msra.mxu1 %v10305_v63 }
 0x696   :  { %6817 = vmatprep.subr.bf16.mxu0 %v10310_v0  ;;  %6899 = vmatprep.subr.bf16.mxu1 %v10313_v10 }
 0x699   :  { %6818 = vmatpush1.bf16.msra.mxu0 %v10308_v1  ;;  %6900 = vmatpush1.bf16.msra.mxu1 %v10311_v2  ;;  %v10362_v2 = vld [vmem:[#allocation9 + $0x1600] ss:$16 sps:$4 sm:$0xff]  }
 0x69a   :  { %6819 = vmatprep.subr.bf16.mxu0 %v10316_v3  ;;  %6901 = vmatprep.subr.bf16.mxu1 %v10319_v4  ;;  %v10365_v3 = vld [vmem:[#allocation9 + $0x1608] ss:$16 sps:$4 sm:$0xff]   ;;  %v10370_v4 = vld [vmem:[#allocation9 + $0x1624] ss:$16 sps:$4 sm:$0xff]  }
 0x69d   :  { %6820 = vmatpush1.bf16.msra.mxu0 %v10314_v5  ;;  %6902 = vmatpush1.bf16.msra.mxu1 %v10317_v6  ;;  %v10373_v5 = vld [vmem:[#allocation9 + $0x162c] ss:$16 sps:$4 sm:$0xff]  }
 0x69e   :  { %6821 = vmatprep.subr.bf16.mxu0 %v10322_v7  ;;  %6903 = vmatprep.subr.bf16.mxu1 %v10325_v8  ;;  %v10368_v7 = vld [vmem:[#allocation9 + $0x1620] ss:$16 sps:$4 sm:$0xff]   ;;  %v10371_v8 = vld [vmem:[#allocation9 + $0x1628] ss:$16 sps:$4 sm:$0xff]  }
 0x6a1   :  { %6822 = vmatpush1.bf16.msra.mxu0 %v10320_v9  ;;  %6904 = vmatpush1.bf16.msra.mxu1 %v10323_v25  ;;  %v10376_v9 = vld [vmem:[#allocation9 + $0x1644] ss:$16 sps:$4 sm:$0xff]   ;;  %v10379_v25 = vld [vmem:[#allocation9 + $0x164c] ss:$16 sps:$4 sm:$0xff]  }
 0x6a2   :  { %6823 = vmatprep.subr.bf16.mxu0 %v10328_v11  ;;  %6905 = vmatprep.subr.bf16.mxu1 %v10331_v12  ;;  %v10374_v11 = vld [vmem:[#allocation9 + $0x1640] ss:$16 sps:$4 sm:$0xff]   ;;  %v10377_v12 = vld [vmem:[#allocation9 + $0x1648] ss:$16 sps:$4 sm:$0xff]  }
 0x6a5   :  { %6824 = vmatpush1.bf16.msra.mxu0 %v10326_v13  ;;  %6906 = vmatpush1.bf16.msra.mxu1 %v10329_v15  ;;  %v10382_v13 = vld [vmem:[#allocation9 + $0x1664] ss:$16 sps:$4 sm:$0xff]   ;;  %v10385_v15 = vld [vmem:[#allocation9 + $0x166c] ss:$16 sps:$4 sm:$0xff]  }
 0x6a6   :  { %6825 = vmatprep.subr.bf16.mxu0 %v10334_v16  ;;  %6907 = vmatprep.subr.bf16.mxu1 %v10337_v17  ;;  %v10380_v16 = vld [vmem:[#allocation9 + $0x1660] ss:$16 sps:$4 sm:$0xff]   ;;  %v10383_v17 = vld [vmem:[#allocation9 + $0x1668] ss:$16 sps:$4 sm:$0xff]  }
 0x6a9   :  { %6826 = vmatpush1.bf16.msra.mxu0 %v10332_v32  ;;  %6908 = vmatpush1.bf16.msra.mxu1 %v10335_v18  ;;  %v10388_v32 = vld [vmem:[#allocation9 + $0x1684] ss:$16 sps:$4 sm:$0xff]   ;;  %v10391_v18 = vld [vmem:[#allocation9 + $0x168c] ss:$16 sps:$4 sm:$0xff]  }
 0x6aa   :  { %6827 = vmatprep.subr.bf16.mxu0 %v10340_v19  ;;  %6909 = vmatprep.subr.bf16.mxu1 %v10343_v20  ;;  %v10386_v19 = vld [vmem:[#allocation9 + $0x1680] ss:$16 sps:$4 sm:$0xff]   ;;  %v10389_v20 = vld [vmem:[#allocation9 + $0x1688] ss:$16 sps:$4 sm:$0xff]  }
 0x6ad   :  { %6828 = vmatpush1.bf16.msra.mxu0 %v10338_v37  ;;  %6910 = vmatpush1.bf16.msra.mxu1 %v10341_v21  ;;  %v10394_v37 = vld [vmem:[#allocation9 + $0x16a4] ss:$16 sps:$4 sm:$0xff]   ;;  %v10397_v21 = vld [vmem:[#allocation9 + $0x16ac] ss:$16 sps:$4 sm:$0xff]  }
 0x6ae   :  { %6829 = vmatprep.subr.bf16.mxu0 %v10346_v23  ;;  %6911 = vmatprep.subr.bf16.mxu1 %v10349_v26  ;;  %v10395_v23 = vld [vmem:[#allocation9 + $0x16a8] ss:$16 sps:$4 sm:$0xff]   ;;  %v10403_v26 = vld [vmem:[#allocation9 + $0x16cc] ss:$16 sps:$4 sm:$0xff]  }
 0x6b1   :  { %6830 = vmatpush1.bf16.msra.mxu0 %v10344_v22  ;;  %6912 = vmatpush1.bf16.msra.mxu1 %v10347_v24  ;;  %v10392_v22 = vld [vmem:[#allocation9 + $0x16a0] ss:$16 sps:$4 sm:$0xff]   ;;  %v10400_v24 = vld [vmem:[#allocation9 + $0x16c4] ss:$16 sps:$4 sm:$0xff]  }
 0x6b2   :  { %6831 = vmatprep.subr.bf16.mxu0 %v10352_v27  ;;  %6913 = vmatprep.subr.bf16.mxu1 %v10355_v33  ;;  %v10398_v27 = vld [vmem:[#allocation9 + $0x16c0] ss:$16 sps:$4 sm:$0xff]   ;;  %v10401_v33 = vld [vmem:[#allocation9 + $0x16c8] ss:$16 sps:$4 sm:$0xff]  }
 0x6b5   :  { %6832 = vmatpush1.bf16.msra.mxu0 %v10350_v34  ;;  %6914 = vmatpush1.bf16.msra.mxu1 %v10353_v35  ;;  %v10406_v34 = vld [vmem:[#allocation9 + $0x16e4] ss:$16 sps:$4 sm:$0xff]   ;;  %v10409_v35 = vld [vmem:[#allocation9 + $0x16ec] ss:$16 sps:$4 sm:$0xff]  }
 0x6b6   :  { %6833 = vmatprep.subr.bf16.mxu0 %v10358_v36  ;;  %6915 = vmatprep.subr.bf16.mxu1 %v10361_v38  ;;  %v10404_v36 = vld [vmem:[#allocation9 + $0x16e0] ss:$16 sps:$4 sm:$0xff]   ;;  %v10407_v38 = vld [vmem:[#allocation9 + $0x16e8] ss:$16 sps:$4 sm:$0xff]  }
 0x6b9   :  { %6834 = vmatpush1.bf16.msra.mxu0 %v10356_v39  ;;  %6916 = vmatpush1.bf16.msra.mxu1 %v10359_v40  ;;  %v10412_v39 = vld [vmem:[#allocation9 + $0x1704] ss:$16 sps:$4 sm:$0xff]   ;;  %v10415_v40 = vld [vmem:[#allocation9 + $0x170c] ss:$16 sps:$4 sm:$0xff]  }
 0x6ba   :  { %6844 = vmatprep.subr.bf16.mxu0 %v10364_v42  ;;  %6926 = vmatprep.subr.bf16.mxu1 %v10367_v43  ;;  %v10410_v42 = vld [vmem:[#allocation9 + $0x1700] ss:$16 sps:$4 sm:$0xff]   ;;  %v10413_v43 = vld [vmem:[#allocation9 + $0x1708] ss:$16 sps:$4 sm:$0xff]  }
 0x74f   :  { %v5882_v44 = vpop.f32.mrb[20].mxu0  ;;  %v5964_v45 = vpop.f32.mrb[20].mxu1 }
 0x750   :  { %v5884_v56 = vpop.f32.mrb[21].mxu0  ;;  %v5966_v46 = vpop.f32.mrb[21].mxu1 }
 0x751   :  { %v5977_v47 = vcombine.low %v5882_v44, %v5884_v56  ;;  %v5978_v48 = vcombine.low %v5964_v45, %v5966_v46  ;;  %v5886_v49 = vpop.f32.mrb[22].mxu0  ;;  %v5968_v50 = vpop.f32.mrb[22].mxu1  ;;  %v10418_v44 = vld [vmem:[#allocation9 + $0x1724] ss:$16 sps:$4 sm:$0xff]   ;;  %v10421_v45 = vld [vmem:[#allocation9 + $0x172c] ss:$16 sps:$4 sm:$0xff]  }
 0x752   :  { %v5887_v51 = vpop.f32.mrb[23].mxu0  ;;  %v5969_v52 = vpop.f32.mrb[23].mxu1  ;;  %v10416_v56 = vld [vmem:[#allocation9 + $0x1720] ss:$16 sps:$4 sm:$0xff]   ;;  %v10419_v46 = vld [vmem:[#allocation9 + $0x1728] ss:$16 sps:$4 sm:$0xff]  }
 0x753   :  { %v5985_v53 = vrot.slane %v5977_v47, %v10881_v58  ;;  %v5992_v54 = vrot.slane %v5978_v48, %v10881_v58  ;;  %v10424_v47 = vld [vmem:[#allocation9 + $0x1744] ss:$16 sps:$4 sm:$0xff]   ;;  %v10427_v48 = vld [vmem:[#allocation9 + $0x174c] ss:$16 sps:$4 sm:$0xff]   ;;  %v10422_v49 = vld [vmem:[#allocation9 + $0x1740] ss:$16 sps:$4 sm:$0xff]  }
 0x754   :  { %v10425_v50 = vld [vmem:[#allocation9 + $0x1748] ss:$16 sps:$4 sm:$0xff]   ;;  %v10430_v51 = vld [vmem:[#allocation9 + $0x1764] ss:$16 sps:$4 sm:$0xff]   ;;  %v10433_v52 = vld [vmem:[#allocation9 + $0x176c] ss:$16 sps:$4 sm:$0xff]  }
 0x755   :  { %v5993_v55 = vcombine.low %v5985_v53, %v5992_v54  ;;  %v10428_v53 = vld [vmem:[#allocation9 + $0x1760] ss:$16 sps:$4 sm:$0xff]   ;;  %v10431_v54 = vld [vmem:[#allocation9 + $0x1768] ss:$16 sps:$4 sm:$0xff]  }
 0x757   :  { %v6000_v57 = vrot.slane %v5993_v55, %v10881_v58  ;;  %v10436_v55 = vld [vmem:[#allocation9 + $0x1784] ss:$16 sps:$4 sm:$0xff]  }
 0x759   :  { %v10955_v61 = vadd.f32 %v6000_v57, %v5972_v59  ;;  %v10439_v57 = vld [vmem:[#allocation9 + $0x178c] ss:$16 sps:$4 sm:$0xff]   ;;  %v10434_v59 = vld [vmem:[#allocation9 + $0x1780] ss:$16 sps:$4 sm:$0xff]  }
 0x75b   :  { %v6005_v62 = vadd.f32 %v6003_v60, %v10955_v61  ;;  %v6017_v63 = vrot.slane %v10955_v61, %v10852_v28  ;;  %v6013_v0 = vrot.slane %v10955_v61, %v10855_v29  ;;  %v6025_v10 = vrot.slane %v10955_v61, %v10862_v31  ;;  %v10437_v60 = vld [vmem:[#allocation9 + $0x1788] ss:$16 sps:$4 sm:$0xff]  }
 0x75d   :  { %6007 = vst.msk [vmem:[#allocation11 + $0x5] ss:$8 sm:$0x3] %vm10857_vm0, %v6005_v62  ;;  %v6031_v1 = vpack.c.bf16 %v6017_v63, %v6017_v63  ;;  %v6030_v14 = vpack.c.bf16 %v6013_v0, %v6013_v0  ;;  %v6033_v6 = vpack.c.bf16 %v6025_v10, %v6025_v10  ;;  %v10442_v62 = vld [vmem:[#allocation9 + $0x17a4] ss:$16 sps:$4 sm:$0xff]  }
 0x75e   :  { %v10445_v63 = vld [vmem:[#allocation9 + $0x17ac] ss:$16 sps:$4 sm:$0xff]   ;;  %v10440_v0 = vld [vmem:[#allocation9 + $0x17a0] ss:$16 sps:$4 sm:$0xff]   ;;  %v10443_v10 = vld [vmem:[#allocation9 + $0x17a8] ss:$16 sps:$4 sm:$0xff]  }
 0x75f   :  { %6835 = vmatprep.mubr.bf16.mxu0 %v6031_v1  ;;  %6917 = vmatprep.mubr.bf16.mxu1 %v6031_v1  ;;  %v10448_v1 = vld [vmem:[#allocation9 + $0x17c4] ss:$16 sps:$4 sm:$0xff]  }
 0x760   :  { %6836 = vmatmul.mubr.bf16.vlgmr.msra.gmra.mrb[24].mxu0 %v6030_v14  ;;  %6918 = vmatmul.mubr.bf16.vlgmr.msra.gmra.mrb[24].mxu1 %v6030_v14  ;;  %v10449_v14 = vld [vmem:[#allocation9 + $0x17c8] ss:$16 sps:$4 sm:$0xff]  }
 0x761   :  { %6845 = vmatpush1.bf16.msra.mxu0 %v10362_v2  ;;  %6927 = vmatpush1.bf16.msra.mxu1 %v10365_v3  ;;  %v10451_v2 = vld [vmem:[#allocation9 + $0x17cc] ss:$16 sps:$4 sm:$0xff]   ;;  %v10446_v3 = vld [vmem:[#allocation9 + $0x17c0] ss:$16 sps:$4 sm:$0xff]  }
 0x762   :  { %6876 = vmatprep.mubr.bf16.mxu0 %v6033_v6  ;;  %6958 = vmatprep.mubr.bf16.mxu1 %v6033_v6  ;;  %v10452_v6 = vld [vmem:[#allocation9 + $0x17e0] ss:$16 sps:$4 sm:$0xff]  }
 0x763   :  { %6846 = vmatprep.subr.bf16.mxu0 %v10370_v4  ;;  %6928 = vmatprep.subr.bf16.mxu1 %v10373_v5  ;;  %v10454_v4 = vld [vmem:[#allocation9 + $0x17e4] ss:$16 sps:$4 sm:$0xff]   ;;  %v10457_v5 = vld [vmem:[#allocation9 + $0x17ec] ss:$16 sps:$4 sm:$0xff]  }
 0x765   :  { %6847 = vmatpush1.bf16.msra.mxu0 %v10368_v7  ;;  %6929 = vmatpush1.bf16.msra.mxu1 %v10371_v8  ;;  %v10455_v7 = vld [vmem:[#allocation9 + $0x17e8] ss:$16 sps:$4 sm:$0xff]   ;;  %v6021_v8 = vrot.slane %v10955_v61, %v10876_v41 }
 0x766   :  { %6848 = vmatprep.subr.bf16.mxu0 %v10376_v9  ;;  %6930 = vmatprep.subr.bf16.mxu1 %v10379_v25  ;;  %v10460_v9 = vld [vmem:[#allocation9 + $0x1804] ss:$16 sps:$4 sm:$0xff]   ;;  %v10463_v25 = vld [vmem:[#allocation9 + $0x180c] ss:$16 sps:$4 sm:$0xff]  }
 0x769   :  { %6849 = vmatpush1.bf16.msra.mxu0 %v10374_v11  ;;  %6931 = vmatpush1.bf16.msra.mxu1 %v10377_v12  ;;  %v10458_v11 = vld [vmem:[#allocation9 + $0x1800] ss:$16 sps:$4 sm:$0xff]   ;;  %v10461_v12 = vld [vmem:[#allocation9 + $0x1808] ss:$16 sps:$4 sm:$0xff]  }
 0x76a   :  { %6850 = vmatprep.subr.bf16.mxu0 %v10382_v13  ;;  %6932 = vmatprep.subr.bf16.mxu1 %v10385_v15  ;;  %v6032_v13 = vpack.c.bf16 %v6021_v8, %v6021_v8  ;;  %v10466_v15 = vld [vmem:[#allocation9 + $0x1824] ss:$16 sps:$4 sm:$0xff]   ;;  %v10541_v8 = vld [vmem:[#allocation9 + $0x19ac] ss:$16 sps:$4 sm:$0xff]  }
 0x76d   :  { %6851 = vmatpush1.bf16.msra.mxu0 %v10380_v16  ;;  %6933 = vmatpush1.bf16.msra.mxu1 %v10383_v17  ;;  %v10469_v16 = vld [vmem:[#allocation9 + $0x182c] ss:$16 sps:$4 sm:$0xff]   ;;  %v10464_v17 = vld [vmem:[#allocation9 + $0x1820] ss:$16 sps:$4 sm:$0xff]  }
 0x76e   :  { %6852 = vmatprep.subr.bf16.mxu0 %v10388_v32  ;;  %6934 = vmatprep.subr.bf16.mxu1 %v10391_v18  ;;  %v10467_v32 = vld [vmem:[#allocation9 + $0x1828] ss:$16 sps:$4 sm:$0xff]   ;;  %v10472_v18 = vld [vmem:[#allocation9 + $0x1844] ss:$16 sps:$4 sm:$0xff]  }
 0x771   :  { %6853 = vmatpush1.bf16.msra.mxu0 %v10386_v19  ;;  %6935 = vmatpush1.bf16.msra.mxu1 %v10389_v20  ;;  %v10475_v19 = vld [vmem:[#allocation9 + $0x184c] ss:$16 sps:$4 sm:$0xff]   ;;  %v10470_v20 = vld [vmem:[#allocation9 + $0x1840] ss:$16 sps:$4 sm:$0xff]  }
 0x772   :  { %6854 = vmatprep.subr.bf16.mxu0 %v10394_v37  ;;  %6936 = vmatprep.subr.bf16.mxu1 %v10397_v21  ;;  %v10473_v37 = vld [vmem:[#allocation9 + $0x1848] ss:$16 sps:$4 sm:$0xff]   ;;  %v10478_v21 = vld [vmem:[#allocation9 + $0x1864] ss:$16 sps:$4 sm:$0xff]  }
 0x775   :  { %6855 = vmatpush1.bf16.msra.mxu0 %v10392_v22  ;;  %6937 = vmatpush1.bf16.msra.mxu1 %v10395_v23  ;;  %v10481_v22 = vld [vmem:[#allocation9 + $0x186c] ss:$16 sps:$4 sm:$0xff]   ;;  %v10476_v23 = vld [vmem:[#allocation9 + $0x1860] ss:$16 sps:$4 sm:$0xff]  }
 0x776   :  { %6856 = vmatprep.subr.bf16.mxu0 %v10400_v24  ;;  %6938 = vmatprep.subr.bf16.mxu1 %v10403_v26  ;;  %v10479_v24 = vld [vmem:[#allocation9 + $0x1868] ss:$16 sps:$4 sm:$0xff]   ;;  %v10484_v26 = vld [vmem:[#allocation9 + $0x1884] ss:$16 sps:$4 sm:$0xff]  }
 0x779   :  { %6857 = vmatpush1.bf16.msra.mxu0 %v10398_v27  ;;  %6939 = vmatpush1.bf16.msra.mxu1 %v10401_v33  ;;  %v10487_v27 = vld [vmem:[#allocation9 + $0x188c] ss:$16 sps:$4 sm:$0xff]   ;;  %v10482_v33 = vld [vmem:[#allocation9 + $0x1880] ss:$16 sps:$4 sm:$0xff]  }
 0x77a   :  { %6858 = vmatprep.subr.bf16.mxu0 %v10406_v34  ;;  %6940 = vmatprep.subr.bf16.mxu1 %v10409_v35  ;;  %v10485_v34 = vld [vmem:[#allocation9 + $0x1888] ss:$16 sps:$4 sm:$0xff]   ;;  %v10490_v35 = vld [vmem:[#allocation9 + $0x18a4] ss:$16 sps:$4 sm:$0xff]  }
 0x77d   :  { %6859 = vmatpush1.bf16.msra.mxu0 %v10404_v36  ;;  %6941 = vmatpush1.bf16.msra.mxu1 %v10407_v38  ;;  %v10493_v36 = vld [vmem:[#allocation9 + $0x18ac] ss:$16 sps:$4 sm:$0xff]   ;;  %v10488_v38 = vld [vmem:[#allocation9 + $0x18a0] ss:$16 sps:$4 sm:$0xff]  }
 0x77e   :  { %6860 = vmatprep.subr.bf16.mxu0 %v10412_v39  ;;  %6942 = vmatprep.subr.bf16.mxu1 %v10415_v40  ;;  %v10491_v39 = vld [vmem:[#allocation9 + $0x18a8] ss:$16 sps:$4 sm:$0xff]   ;;  %v10496_v40 = vld [vmem:[#allocation9 + $0x18c4] ss:$16 sps:$4 sm:$0xff]  }
 0x781   :  { %6861 = vmatpush1.bf16.msra.mxu0 %v10410_v42  ;;  %6943 = vmatpush1.bf16.msra.mxu1 %v10413_v43  ;;  %v10499_v42 = vld [vmem:[#allocation9 + $0x18cc] ss:$16 sps:$4 sm:$0xff]   ;;  %v10494_v43 = vld [vmem:[#allocation9 + $0x18c0] ss:$16 sps:$4 sm:$0xff]  }
 0x782   :  { %6862 = vmatprep.subr.bf16.mxu0 %v10418_v44  ;;  %6944 = vmatprep.subr.bf16.mxu1 %v10421_v45  ;;  %v10497_v44 = vld [vmem:[#allocation9 + $0x18c8] ss:$16 sps:$4 sm:$0xff]   ;;  %v10502_v45 = vld [vmem:[#allocation9 + $0x18e4] ss:$16 sps:$4 sm:$0xff]  }
 0x785   :  { %6863 = vmatpush1.bf16.msra.mxu0 %v10416_v56  ;;  %6945 = vmatpush1.bf16.msra.mxu1 %v10419_v46  ;;  %v10505_v56 = vld [vmem:[#allocation9 + $0x18ec] ss:$16 sps:$4 sm:$0xff]   ;;  %v10500_v46 = vld [vmem:[#allocation9 + $0x18e0] ss:$16 sps:$4 sm:$0xff]  }
 0x786   :  { %6864 = vmatprep.subr.bf16.mxu0 %v10424_v47  ;;  %6946 = vmatprep.subr.bf16.mxu1 %v10427_v48  ;;  %v10503_v47 = vld [vmem:[#allocation9 + $0x18e8] ss:$16 sps:$4 sm:$0xff]   ;;  %v10508_v48 = vld [vmem:[#allocation9 + $0x1904] ss:$16 sps:$4 sm:$0xff]  }
 0x789   :  { %6865 = vmatpush1.bf16.msra.mxu0 %v10422_v49  ;;  %6947 = vmatpush1.bf16.msra.mxu1 %v10425_v50  ;;  %v10511_v49 = vld [vmem:[#allocation9 + $0x190c] ss:$16 sps:$4 sm:$0xff]   ;;  %v10506_v50 = vld [vmem:[#allocation9 + $0x1900] ss:$16 sps:$4 sm:$0xff]  }
 0x78a   :  { %6866 = vmatprep.subr.bf16.mxu0 %v10430_v51  ;;  %6948 = vmatprep.subr.bf16.mxu1 %v10433_v52  ;;  %v10509_v51 = vld [vmem:[#allocation9 + $0x1908] ss:$16 sps:$4 sm:$0xff]   ;;  %v10514_v52 = vld [vmem:[#allocation9 + $0x1924] ss:$16 sps:$4 sm:$0xff]  }
 0x78d   :  { %6867 = vmatpush1.bf16.msra.mxu0 %v10428_v53  ;;  %6949 = vmatpush1.bf16.msra.mxu1 %v10431_v54  ;;  %v10517_v53 = vld [vmem:[#allocation9 + $0x192c] ss:$16 sps:$4 sm:$0xff]   ;;  %v10512_v54 = vld [vmem:[#allocation9 + $0x1920] ss:$16 sps:$4 sm:$0xff]  }
 0x78e   :  { %6868 = vmatprep.subr.bf16.mxu0 %v10436_v55  ;;  %6950 = vmatprep.subr.bf16.mxu1 %v10439_v57  ;;  %v10515_v55 = vld [vmem:[#allocation9 + $0x1928] ss:$16 sps:$4 sm:$0xff]   ;;  %v10520_v57 = vld [vmem:[#allocation9 + $0x1944] ss:$16 sps:$4 sm:$0xff]  }
 0x791   :  { %6869 = vmatpush1.bf16.msra.mxu0 %v10434_v59  ;;  %6951 = vmatpush1.bf16.msra.mxu1 %v10437_v60  ;;  %v10523_v59 = vld [vmem:[#allocation9 + $0x194c] ss:$16 sps:$4 sm:$0xff]   ;;  %v10518_v60 = vld [vmem:[#allocation9 + $0x1940] ss:$16 sps:$4 sm:$0xff]  }
 0x792   :  { %6870 = vmatprep.subr.bf16.mxu0 %v10442_v62  ;;  %6952 = vmatprep.subr.bf16.mxu1 %v10445_v63  ;;  %v10521_v62 = vld [vmem:[#allocation9 + $0x1948] ss:$16 sps:$4 sm:$0xff]   ;;  %v10526_v63 = vld [vmem:[#allocation9 + $0x1964] ss:$16 sps:$4 sm:$0xff]  }
 0x795   :  { %6871 = vmatpush1.bf16.msra.mxu0 %v10440_v0  ;;  %6953 = vmatpush1.bf16.msra.mxu1 %v10443_v10  ;;  %v10529_v0 = vld [vmem:[#allocation9 + $0x196c] ss:$16 sps:$4 sm:$0xff]   ;;  %v10524_v10 = vld [vmem:[#allocation9 + $0x1960] ss:$16 sps:$4 sm:$0xff]  }
 0x796   :  { %6872 = vmatprep.subr.bf16.mxu0 %v10448_v1  ;;  %6954 = vmatprep.subr.bf16.mxu1 %v10451_v2  ;;  %v10527_v1 = vld [vmem:[#allocation9 + $0x1968] ss:$16 sps:$4 sm:$0xff]   ;;  %v10530_v2 = vld [vmem:[#allocation9 + $0x1980] ss:$16 sps:$4 sm:$0xff]  }
 0x799   :  { %6873 = vmatpush1.bf16.msra.mxu0 %v10446_v3  ;;  %6955 = vmatpush1.bf16.msra.mxu1 %v10449_v14  ;;  %v10532_v3 = vld [vmem:[#allocation9 + $0x1984] ss:$16 sps:$4 sm:$0xff]   ;;  %v10533_v14 = vld [vmem:[#allocation9 + $0x1988] ss:$16 sps:$4 sm:$0xff]  }
 0x79a   :  { %6874 = vmatprep.subr.bf16.mxu0 %v10454_v4  ;;  %6956 = vmatprep.subr.bf16.mxu1 %v10457_v5  ;;  %v10535_v4 = vld [vmem:[#allocation9 + $0x198c] ss:$16 sps:$4 sm:$0xff]   ;;  %v10536_v5 = vld [vmem:[#allocation9 + $0x19a0] ss:$16 sps:$4 sm:$0xff]  }
 0x79d   :  { %6875 = vmatpush1.bf16.msra.mxu0 %v10452_v6  ;;  %6957 = vmatpush1.bf16.msra.mxu1 %v10455_v7  ;;  %v10538_v6 = vld [vmem:[#allocation9 + $0x19a4] ss:$16 sps:$4 sm:$0xff]   ;;  %v10539_v7 = vld [vmem:[#allocation9 + $0x19a8] ss:$16 sps:$4 sm:$0xff]  }
 0x79e   :  { %7799 = vmatprep.subr.bf16.mxu0 %v10460_v9  ;;  %7881 = vmatprep.subr.bf16.mxu1 %v10463_v25  ;;  %v10544_v9 = vld [vmem:[#allocation9 + $0x19c4] ss:$16 sps:$4 sm:$0xff]   ;;  %v10547_v25 = vld [vmem:[#allocation9 + $0x19cc] ss:$16 sps:$4 sm:$0xff]  }
 0x7a0   :  { %6877 = vmatmul.mubr.bf16.vlgmr.msra.gmra.mrb[24].mxu0 %v6032_v13  ;;  %6959 = vmatmul.mubr.bf16.vlgmr.msra.gmra.mrb[24].mxu1 %v6032_v13  ;;  %v10550_v13 = vld [vmem:[#allocation9 + $0x19e4] ss:$16 sps:$4 sm:$0xff]  }
 0x7a1   :  { %7800 = vmatpush1.bf16.msra.mxu0 %v10458_v11  ;;  %7882 = vmatpush1.bf16.msra.mxu1 %v10461_v12  ;;  %v10542_v11 = vld [vmem:[#allocation9 + $0x19c0] ss:$16 sps:$4 sm:$0xff]   ;;  %v10545_v12 = vld [vmem:[#allocation9 + $0x19c8] ss:$16 sps:$4 sm:$0xff]  }
 0x7a2   :  { %7801 = vmatprep.subr.bf16.mxu0 %v10466_v15  ;;  %7883 = vmatprep.subr.bf16.mxu1 %v10469_v16  ;;  %v10553_v15 = vld [vmem:[#allocation9 + $0x19ec] ss:$16 sps:$4 sm:$0xff]   ;;  %v10548_v16 = vld [vmem:[#allocation9 + $0x19e0] ss:$16 sps:$4 sm:$0xff]  }
 0x7a5   :  { %7802 = vmatpush1.bf16.msra.mxu0 %v10464_v17  ;;  %7884 = vmatpush1.bf16.msra.mxu1 %v10467_v32  ;;  %v10551_v17 = vld [vmem:[#allocation9 + $0x19e8] ss:$16 sps:$4 sm:$0xff]   ;;  %v10556_v32 = vld [vmem:[#allocation9 + $0x1a04] ss:$16 sps:$4 sm:$0xff]  }
 0x7a6   :  { %7803 = vmatprep.subr.bf16.mxu0 %v10472_v18  ;;  %7885 = vmatprep.subr.bf16.mxu1 %v10475_v19  ;;  %v10559_v18 = vld [vmem:[#allocation9 + $0x1a0c] ss:$16 sps:$4 sm:$0xff]  }
 0x7a9   :  { %7804 = vmatpush1.bf16.msra.mxu0 %v10470_v20  ;;  %7886 = vmatpush1.bf16.msra.mxu1 %v10473_v37 }
 0x7aa   :  { %7805 = vmatprep.subr.bf16.mxu0 %v10478_v21  ;;  %7887 = vmatprep.subr.bf16.mxu1 %v10481_v22 }
 0x7ad   :  { %7806 = vmatpush1.bf16.msra.mxu0 %v10476_v23  ;;  %7888 = vmatpush1.bf16.msra.mxu1 %v10479_v24 }
 0x7ae   :  { %7807 = vmatprep.subr.bf16.mxu0 %v10484_v26  ;;  %7889 = vmatprep.subr.bf16.mxu1 %v10487_v27 }
 0x7b1   :  { %7808 = vmatpush1.bf16.msra.mxu0 %v10482_v33  ;;  %7890 = vmatpush1.bf16.msra.mxu1 %v10485_v34 }
 0x7b2   :  { %7809 = vmatprep.subr.bf16.mxu0 %v10490_v35  ;;  %7891 = vmatprep.subr.bf16.mxu1 %v10493_v36 }
 0x7b5   :  { %7810 = vmatpush1.bf16.msra.mxu0 %v10488_v38  ;;  %7892 = vmatpush1.bf16.msra.mxu1 %v10491_v39  ;;  %v6968_v39 = vld [vmem:[#allocation2 + $0x6] ss:$8 sm:$0xf] }
 0x7b6   :  { %7811 = vmatprep.subr.bf16.mxu0 %v10496_v40  ;;  %7893 = vmatprep.subr.bf16.mxu1 %v10499_v42  ;;  %v6999_v40 = vrot.slane %v10955_v61, 2 }
 0x7b9   :  { %7812 = vmatpush1.bf16.msra.mxu0 %v10494_v43  ;;  %7894 = vmatpush1.bf16.msra.mxu1 %v10497_v44 }
 0x7ba   :  { %7813 = vmatprep.subr.bf16.mxu0 %v10502_v45  ;;  %7895 = vmatprep.subr.bf16.mxu1 %v10505_v56 }
 0x7bd   :  { %7814 = vmatpush1.bf16.msra.mxu0 %v10500_v46  ;;  %7896 = vmatpush1.bf16.msra.mxu1 %v10503_v47  ;;  %v10554_v47 = vld [vmem:[#allocation9 + $0x1a00] ss:$16 sps:$4 sm:$0xff]  }
 0x7be   :  { %7815 = vmatprep.subr.bf16.mxu0 %v10508_v48  ;;  %7897 = vmatprep.subr.bf16.mxu1 %v10511_v49  ;;  %v10557_v48 = vld [vmem:[#allocation9 + $0x1a08] ss:$16 sps:$4 sm:$0xff]   ;;  %v10562_v49 = vld [vmem:[#allocation9 + $0x1a24] ss:$16 sps:$4 sm:$0xff]  }
 0x7c1   :  { %7816 = vmatpush1.bf16.msra.mxu0 %v10506_v50  ;;  %7898 = vmatpush1.bf16.msra.mxu1 %v10509_v51  ;;  %v10565_v50 = vld [vmem:[#allocation9 + $0x1a2c] ss:$16 sps:$4 sm:$0xff]   ;;  %v10563_v51 = vld [vmem:[#allocation9 + $0x1a28] ss:$16 sps:$4 sm:$0xff]  }
 0x7c2   :  { %7817 = vmatprep.subr.bf16.mxu0 %v10514_v52  ;;  %7899 = vmatprep.subr.bf16.mxu1 %v10517_v53  ;;  %v10571_v52 = vld [vmem:[#allocation9 + $0x1a4c] ss:$16 sps:$4 sm:$0xff]   ;;  %v10566_v53 = vld [vmem:[#allocation9 + $0x1a40] ss:$16 sps:$4 sm:$0xff]  }
 0x7c5   :  { %7818 = vmatpush1.bf16.msra.mxu0 %v10512_v54  ;;  %7900 = vmatpush1.bf16.msra.mxu1 %v10515_v55  ;;  %v10569_v54 = vld [vmem:[#allocation9 + $0x1a48] ss:$16 sps:$4 sm:$0xff]   ;;  %v10574_v55 = vld [vmem:[#allocation9 + $0x1a64] ss:$16 sps:$4 sm:$0xff]  }
 0x7c6   :  { %7819 = vmatprep.subr.bf16.mxu0 %v10520_v57  ;;  %7901 = vmatprep.subr.bf16.mxu1 %v10523_v59  ;;  %v10577_v57 = vld [vmem:[#allocation9 + $0x1a6c] ss:$16 sps:$4 sm:$0xff]   ;;  %v10572_v59 = vld [vmem:[#allocation9 + $0x1a60] ss:$16 sps:$4 sm:$0xff]  }
 0x7c9   :  { %7820 = vmatpush1.bf16.msra.mxu0 %v10518_v60  ;;  %7902 = vmatpush1.bf16.msra.mxu1 %v10521_v62  ;;  %v10575_v60 = vld [vmem:[#allocation9 + $0x1a68] ss:$16 sps:$4 sm:$0xff]   ;;  %v10580_v62 = vld [vmem:[#allocation9 + $0x1a84] ss:$16 sps:$4 sm:$0xff]  }
 0x7ca   :  { %7821 = vmatprep.subr.bf16.mxu0 %v10526_v63  ;;  %7903 = vmatprep.subr.bf16.mxu1 %v10529_v0  ;;  %v10583_v63 = vld [vmem:[#allocation9 + $0x1a8c] ss:$16 sps:$4 sm:$0xff]   ;;  %v10578_v0 = vld [vmem:[#allocation9 + $0x1a80] ss:$16 sps:$4 sm:$0xff]  }
 0x7cd   :  { %7822 = vmatpush1.bf16.msra.mxu0 %v10524_v10  ;;  %7904 = vmatpush1.bf16.msra.mxu1 %v10527_v1  ;;  %v10581_v10 = vld [vmem:[#allocation9 + $0x1a88] ss:$16 sps:$4 sm:$0xff]   ;;  %v10586_v1 = vld [vmem:[#allocation9 + $0x1aa4] ss:$16 sps:$4 sm:$0xff]  }
 0x7ce   :  { %7823 = vmatprep.subr.bf16.mxu0 %v10532_v3  ;;  %7905 = vmatprep.subr.bf16.mxu1 %v10535_v4  ;;  %v10584_v3 = vld [vmem:[#allocation9 + $0x1aa0] ss:$16 sps:$4 sm:$0xff]   ;;  %v10592_v4 = vld [vmem:[#allocation9 + $0x1ac4] ss:$16 sps:$4 sm:$0xff]  }
 0x7d1   :  { %7824 = vmatpush1.bf16.msra.mxu0 %v10530_v2  ;;  %7906 = vmatpush1.bf16.msra.mxu1 %v10533_v14  ;;  %v10589_v2 = vld [vmem:[#allocation9 + $0x1aac] ss:$16 sps:$4 sm:$0xff]   ;;  %v10587_v14 = vld [vmem:[#allocation9 + $0x1aa8] ss:$16 sps:$4 sm:$0xff]  }
 0x7d2   :  { %7825 = vmatprep.subr.bf16.mxu0 %v10538_v6  ;;  %7907 = vmatprep.subr.bf16.mxu1 %v10541_v8  ;;  %v10590_v6 = vld [vmem:[#allocation9 + $0x1ac0] ss:$16 sps:$4 sm:$0xff]   ;;  %v10598_v8 = vld [vmem:[#allocation9 + $0x1ae4] ss:$16 sps:$4 sm:$0xff]  }
 0x7d5   :  { %7826 = vmatpush1.bf16.msra.mxu0 %v10536_v5  ;;  %7908 = vmatpush1.bf16.msra.mxu1 %v10539_v7  ;;  %v10595_v5 = vld [vmem:[#allocation9 + $0x1acc] ss:$16 sps:$4 sm:$0xff]   ;;  %v10593_v7 = vld [vmem:[#allocation9 + $0x1ac8] ss:$16 sps:$4 sm:$0xff]  }
 0x7d6   :  { %7827 = vmatprep.subr.bf16.mxu0 %v10544_v9  ;;  %7909 = vmatprep.subr.bf16.mxu1 %v10547_v25  ;;  %v10601_v9 = vld [vmem:[#allocation9 + $0x1aec] ss:$16 sps:$4 sm:$0xff]   ;;  %v10596_v25 = vld [vmem:[#allocation9 + $0x1ae0] ss:$16 sps:$4 sm:$0xff]  }
 0x7d9   :  { %7828 = vmatpush1.bf16.msra.mxu0 %v10542_v11  ;;  %7910 = vmatpush1.bf16.msra.mxu1 %v10545_v12  ;;  %v10599_v11 = vld [vmem:[#allocation9 + $0x1ae8] ss:$16 sps:$4 sm:$0xff]   ;;  %v10604_v12 = vld [vmem:[#allocation9 + $0x1b04] ss:$16 sps:$4 sm:$0xff]  }
 0x7da   :  { %7829 = vmatprep.subr.bf16.mxu0 %v10550_v13  ;;  %7911 = vmatprep.subr.bf16.mxu1 %v10553_v15  ;;  %v10607_v13 = vld [vmem:[#allocation9 + $0x1b0c] ss:$16 sps:$4 sm:$0xff]   ;;  %v10602_v15 = vld [vmem:[#allocation9 + $0x1b00] ss:$16 sps:$4 sm:$0xff]  }
 0x7dd   :  { %7830 = vmatpush1.bf16.msra.mxu0 %v10548_v16  ;;  %7912 = vmatpush1.bf16.msra.mxu1 %v10551_v17  ;;  %v10605_v16 = vld [vmem:[#allocation9 + $0x1b08] ss:$16 sps:$4 sm:$0xff]   ;;  %v10610_v17 = vld [vmem:[#allocation9 + $0x1b24] ss:$16 sps:$4 sm:$0xff]  }
 0x7de   :  { %7840 = vmatprep.subr.bf16.mxu0 %v10556_v32  ;;  %7922 = vmatprep.subr.bf16.mxu1 %v10559_v18  ;;  %v10613_v32 = vld [vmem:[#allocation9 + $0x1b2c] ss:$16 sps:$4 sm:$0xff]   ;;  %v10608_v18 = vld [vmem:[#allocation9 + $0x1b20] ss:$16 sps:$4 sm:$0xff]  }
 0x873   :  { %v6878_v19 = vpop.f32.mrb[24].mxu0  ;;  %v6960_v20 = vpop.f32.mrb[24].mxu1 }
 0x874   :  { %v6880_v37 = vpop.f32.mrb[25].mxu0  ;;  %v6962_v21 = vpop.f32.mrb[25].mxu1 }
 0x875   :  { %v6973_v22 = vcombine.low %v6878_v19, %v6880_v37  ;;  %v6974_v23 = vcombine.low %v6960_v20, %v6962_v21  ;;  %v6882_v24 = vpop.f32.mrb[26].mxu0  ;;  %v6964_v26 = vpop.f32.mrb[26].mxu1  ;;  %v10611_v19 = vld [vmem:[#allocation9 + $0x1b28] ss:$16 sps:$4 sm:$0xff]   ;;  %v10616_v20 = vld [vmem:[#allocation9 + $0x1b44] ss:$16 sps:$4 sm:$0xff]  }
 0x876   :  { %v6883_v27 = vpop.f32.mrb[27].mxu0  ;;  %v6965_v33 = vpop.f32.mrb[27].mxu1  ;;  %v10619_v37 = vld [vmem:[#allocation9 + $0x1b4c] ss:$16 sps:$4 sm:$0xff]   ;;  %v10614_v21 = vld [vmem:[#allocation9 + $0x1b40] ss:$16 sps:$4 sm:$0xff]  }
 0x877   :  { %v6981_v34 = vrot.slane %v6973_v22, %v10881_v58  ;;  %v6988_v35 = vrot.slane %v6974_v23, %v10881_v58  ;;  %v10617_v22 = vld [vmem:[#allocation9 + $0x1b48] ss:$16 sps:$4 sm:$0xff]   ;;  %v10622_v23 = vld [vmem:[#allocation9 + $0x1b64] ss:$16 sps:$4 sm:$0xff]   ;;  %v10625_v24 = vld [vmem:[#allocation9 + $0x1b6c] ss:$16 sps:$4 sm:$0xff]  }
 0x878   :  { %v10620_v26 = vld [vmem:[#allocation9 + $0x1b60] ss:$16 sps:$4 sm:$0xff]   ;;  %v10623_v27 = vld [vmem:[#allocation9 + $0x1b68] ss:$16 sps:$4 sm:$0xff]   ;;  %v10628_v33 = vld [vmem:[#allocation9 + $0x1b84] ss:$16 sps:$4 sm:$0xff]  }
 0x879   :  { %v6989_v36 = vcombine.low %v6981_v34, %v6988_v35  ;;  %v10631_v34 = vld [vmem:[#allocation9 + $0x1b8c] ss:$16 sps:$4 sm:$0xff]   ;;  %v10626_v35 = vld [vmem:[#allocation9 + $0x1b80] ss:$16 sps:$4 sm:$0xff]  }
 0x87b   :  { %v6996_v38 = vrot.slane %v6989_v36, %v10881_v58  ;;  %v10629_v36 = vld [vmem:[#allocation9 + $0x1b88] ss:$16 sps:$4 sm:$0xff]  }
 0x87d   :  { %v10972_v42 = vadd.f32 %v6996_v38, %v6968_v39  ;;  %v10634_v38 = vld [vmem:[#allocation9 + $0x1ba4] ss:$16 sps:$4 sm:$0xff]   ;;  %v10637_v39 = vld [vmem:[#allocation9 + $0x1bac] ss:$16 sps:$4 sm:$0xff]  }
 0x87f   :  { %v7001_v43 = vadd.f32 %v6999_v40, %v10972_v42  ;;  %v7013_v44 = vrot.slane %v10972_v42, %v10852_v28  ;;  %v7009_v45 = vrot.slane %v10972_v42, %v10855_v29  ;;  %v7021_v56 = vrot.slane %v10972_v42, %v10862_v31  ;;  %v10560_v29 = vld [vmem:[#allocation9 + $0x1a20] ss:$16 sps:$4 sm:$0xff]   ;;  %v10568_v31 = vld [vmem:[#allocation9 + $0x1a44] ss:$16 sps:$4 sm:$0xff]  }
 0x880   :  { %v10632_v40 = vld [vmem:[#allocation9 + $0x1ba0] ss:$16 sps:$4 sm:$0xff]  }
 0x881   :  { %7003 = vst.msk [vmem:[#allocation11 + $0x6] ss:$8 sm:$0x3] %vm10857_vm0, %v7001_v43  ;;  %v7027_v46 = vpack.c.bf16 %v7013_v44, %v7013_v44  ;;  %v7026_v61 = vpack.c.bf16 %v7009_v45, %v7009_v45  ;;  %v7029_v28 = vpack.c.bf16 %v7021_v56, %v7021_v56  ;;  %v10635_v43 = vld [vmem:[#allocation9 + $0x1ba8] ss:$16 sps:$4 sm:$0xff]  }
 0x882   :  { %v10640_v44 = vld [vmem:[#allocation9 + $0x1bc4] ss:$16 sps:$4 sm:$0xff]   ;;  %v10643_v45 = vld [vmem:[#allocation9 + $0x1bcc] ss:$16 sps:$4 sm:$0xff]   ;;  %v10638_v56 = vld [vmem:[#allocation9 + $0x1bc0] ss:$16 sps:$4 sm:$0xff]  }
 0x883   :  { %7831 = vmatprep.mubr.bf16.mxu0 %v7027_v46  ;;  %7913 = vmatprep.mubr.bf16.mxu1 %v7027_v46  ;;  %v10641_v46 = vld [vmem:[#allocation9 + $0x1bc8] ss:$16 sps:$4 sm:$0xff]  }
 0x884   :  { %7832 = vmatmul.mubr.bf16.vlgmr.msra.gmra.mrb[28].mxu0 %v7026_v61  ;;  %7914 = vmatmul.mubr.bf16.vlgmr.msra.gmra.mrb[28].mxu1 %v7026_v61  ;;  %v10644_v61 = vld [vmem:[#allocation9 + $0x1be0] ss:$16 sps:$4 sm:$0xff]  }
 0x885   :  { %7841 = vmatpush1.bf16.msra.mxu0 %v10554_v47  ;;  %7923 = vmatpush1.bf16.msra.mxu1 %v10557_v48  ;;  %v10646_v47 = vld [vmem:[#allocation9 + $0x1be4] ss:$16 sps:$4 sm:$0xff]   ;;  %v10649_v48 = vld [vmem:[#allocation9 + $0x1bec] ss:$16 sps:$4 sm:$0xff]  }
 0x886   :  { %7872 = vmatprep.mubr.bf16.mxu0 %v7029_v28  ;;  %7954 = vmatprep.mubr.bf16.mxu1 %v7029_v28 }
 0x887   :  { %7842 = vmatprep.subr.bf16.mxu0 %v10562_v49  ;;  %7924 = vmatprep.subr.bf16.mxu1 %v10565_v50  ;;  %v10647_v49 = vld [vmem:[#allocation9 + $0x1be8] ss:$16 sps:$4 sm:$0xff]   ;;  %v7017_v50 = vrot.slane %v10972_v42, %v10876_v41 }
 0x889   :  { %7843 = vmatpush1.bf16.msra.mxu0 %v10560_v29  ;;  %7925 = vmatpush1.bf16.msra.mxu1 %v10563_v51  ;;  %v7028_v28 = vpack.c.bf16 %v7017_v50, %v7017_v50 }
 0x88a   :  { %7844 = vmatprep.subr.bf16.mxu0 %v10568_v31  ;;  %7926 = vmatprep.subr.bf16.mxu1 %v10571_v52 }
 0x88d   :  { %7845 = vmatpush1.bf16.msra.mxu0 %v10566_v53  ;;  %7927 = vmatpush1.bf16.msra.mxu1 %v10569_v54 }
 0x88e   :  { %7846 = vmatprep.subr.bf16.mxu0 %v10574_v55  ;;  %7928 = vmatprep.subr.bf16.mxu1 %v10577_v57 }
 0x891   :  { %7847 = vmatpush1.bf16.msra.mxu0 %v10572_v59  ;;  %7929 = vmatpush1.bf16.msra.mxu1 %v10575_v60 }
 0x892   :  { %7848 = vmatprep.subr.bf16.mxu0 %v10580_v62  ;;  %7930 = vmatprep.subr.bf16.mxu1 %v10583_v63 }
 0x895   :  { %7849 = vmatpush1.bf16.msra.mxu0 %v10578_v0  ;;  %7931 = vmatpush1.bf16.msra.mxu1 %v10581_v10  ;;  %v7964_v10 = vld [vmem:[#allocation2 + $0x7] ss:$8 sm:$0xf] }
 0x896   :  { %7850 = vmatprep.subr.bf16.mxu0 %v10586_v1  ;;  %7932 = vmatprep.subr.bf16.mxu1 %v10589_v2  ;;  %v7995_v2 = vrot.slane %v10972_v42, 2 }
 0x899   :  { %7851 = vmatpush1.bf16.msra.mxu0 %v10584_v3  ;;  %7933 = vmatpush1.bf16.msra.mxu1 %v10587_v14 }
 0x89a   :  { %7852 = vmatprep.subr.bf16.mxu0 %v10592_v4  ;;  %7934 = vmatprep.subr.bf16.mxu1 %v10595_v5 }
 0x89d   :  { %7853 = vmatpush1.bf16.msra.mxu0 %v10590_v6  ;;  %7935 = vmatpush1.bf16.msra.mxu1 %v10593_v7 }
 0x89e   :  { %7854 = vmatprep.subr.bf16.mxu0 %v10598_v8  ;;  %7936 = vmatprep.subr.bf16.mxu1 %v10601_v9 }
 0x8a1   :  { %7855 = vmatpush1.bf16.msra.mxu0 %v10596_v25  ;;  %7937 = vmatpush1.bf16.msra.mxu1 %v10599_v11 }
 0x8a2   :  { %7856 = vmatprep.subr.bf16.mxu0 %v10604_v12  ;;  %7938 = vmatprep.subr.bf16.mxu1 %v10607_v13 }
 0x8a5   :  { %7857 = vmatpush1.bf16.msra.mxu0 %v10602_v15  ;;  %7939 = vmatpush1.bf16.msra.mxu1 %v10605_v16 }
 0x8a6   :  { %7858 = vmatprep.subr.bf16.mxu0 %v10610_v17  ;;  %7940 = vmatprep.subr.bf16.mxu1 %v10613_v32 }
 0x8a9   :  { %7859 = vmatpush1.bf16.msra.mxu0 %v10608_v18  ;;  %7941 = vmatpush1.bf16.msra.mxu1 %v10611_v19 }
 0x8aa   :  { %7860 = vmatprep.subr.bf16.mxu0 %v10616_v20  ;;  %7942 = vmatprep.subr.bf16.mxu1 %v10619_v37 }
 0x8ad   :  { %7861 = vmatpush1.bf16.msra.mxu0 %v10614_v21  ;;  %7943 = vmatpush1.bf16.msra.mxu1 %v10617_v22 }
 0x8ae   :  { %7862 = vmatprep.subr.bf16.mxu0 %v10622_v23  ;;  %7944 = vmatprep.subr.bf16.mxu1 %v10625_v24 }
 0x8b1   :  { %7863 = vmatpush1.bf16.msra.mxu0 %v10620_v26  ;;  %7945 = vmatpush1.bf16.msra.mxu1 %v10623_v27 }
 0x8b2   :  { %7864 = vmatprep.subr.bf16.mxu0 %v10628_v33  ;;  %7946 = vmatprep.subr.bf16.mxu1 %v10631_v34 }
 0x8b5   :  { %7865 = vmatpush1.bf16.msra.mxu0 %v10626_v35  ;;  %7947 = vmatpush1.bf16.msra.mxu1 %v10629_v36 }
 0x8b6   :  { %7866 = vmatprep.subr.bf16.mxu0 %v10634_v38  ;;  %7948 = vmatprep.subr.bf16.mxu1 %v10637_v39 }
 0x8b9   :  { %7867 = vmatpush1.bf16.msra.mxu0 %v10632_v40  ;;  %7949 = vmatpush1.bf16.msra.mxu1 %v10635_v43 }
 0x8ba   :  { %7868 = vmatprep.subr.bf16.mxu0 %v10640_v44  ;;  %7950 = vmatprep.subr.bf16.mxu1 %v10643_v45 }
 0x8bd   :  { %7869 = vmatpush1.bf16.msra.mxu0 %v10638_v56  ;;  %7951 = vmatpush1.bf16.msra.mxu1 %v10641_v46 }
 0x8be   :  { %7870 = vmatprep.subr.bf16.mxu0 %v10646_v47  ;;  %7952 = vmatprep.subr.bf16.mxu1 %v10649_v48 }
 0x8c1   :  { %7871 = vmatpush1.bf16.msra.mxu0 %v10644_v61  ;;  %7953 = vmatpush1.bf16.msra.mxu1 %v10647_v49 }
 0x8c4   :  { %7873 = vmatmul.mubr.bf16.vlgmr.msra.gmra.mrb[28].mxu0 %v7028_v28  ;;  %7955 = vmatmul.mubr.bf16.vlgmr.msra.gmra.mrb[28].mxu1 %v7028_v28 }
 0x997   :  { %v7874_v29 = vpop.f32.mrb[28].mxu0  ;;  %v7956_v51 = vpop.f32.mrb[28].mxu1 }
 0x998   :  { %v7876_v31 = vpop.f32.mrb[29].mxu0  ;;  %v7958_v52 = vpop.f32.mrb[29].mxu1 }
 0x999   :  { %v7969_v53 = vcombine.low %v7874_v29, %v7876_v31  ;;  %v7970_v54 = vcombine.low %v7956_v51, %v7958_v52  ;;  %v7878_v55 = vpop.f32.mrb[30].mxu0  ;;  %v7960_v57 = vpop.f32.mrb[30].mxu1 }
 0x99a   :  { %v7879_v59 = vpop.f32.mrb[31].mxu0  ;;  %v7961_v60 = vpop.f32.mrb[31].mxu1 }
 0x99b   :  { %v7977_v62 = vrot.slane %v7969_v53, %v10881_v58  ;;  %v7984_v63 = vrot.slane %v7970_v54, %v10881_v58 }
 0x99d   :  { %v7985_v41 = vcombine.low %v7977_v62, %v7984_v63 }
 0x99f   :  { %v7992_v0 = vrot.slane %v7985_v41, %v10881_v58 }
 0x9a1   :  { %v7994_v1 = vadd.f32 %v7992_v0, %v7964_v10 }
 0x9a3   :  { %v7997_v3 = vadd.f32 %v7995_v2, %v7994_v1 }
 0x9a5   :  { %7999 = vst.msk [vmem:[#allocation11 + $0x7] ss:$8 sm:$0x3] %vm10857_vm0, %v7997_v3 }
 0x9a6   :  { %10749 = shalt.err (!%p10746_p8)
}
 0x9a7   :  { %s10750_s13 = scalar_lea.hbm %s11007_s4, 256 }
 0x9a8   :  { %p10751_p9 = scmp.ne.s32.totalorder %s11007_s4, %s10750_s13  ;;  %p10754_p10 = scmp.lt.u32.totalorder %s10750_s13, %s11007_s4 }
 0x9aa   :  { %p10756_p11 = pnand %p10754_p10, %p10751_p9 }
 0x9ac   :  { %10759 = shalt.err (!%p10756_p11)
}
 0x9ad   :  { %8010 = dma.vmem_to_hbm [thread:$0]  %s8008_s10, 256, %s11007_s4, [#allocation5]  }
 0x9ae   :  { %10766 = dma.done.wait [#allocation5], 256  }
 0x9af   :  { %10767 = vsyncadd [#allocation5], 4294967040 }
 0x9b0   :  { %8014 = vsyncpa [#allocation4], 1 }
 0x9b1   :  { %8015 = vsyncpa [#allocation7], 1 }
 0x9b2   :  { %8016 = vsyncpa [#allocation10], 1 }
 0x9b3   :  { %8017 = vsyncpa [#allocation5], 1 }

</bundles_post_ra>
